<compile_context>
chip_gen: v5e
topology: v5e:2x2
jax: 0.10.0
libtpu: 0.0.40
codegen_flags: <defaults>
</compile_context>

<pallas_src>
import functools

import jax
import jax.numpy as jnp
from jax.experimental import pallas as pl
from jax.experimental.pallas import tpu as pltpu

C = 64     # fixed by the module: ConvTranspose2d(64, 64, 5, stride=1, padding=2)
K = 5
PAD = 2    # padding of the equivalent forward ("same") correlation


def _deconv_kernel(x_ref, w_ref, b_ref, o_ref, acc_ref, *, H, BT):
    """One (batch-tile, kh) grid step.

    x_ref  : (Hp, BT, Wp*C) bf16  padded activations (H-major, lane-fused)
    w_ref  : (1, Wp*C, W*C) bf16  one kh slab of the banded weight
    b_ref  : (1, W*C)       f32   bias tiled across W
    o_ref  : (H, BT, W*C)         lane-dense output tile
    acc_ref: (H*BT, W*C)    f32   VMEM scratch accumulator
    """
    kh = pl.program_id(1)
    WpC = x_ref.shape[-1]
    WC = o_ref.shape[-1]

    # Major-axis dynamic window -> layout-free flatten -> one fat MXU matmul per kh.
    xs = x_ref[pl.ds(kh, H), :, :].reshape(H * BT, WpC)
    tap = jnp.dot(xs, w_ref[0], preferred_element_type=jnp.float32)

    @pl.when(kh == 0)
    def _():
        acc_ref[...] = tap

    @pl.when(kh != 0)
    def _():
        acc_ref[...] += tap

    @pl.when(kh == pl.num_programs(1) - 1)
    def _():
        o_ref[...] = (acc_ref[...] + b_ref[...]).reshape(H, BT, WC).astype(o_ref.dtype)


def precompute_decoder2_params(w_pt, b_pt, W, dtype=jnp.bfloat16):
    """One-time (per activation width W) banded-weight + bias-row construction.

    w_pt : (64, 64, 5, 5) PyTorch ConvTranspose2d weight (Cin, Cout, kH, kW)
    b_pt : (64,)
    Returns (w_band[K, Wp*C, W*C] in `dtype`, b_row[1, W*C] in f32).
    """
    Wp = W + K - 1
    # ConvTranspose(stride=1, pad=2) == 'same' correlation with flipped kernel and
    # swapped channels: w_conv[kh, kw, ci, co] = w_pt[ci, co, K-1-kh, K-1-kw].
    w_conv = jnp.transpose(w_pt[:, :, ::-1, ::-1], (2, 3, 0, 1))          # (K,K,Ci,Co)

    # Banded weight: W_band[kh, iw*C+ci, ow*C+co] = w_conv[kh, iw-ow, ci, co]
    # for 0 <= iw-ow < K, else 0.
    iw = jnp.arange(Wp)
    ow = jnp.arange(W)
    kw_idx = iw[:, None] - ow[None, :]                                    # (Wp, W)
    valid = (kw_idx >= 0) & (kw_idx < K)
    w_gather = w_conv[:, jnp.clip(kw_idx, 0, K - 1)]                      # (K,Wp,W,Ci,Co)
    w_gather = jnp.where(valid[None, :, :, None, None], w_gather, 0.0)
    w_band = jnp.transpose(w_gather, (0, 1, 3, 2, 4)).reshape(K, Wp * C, W * C)

    b_row = jnp.tile(b_pt.astype(jnp.float32), W).reshape(1, W * C)
    return w_band.astype(dtype), b_row


def _pick_b_tile(N, H):
    # Target MXU M dimension (b_tile * H) in roughly [128, 256].  The batch block
    # dim is second-to-last in the (Hp, BT, Wp*C) layout, so it must be a multiple
    # of 8 or equal to the full batch (fallback).
    best = None
    bt = 8
    while bt <= N:
        if N % bt == 0:
            if bt * H <= 256 or best is None:
                best = bt
            if bt * H > 256:
                break
        bt += 8
    return best if best is not None else N


def decoder2_apply(x_nchw, w_band, b_row, *, b_tile=None):
    """Decoder2.forward with precomputed banded weights.

    x_nchw : (N, 64, H, W) float32  (PyTorch NCHW convention)
    returns: (N, 64, H, W) float32
    """
    N, Cin, H, W = x_nchw.shape
    assert Cin == C
    Hp, Wp = H + K - 1, W + K - 1
    assert w_band.shape == (K, Wp * C, W * C)

    if b_tile is None:
        b_tile = _pick_b_tile(N, H)
    assert N % b_tile == 0

    # --- wrapper-side layout plumbing ------------------------------------------
    # NCHW -> (H, N, W, C), zero-pad both spatial dims, fuse (W, C) onto the lane
    # axis, cast operands to bf16 (f32 accumulation inside the kernel).
    x_hmaj = jnp.transpose(x_nchw, (2, 0, 3, 1))                           # (H,N,W,C)
    x_pad = jnp.pad(x_hmaj, ((PAD, PAD), (0, 0), (PAD, PAD), (0, 0)))
    x_fused = x_pad.reshape(Hp, N, Wp * C).astype(w_band.dtype)

    kernel = functools.partial(_deconv_kernel, H=H, BT=b_tile)

    flops = 2 * N * K * H * (Wp * C) * (W * C)   # counts the structural-zero MACs
    bytes_accessed = (x_fused.size * x_fused.dtype.itemsize
                      + w_band.size * w_band.dtype.itemsize
                      + b_row.size * 4
                      + N * H * W * C * 4)

    out_fused = pl.pallas_call(
        kernel,
        out_shape=jax.ShapeDtypeStruct((H, N, W * C), x_nchw.dtype),
        grid=(N // b_tile, K),
        in_specs=[
            pl.BlockSpec((Hp, b_tile, Wp * C), lambda n, k: (0, n, 0)),
            pl.BlockSpec((1, Wp * C, W * C), lambda n, k: (k, 0, 0)),
            pl.BlockSpec((1, W * C), lambda n, k: (0, 0)),
        ],
        out_specs=pl.BlockSpec((H, b_tile, W * C), lambda n, k: (0, n, 0)),
        scratch_shapes=[pltpu.VMEM((b_tile * H, W * C), jnp.float32)],
        compiler_params=pltpu.CompilerParams(
            dimension_semantics=("parallel", "arbitrary"),
            vmem_limit_bytes=32 * 1024 * 1024,
        ),
        cost_estimate=pl.CostEstimate(
            flops=flops, transcendentals=0, bytes_accessed=bytes_accessed),
    )(x_fused, w_band, b_row)

    # (H, N, W*C) -> (H, N, W, C) -> NCHW.
    return jnp.transpose(out_fused.reshape(H, N, W, C), (1, 3, 0, 2))


def decoder2_forward(x_nchw, w_pt, b_pt, *, b_tile=None):
    """Convenience wrapper: builds the banded weights and applies the kernel."""
    W = x_nchw.shape[-1]
    w_band, b_row = precompute_decoder2_params(w_pt, b_pt, W)
    return decoder2_apply(x_nchw, w_band, b_row, b_tile=b_tile)


def _reference_deconv(x_nchw, w_pt, b_pt):
    """Pure-JAX reference implementing the ConvTranspose2d definition directly."""
    N, Ci, H, W = x_nchw.shape
    xp = jnp.pad(x_nchw, ((0, 0), (0, 0), (PAD, PAD), (PAD, PAD)))
    y = jnp.zeros((N, C, H, W), dtype=jnp.float32)
    # y[n,co,oh,ow] = b[co] + sum_{ci,kh,kw} x[n,ci,oh+2-kh,ow+2-kw] * w[ci,co,kh,kw]
    for kh in range(K):
        for kw in range(K):
            xs = xp[:, :, 2 * PAD - kh:2 * PAD - kh + H, 2 * PAD - kw:2 * PAD - kw + W]
            y = y + jnp.einsum('nchw,cd->ndhw', xs, w_pt[:, :, kh, kw])
    return y + b_pt[None, :, None, None]


if __name__ == "__main__":
    key = jax.random.PRNGKey(0)
    kx, kwt, kb = jax.random.split(key, 3)

    # Small shapes consistent with the module (Cin = Cout = 64 fixed by __init__).
    # N = 16 gives a full MXU M dimension (b_tile*H = 128) in a single batch tile.
    Nb, Hs, Ws = 16, 8, 8
    x = jax.random.normal(kx, (Nb, C, Hs, Ws), dtype=jnp.float32)
    # Deterministic synthetic parameters (scale roughly like PyTorch's default init).
    w = jax.random.normal(kwt, (C, C, K, K), dtype=jnp.float32) * 0.025
    b = jax.random.normal(kb, (C,), dtype=jnp.float32) * 0.025

    # One-time weight prep (banded, bf16); reused across forward calls.
    w_band, b_row = precompute_decoder2_params(w, b, Ws)

    y = decoder2_apply(x, w_band, b_row)
    y = jax.block_until_ready(y)

    # Reference with the same bf16 operand rounding (f32 math) to isolate kernel
    # correctness from the quantization of the operands.
    x_q = x.astype(jnp.bfloat16).astype(jnp.float32)
    w_q = w.astype(jnp.bfloat16).astype(jnp.float32)
    y_ref = _reference_deconv(x_q, w_q, b)

    assert y.shape == (Nb, C, Hs, Ws)
    assert jnp.allclose(y, y_ref, atol=2e-3, rtol=2e-3), "mismatch vs reference"

    print("KERNEL_OK")
</pallas_src>

<mosaic_0001>
module attributes {stable_mosaic.version = 11 : i64} {
  func.func @_deconv_kernel(%arg0: i32, %arg1: i32, %arg2: memref<12x16x768xbf16, #tpu.memory_space<vmem>>, %arg3: memref<1x768x512xbf16, #tpu.memory_space<vmem>>, %arg4: memref<1x512xf32, #tpu.memory_space<vmem>>, %arg5: memref<8x16x512xf32, #tpu.memory_space<vmem>>, %arg6: memref<128x512xf32, #tpu.memory_space<vmem>>) attributes {dimension_semantics = [#tpu.dimension_semantics<parallel>, #tpu.dimension_semantics<arbitrary>], iteration_bounds = array<i64: 1, 5>, scalar_prefetch = 0 : i64, scratch_operands = 1 : i64, tpu.core_type = #tpu.core_type<tc>, window_params = [{transform_indices = @transform_0, window_bounds = array<i64: 12, 16, 768>}, {transform_indices = @transform_1, window_bounds = array<i64: 1, 768, 512>}, {pipeline_mode = #tpu.pipeline_mode<synchronous>, transform_indices = @transform_2, window_bounds = array<i64: 1, 512>}, {transform_indices = @transform_3, window_bounds = array<i64: 8, 16, 512>}]} {
    %0 = arith.index_cast %arg1 : i32 to index
    %c0 = arith.constant 0 : index
    %c0_0 = arith.constant 0 : index
    %1 = vector.load %arg2[%0, %c0, %c0_0] : memref<12x16x768xbf16, #tpu.memory_space<vmem>>, vector<8x16x768xbf16>
    %2 = vector.shape_cast %1 : vector<8x16x768xbf16> to vector<128x768xbf16>
    %c0_1 = arith.constant 0 : index
    %c0_2 = arith.constant 0 : index
    %c0_3 = arith.constant 0 : index
    %3 = vector.load %arg3[%c0_1, %c0_2, %c0_3] : memref<1x768x512xbf16, #tpu.memory_space<vmem>>, vector<1x768x512xbf16>
    %4 = vector.shape_cast %3 : vector<1x768x512xbf16> to vector<768x512xbf16>
    %cst = arith.constant dense<0.000000e+00> : vector<128x512xf32>
    %5 = tpu.matmul %2, %4, %cst {dimension_numbers = #tpu.dot_dimension_numbers<[1], [0], [0], [1], [0, 0, 1, 1], [], []>} : vector<128x768xbf16>, vector<768x512xbf16>, vector<128x512xf32> -> vector<128x512xf32>
    %c0_i32 = arith.constant 0 : i32
    %6 = arith.cmpi eq, %arg1, %c0_i32 : i32
    %7 = arith.extui %6 : i1 to i32
    %c0_i32_4 = arith.constant 0 : i32
    %8 = arith.cmpi ne, %7, %c0_i32_4 : i32
    scf.if %8 {
      %c0_8 = arith.constant 0 : index
      %c0_9 = arith.constant 0 : index
      %15 = vector.load %arg6[%c0_8, %c0_9] : memref<128x512xf32, #tpu.memory_space<vmem>>, vector<128x512xf32>
      tpu.vector_store %arg6[%c0_8, %c0_9], %5 {strides = array<i32>} : memref<128x512xf32, #tpu.memory_space<vmem>>, vector<128x512xf32>,
    } else {
    }
    %c0_i32_5 = arith.constant 0 : i32
    %9 = arith.cmpi ne, %arg1, %c0_i32_5 : i32
    %10 = arith.extui %9 : i1 to i32
    %c0_i32_6 = arith.constant 0 : i32
    %11 = arith.cmpi ne, %10, %c0_i32_6 : i32
    scf.if %11 {
      %c0_8 = arith.constant 0 : index
      %c0_9 = arith.constant 0 : index
      %15 = vector.load %arg6[%c0_8, %c0_9] : memref<128x512xf32, #tpu.memory_space<vmem>>, vector<128x512xf32>
      %16 = arith.addf %15, %5 : vector<128x512xf32>
      %c0_10 = arith.constant 0 : index
      %c0_11 = arith.constant 0 : index
      %17 = vector.load %arg6[%c0_10, %c0_11] : memref<128x512xf32, #tpu.memory_space<vmem>>, vector<128x512xf32>
      tpu.vector_store %arg6[%c0_10, %c0_11], %16 {strides = array<i32>} : memref<128x512xf32, #tpu.memory_space<vmem>>, vector<128x512xf32>,
    } else {
    }
    %c4_i32 = arith.constant 4 : i32
    %12 = arith.cmpi eq, %arg1, %c4_i32 : i32
    %13 = arith.extui %12 : i1 to i32
    %c0_i32_7 = arith.constant 0 : i32
    %14 = arith.cmpi ne, %13, %c0_i32_7 : i32
    scf.if %14 {
      %c0_8 = arith.constant 0 : index
      %c0_9 = arith.constant 0 : index
      %15 = vector.load %arg6[%c0_8, %c0_9] : memref<128x512xf32, #tpu.memory_space<vmem>>, vector<128x512xf32>
      %c0_10 = arith.constant 0 : index
      %c0_11 = arith.constant 0 : index
      %16 = vector.load %arg4[%c0_10, %c0_11] : memref<1x512xf32, #tpu.memory_space<vmem>>, vector<1x512xf32>
      %17 = vector.broadcast %16 : vector<1x512xf32> to vector<128x512xf32>
      %18 = arith.addf %15, %17 : vector<128x512xf32>
      %19 = vector.shape_cast %18 : vector<128x512xf32> to vector<8x16x512xf32>
      %c0_12 = arith.constant 0 : index
      %c0_13 = arith.constant 0 : index
      %c0_14 = arith.constant 0 : index
      %20 = vector.load %arg5[%c0_12, %c0_13, %c0_14] : memref<8x16x512xf32, #tpu.memory_space<vmem>>, vector<8x16x512xf32>
      tpu.vector_store %arg5[%c0_12, %c0_13, %c0_14], %19 {strides = array<i32>} : memref<8x16x512xf32, #tpu.memory_space<vmem>>, vector<8x16x512xf32>,
    } else {
    }
    return
  }
  func.func @transform_0(%arg0: i32, %arg1: i32) -> (i32, i32, i32) {
    %c0_i32 = arith.constant 0 : i32
    %c0_i32_0 = arith.constant 0 : i32
    %c0_i32_1 = arith.constant 0 : i32
    return %c0_i32, %arg0, %c0_i32_0 : i32, i32, i32
  }
  func.func @transform_1(%arg0: i32, %arg1: i32) -> (i32, i32, i32) {
    %c0_i32 = arith.constant 0 : i32
    %c0_i32_0 = arith.constant 0 : i32
    %c0_i32_1 = arith.constant 0 : i32
    return %arg1, %c0_i32, %c0_i32_0 : i32, i32, i32
  }
  func.func @transform_2(%arg0: i32, %arg1: i32) -> (i32, i32) {
    %c0_i32 = arith.constant 0 : i32
    %c0_i32_0 = arith.constant 0 : i32
    %c0_i32_1 = arith.constant 0 : i32
    return %c0_i32, %c0_i32_0 : i32, i32
  }
  func.func @transform_3(%arg0: i32, %arg1: i32) -> (i32, i32, i32) {
    %c0_i32 = arith.constant 0 : i32
    %c0_i32_0 = arith.constant 0 : i32
    %c0_i32_1 = arith.constant 0 : i32
    return %c0_i32, %arg0, %c0_i32_0 : i32, i32, i32
  }
}

</mosaic_0001>

<bundles_post_ra>
// kernel: tpu_custom_call.1
= control target key start
LH: loop header
LB: loop body
LE: loop exit
PB: predicated region body
PF: predicated region fallthrough
CT: control target
= control target key end

     0   :  { %8 = vsyncpa [#allocation4], 0  ;;  %s6373_s0 = inlined_call_operand.hbm [shape: bf16[12,16,768], index: 0, kind: input, shape index: {}]   ;;  %s6374_s1 = inlined_call_operand.hbm [shape: bf16[5,768,512], index: 1, kind: input, shape index: {}]   ;;  %s6375_s2 = inlined_call_operand.hbm [shape: f32[1,512], index: 2, kind: input, shape index: {}]   ;;  %s6376_s3 = inlined_call_operand.hbm [shape: f32[8,16,512], index: 3, kind: output, shape index: {}]  }
   0x1   :  { %9 = vsyncpa [#allocation7], 0 }
   0x2   :  { %11 = vsyncpa [#allocation7 + $0x1], 0 }
   0x3   :  { %12 = vsyncpa [#allocation5], 0  ;;  %s4949_s12 = smov 0   ;;  %s4951_s13 = smov 0  }
   0x4   :  { %s4953_s14 = smov 0   ;;  %s4955_s15 = smov 0  }
   0x5   :  { %s4957_s16 = smov 0   ;;  %s4959_s17 = smov 0  }
   0x6 LB: > { %s4978_s18 = sadd.s32 4294967295, %s4918_s17   ;;  %s63_s19 = sadd.s32 1, %s4906_s14  ;;  %s4918_s17 = sphi %s4959_s17, %s18_s17   ;;  %s4914_s16 = sphi %s4957_s16, %s6560_s16   ;;  %s4910_s15 = sphi %s4955_s15, %s6559_s15   ;;  %s4906_s14 = sphi %s4953_s14, %s6558_s14   ;;  %s4902_s13 = sphi %s4951_s13, %s6557_s13   ;;  %s4898_s12 = sphi %s4949_s12, %s6556_s12  }
   0x7   : > { %p70_p0 = scmp.ne.s32.totalorder %s4906_s14, %s4902_s13  ;;  %p71_p1 = scmp.eq.s32.totalorder %s4918_s17, 0 }
   0x8   : > { %p76_p2 = scmp.ne.s32.totalorder %s4902_s13, %s4898_s12  ;;  %p77_p3 = scmp.eq.s32.totalorder %s4978_s18, 0 }
   0x9   : > { %p4986_p4 = por %p71_p1, %p70_p0  ;;  %p3429_p5 = scmp.ge.s32.totalorder %s4918_s17, 1 }
   0xa   : > { %p4993_p6 = por %p77_p3, %p76_p2  ;;  %p134_p7 = scmp.lt.s32.totalorder %s4918_s17, 6 }
   0xb   : > { %s164_s24 = sshll.u32 %s6375_s2, 4  ;;  %s4920_s26 = smov [#allocation8]   ;;  %s165_s24 = int_to_ptr.hbm [resolvable:$true] %s164_s24 }
   0xc   : > { %p5001_p8 = pnand %p3429_p5, %p134_p7  ;;  %s166_s27 = sshll.u32 %s4920_s26, 4  ;;  %s167_s27 = int_to_ptr.vmem [resolvable:$true] %s166_s27 }
   0xd   : > { %p4676_p10 = scmp.lt.s32.totalorder %s4918_s17, 5  ;;  %s149_s4 = sshll.u32 %s6373_s0, 4  ;;  %s150_s4 = int_to_ptr.hbm [resolvable:$true] %s149_s4 }
   0xe   : > { %p4663_p9 = pneg %p5001_p8  ;;  %s4921_s5 = smov [#allocation3]  }
   0xf   : > { %p5012_p12 = pnand %p4676_p10, %p4986_p4  ;;  %s151_s6 = sshll.u32 %s4921_s5, 4  ;;  %s152_s6 = int_to_ptr.vmem [resolvable:$true] %s151_s6 }
  0x10   : > { %p4664_p11 = pnand %p4663_p9, %p77_p3  ;;  %s4922_s7 = smov 384  }
  0x11   : > { %s4923_s8 = smov 24   ;;  %s177_s9 = sand.u32 1, %s4918_s17  }
  0x12   : > { %4669 = dma.hbm_to_vmem [thread:$0]  (!%p4664_p11), %s165_s24, 64, %s167_s27, [#allocation7]  }
  0x13   : > { %4666 = dma.hbm_to_vmem [thread:$0]  (!%p4664_p11), %s150_s4, 9216, %s152_s6, [#allocation4], %s4922_s7, %s4922_s7, %s4923_s8  }
  0x14   : > { %s27_s10 = sadd.s32 1, %s4914_s16  ;;  %s179_s11 = sand.u32 1, %s4906_s14  }
  0x15   : > { %p28_p13 = scmp.ge.s32.totalorder %s27_s10, 5  ;;  %s4646_s12 = smul.u32 1536, %s179_s11 }
  0x16   : > { %s4647_s20 = smul.u32 1536, %s4914_s16  ;;  %s178_s5 = scalar_lea.sflag [#allocation7], %s177_s9 }
  0x17   : > { %s6562_s10 = smov (%p28_p13, %s27_s10), 0  ;;  %s181_s23 = scalar_lea.vmem [#allocation6], %s4646_s12 }
  0x18   : > { %s60_s22 = ssub.s32 %s4914_s16, %s6562_s10  ;;  %s189_s24 = sshll.u32 %s181_s23, 4  ;;  %s190_s24 = int_to_ptr.vmem [resolvable:$true] %s189_s24 }
  0x19   : > { %p61_p0 = scmp.eq.s32.totalorder %s60_s22, 0  ;;  %s186_s29 = scalar_lea.hbm %s6374_s1, %s4647_s20 }
  0x1a   : > { %s187_s30 = sshll.u32 %s186_s29, 4  ;;  %s4924_s6 = smov 256   ;;  %s188_s30 = int_to_ptr.hbm [resolvable:$true] %s187_s30 }
  0x1b   : > { %s5033_s4 = scalar_select %p61_p0, %s4906_s14, %s63_s19  }
  0x1c   : > { %s4925_s7 = smov 16   ;;  %201 = sbr.rel (%p5001_p8) target bundleno = 1192 (0x4a8), region = 32 }
  0x1d   : > { %4673 = dma.hbm_to_vmem [thread:$0]  (!%p5012_p12), %s188_s30, 24576, %s190_s24, %s178_s5, %s4924_s6, %s4924_s6, %s4925_s7  }
  0x21   : > { %4881 = dma.done.wait (%p77_p3), [#allocation4], 9216  }
  0x22   : > { %4883 = vsyncadd (%p77_p3), [#allocation4], 4294958080  ;;  %s208_s19 = sand.u32 1, %s4978_s18   ;;  %s210_s8 = sand.u32 1, %s4902_s13  }
  0x23   : > { %s4648_s11 = smul.u32 1536, %s210_s8  ;;  %s209_s9 = scalar_lea.sflag [#allocation7], %s208_s19 }
  0x25   : > { %s5045_s12 = scalar_lea.vmem [#allocation6], %s4648_s11 }
  0x26   : > { %4885 = dma.done.wait (%p4993_p6), %s209_s9, 24576  }
  0x27   : > { %4887 = vsyncadd (%p4993_p6), %s209_s9, 4294942720 }
  0x28   : > { %4889 = dma.done.wait (%p77_p3), [#allocation7], 64  }
  0x29   : > { %4891 = vsyncadd (%p77_p3), [#allocation7], 4294967232  ;;  %v3744_v0 = vld [vmem:[%s5045_s12 + $0xe0] sm:$0xf]  ;;  %v4484_v1 = vld [vmem:[%s5045_s12 + $0xec] sm:$0xf0] }
  0x2a   : > { %v3872_v2 = vld [vmem:[%s5045_s12 + $0x1e0] sm:$0xf]  ;;  %v3745_v3 = vor.u32 %v4484_v1, %v3744_v0  ;;  %v4516_v4 = vld [vmem:[%s5045_s12 + $0x1ec] sm:$0xf0]  ;;  %s4405_s21 = smul.u32 48, %s4910_s15  ;;  %p4398_p1 = scmp.ne.s32.totalorder %s4910_s15, 0 }
  0x2b   : > { %v4000_v5 = vld [vmem:[%s5045_s12 + $0x2e0] sm:$0xf]  ;;  %v4548_v6 = vld [vmem:[%s5045_s12 + $0x2ec] sm:$0xf0]  ;;  %v3873_v7 = vor.u32 %v4516_v4, %v3872_v2 }
  0x2c   : > { %v4001_v8 = vor.u32 %v4548_v6, %v4000_v5  ;;  %v4128_v9 = vld [vmem:[%s5045_s12 + $0x3e0] sm:$0xf]  ;;  %v4580_v10 = vld [vmem:[%s5045_s12 + $0x3ec] sm:$0xf0]  ;;  %1681 = vmatpush.bf16.msra.mxu0 %v3745_v3  ;;  %s5122_s25 = scalar_lea.vmem [#allocation3], %s4405_s21 }
  0x2d   : > { %v3728_v11 = vld [vmem:[%s5045_s12 + $0xc0] sm:$0xf]  ;;  %v4129_v12 = vor.u32 %v4580_v10, %v4128_v9  ;;  %v4480_v13 = vld [vmem:[%s5045_s12 + $0xcc] sm:$0xf0]  ;;  %1730 = vmatpush.bf16.msra.mxu1 %v3873_v7 }
  0x2e   : > { %v3856_v14 = vld [vmem:[%s5045_s12 + $0x1c0] sm:$0xf]  ;;  %v4512_v15 = vld [vmem:[%s5045_s12 + $0x1cc] sm:$0xf0]  ;;  %1779 = vmatpush.bf16.msra.mxu2 %v4001_v8  ;;  %v3729_v16 = vor.u32 %v4480_v13, %v3728_v11 }
  0x2f   : > { %v3857_v17 = vor.u32 %v4512_v15, %v3856_v14  ;;  %v3984_v18 = vld [vmem:[%s5045_s12 + $0x2c0] sm:$0xf]  ;;  %v4544_v19 = vld [vmem:[%s5045_s12 + $0x2cc] sm:$0xf0]  ;;  %1828 = vmatpush.bf16.msra.mxu3 %v4129_v12 }
  0x30   : > { %v4112_v20 = vld [vmem:[%s5045_s12 + $0x3c0] sm:$0xf]  ;;  %v3985_v21 = vor.u32 %v4544_v19, %v3984_v18  ;;  %v4576_v22 = vld [vmem:[%s5045_s12 + $0x3cc] sm:$0xf0]  ;;  %1682 = vmatpush.bf16.msra.mxu0 %v3729_v16 }
  0x31   : > { %v3712_v23 = vld [vmem:[%s5045_s12 + $0xa0] sm:$0xf]  ;;  %v4476_v24 = vld [vmem:[%s5045_s12 + $0xac] sm:$0xf0]  ;;  %v4113_v25 = vor.u32 %v4576_v22, %v4112_v20  ;;  %1731 = vmatpush.bf16.msra.mxu1 %v3857_v17 }
  0x32   : > { %v3840_v26 = vld [vmem:[%s5045_s12 + $0x1a0] sm:$0xf]  ;;  %v4508_v27 = vld [vmem:[%s5045_s12 + $0x1ac] sm:$0xf0]  ;;  %v3713_v29 = vor.u32 %v4476_v24, %v3712_v23  ;;  %1780 = vmatpush.bf16.msra.mxu2 %v3985_v21 }
  0x33   : > { %v3968_v28 = vld [vmem:[%s5045_s12 + $0x2a0] sm:$0xf]  ;;  %v4540_v30 = vld [vmem:[%s5045_s12 + $0x2ac] sm:$0xf0]  ;;  %v3841_v33 = vor.u32 %v4508_v27, %v3840_v26  ;;  %1829 = vmatpush.bf16.msra.mxu3 %v4113_v25 }
  0x34   : > { %v4096_v31 = vld [vmem:[%s5045_s12 + $0x3a0] sm:$0xf]  ;;  %v4572_v32 = vld [vmem:[%s5045_s12 + $0x3ac] sm:$0xf0]  ;;  %v3969_v34 = vor.u32 %v4540_v30, %v3968_v28  ;;  %1683 = vmatpush.bf16.msra.mxu0 %v3713_v29  ;;  %v4409_v29 = vld [vmem:[%s5122_s25 + $0x14] sm:$0xf0] }
  0x35   : > { %v3696_v35 = vld [vmem:[%s5045_s12 + $0x80] sm:$0xf]  ;;  %v4472_v36 = vld [vmem:[%s5045_s12 + $0x8c] sm:$0xf0]  ;;  %v4097_v38 = vor.u32 %v4572_v32, %v4096_v31  ;;  %1732 = vmatpush.bf16.msra.mxu1 %v3841_v33  ;;  %v4406_v30 = vld [vmem:[%s5122_s25 + $0x4] sm:$0xf] }
  0x36   : > { %v3824_v37 = vld [vmem:[%s5045_s12 + $0x180] sm:$0xf]  ;;  %v4504_v39 = vld [vmem:[%s5045_s12 + $0x18c] sm:$0xf0]  ;;  %v3697_v44 = vor.u32 %v4472_v36, %v3696_v35  ;;  %1781 = vmatpush.bf16.msra.mxu2 %v3969_v34  ;;  %v3442_v31 = vld [vmem:[%s5122_s25 + $0x18] sm:$0xf0] }
  0x37   : > { %v3952_v40 = vld [vmem:[%s5045_s12 + $0x280] sm:$0xf]  ;;  %v4536_v41 = vld [vmem:[%s5045_s12 + $0x28c] sm:$0xf0]  ;;  %v3825_v45 = vor.u32 %v4504_v39, %v3824_v37  ;;  %1830 = vmatpush.bf16.msra.mxu3 %v4097_v38  ;;  %v4482_v32 = vld [vmem:[%s5045_s12 + $0xe4] sm:$0xf] }
  0x38   : > { %v4080_v42 = vld [vmem:[%s5045_s12 + $0x380] sm:$0xf]  ;;  %v4568_v43 = vld [vmem:[%s5045_s12 + $0x38c] sm:$0xf0]  ;;  %v3953_v46 = vor.u32 %v4536_v41, %v3952_v40  ;;  %1684 = vmatpush.bf16.msra.mxu0 %v3697_v44  ;;  %v3746_v33 = vld [vmem:[%s5045_s12 + $0xf0] sm:$0xf0] }
  0x39   : > { %v3680_v47 = vld [vmem:[%s5045_s12 + $0x60] sm:$0xf]  ;;  %v4468_v48 = vld [vmem:[%s5045_s12 + $0x6c] sm:$0xf0]  ;;  %v4081_v50 = vor.u32 %v4568_v43, %v4080_v42  ;;  %1733 = vmatpush.bf16.msra.mxu1 %v3825_v45  ;;  %v3448_v35 = vld [vmem:[%s5122_s25 + $0x8] sm:$0xf]  ;;  %v3749_v44 = vor.u32 %v4482_v32, %v3746_v33 }
  0x3a   : > { %v3808_v49 = vld [vmem:[%s5045_s12 + $0x160] sm:$0xf]  ;;  %v4500_v51 = vld [vmem:[%s5045_s12 + $0x16c] sm:$0xf0]  ;;  %v3681_v56 = vor.u32 %v4468_v48, %v3680_v47  ;;  %1782 = vmatpush.bf16.msra.mxu2 %v3953_v46  ;;  %v4514_v36 = vld [vmem:[%s5045_s12 + $0x1e4] sm:$0xf] }
  0x3b   : > { %v3936_v52 = vld [vmem:[%s5045_s12 + $0x260] sm:$0xf]  ;;  %v4532_v53 = vld [vmem:[%s5045_s12 + $0x26c] sm:$0xf0]  ;;  %v3809_v57 = vor.u32 %v4500_v51, %v3808_v49  ;;  %1831 = vmatpush.bf16.msra.mxu3 %v4081_v50  ;;  %v3874_v37 = vld [vmem:[%s5045_s12 + $0x1f0] sm:$0xf0] }
  0x3c   : > { %v4064_v54 = vld [vmem:[%s5045_s12 + $0x360] sm:$0xf]  ;;  %v4564_v55 = vld [vmem:[%s5045_s12 + $0x36c] sm:$0xf0]  ;;  %v3937_v58 = vor.u32 %v4532_v53, %v3936_v52  ;;  %1685 = vmatpush.bf16.msra.mxu0 %v3681_v56  ;;  %v4407_v41 = vld [vmem:[%s5122_s25 + $0xc] sm:$0xf]  ;;  %v3877_v49 = vor.u32 %v4514_v36, %v3874_v37  ;;  %v5144_v53 = vor.u32 %v4406_v30, %v3442_v31 }
  0x3d   : > { %v3664_v59 = vld [vmem:[%s5045_s12 + $0x40] sm:$0xf]  ;;  %v4464_v60 = vld [vmem:[%s5045_s12 + $0x4c] sm:$0xf0]  ;;  %v4065_v62 = vor.u32 %v4564_v55, %v4064_v54  ;;  %1734 = vmatpush.bf16.msra.mxu1 %v3809_v57  ;;  %v3450_v42 = vld [vmem:[%s5122_s25 + $0x20] sm:$0xf0] }
  0x3e   : > { %v3792_v61 = vld [vmem:[%s5045_s12 + $0x140] sm:$0xf]  ;;  %v4496_v63 = vld [vmem:[%s5045_s12 + $0x14c] sm:$0xf0]  ;;  %v3665_v4 = vor.u32 %v4464_v60, %v3664_v59  ;;  %1783 = vmatpush.bf16.msra.mxu2 %v3937_v58  ;;  %v4478_v51 = vld [vmem:[%s5045_s12 + $0xc4] sm:$0xf]  ;;  %v5150_v57 = vor.u32 %v4407_v41, %v3450_v42 }
  0x3f   : > { %v3920_v0 = vld [vmem:[%s5045_s12 + $0x240] sm:$0xf]  ;;  %v4528_v1 = vld [vmem:[%s5045_s12 + $0x24c] sm:$0xf0]  ;;  %v3793_v5 = vor.u32 %v4496_v63, %v3792_v61  ;;  %1832 = vmatpush.bf16.msra.mxu3 %v4065_v62  ;;  %v3730_v52 = vld [vmem:[%s5045_s12 + $0xd0] sm:$0xf0] }
  0x40   : > { %v4048_v2 = vld [vmem:[%s5045_s12 + $0x340] sm:$0xf]  ;;  %v4560_v3 = vld [vmem:[%s5045_s12 + $0x34c] sm:$0xf0]  ;;  %v3921_v6 = vor.u32 %v4528_v1, %v3920_v0  ;;  %1686 = vmatpush.bf16.msra.mxu0 %v3665_v4  ;;  %6420 = vst [vmem:[#allocation15_spill] sm:$0xff] %v5144_v53  ;;  %v3733_v60 = vor.u32 %v4478_v51, %v3730_v52 }
  0x41   : > { %v3648_v7 = vld [vmem:[%s5045_s12 + $0x20] sm:$0xf]  ;;  %v4460_v8 = vld [vmem:[%s5045_s12 + $0x2c] sm:$0xf0]  ;;  %v4049_v10 = vor.u32 %v4560_v3, %v4048_v2  ;;  %1735 = vmatpush.bf16.msra.mxu1 %v3793_v5  ;;  %v4510_v55 = vld [vmem:[%s5045_s12 + $0x1c4] sm:$0xf] }
  0x42   : > { %v3776_v9 = vld [vmem:[%s5045_s12 + $0x120] sm:$0xf]  ;;  %v4492_v11 = vld [vmem:[%s5045_s12 + $0x12c] sm:$0xf0]  ;;  %v3649_v17 = vor.u32 %v4460_v8, %v3648_v7  ;;  %1784 = vmatpush.bf16.msra.mxu2 %v3921_v6  ;;  %v3858_v56 = vld [vmem:[%s5045_s12 + $0x1d0] sm:$0xf0] }
  0x43   : > { %v3904_v12 = vld [vmem:[%s5045_s12 + $0x220] sm:$0xf]  ;;  %v4524_v13 = vld [vmem:[%s5045_s12 + $0x22c] sm:$0xf0]  ;;  %v3777_v21 = vor.u32 %v4492_v11, %v3776_v9  ;;  %1833 = vmatpush.bf16.msra.mxu3 %v4049_v10  ;;  %6422 = vst [vmem:[#allocation17_spill] sm:$0xff] %v5150_v57  ;;  %v3861_v63 = vor.u32 %v4510_v55, %v3858_v56 }
  0x44   : > { %v4032_v14 = vld [vmem:[%s5045_s12 + $0x320] sm:$0xf]  ;;  %v4556_v15 = vld [vmem:[%s5045_s12 + $0x32c] sm:$0xf0]  ;;  %v3905_v22 = vor.u32 %v4524_v13, %v3904_v12  ;;  %1687 = vmatpush.bf16.msra.mxu0 %v3649_v17  ;;  %v4474_v3 = vld [vmem:[%s5045_s12 + $0xa4] sm:$0xf] }
  0x45   : > { %v3632_v16 = vld [vmem:[%s5045_s12] sm:$0xf]  ;;  %v4456_v18 = vld [vmem:[%s5045_s12 + $0xc] sm:$0xf0]  ;;  %v4033_v26 = vor.u32 %v4556_v15, %v4032_v14  ;;  %1736 = vmatpush.bf16.msra.mxu1 %v3777_v21  ;;  %v3714_v4 = vld [vmem:[%s5045_s12 + $0xb0] sm:$0xf0] }
  0x46   : > { %v3760_v19 = vld [vmem:[%s5045_s12 + $0x100] sm:$0xf]  ;;  %v4488_v20 = vld [vmem:[%s5045_s12 + $0x10c] sm:$0xf0]  ;;  %v3633_v34 = vor.u32 %v4456_v18, %v3632_v16  ;;  %1785 = vmatpush.bf16.msra.mxu2 %v3905_v22  ;;  %v3717_v7 = vor.u32 %v4474_v3, %v3714_v4  ;;  %v4506_v9 = vld [vmem:[%s5045_s12 + $0x1a4] sm:$0xf] }
  0x47   : > { %v3888_v23 = vld [vmem:[%s5045_s12 + $0x200] sm:$0xf]  ;;  %v4520_v24 = vld [vmem:[%s5045_s12 + $0x20c] sm:$0xf0]  ;;  %v3761_v38 = vor.u32 %v4488_v20, %v3760_v19  ;;  %1834 = vmatpush.bf16.msra.mxu3 %v4033_v26  ;;  %v3842_v10 = vld [vmem:[%s5045_s12 + $0x1b0] sm:$0xf0] }
  0x48   : > { %v4016_v25 = vld [vmem:[%s5045_s12 + $0x300] sm:$0xf]  ;;  %v4552_v27 = vld [vmem:[%s5045_s12 + $0x30c] sm:$0xf0]  ;;  %v3889_v39 = vor.u32 %v4520_v24, %v3888_v23  ;;  %1688 = vmatpush.bf16.msra.mxu0 %v3633_v34  ;;  %v3845_v11 = vor.u32 %v4506_v9, %v3842_v10  ;;  %v4415_v17 = vld [vmem:[%s5122_s25 + $0x44] sm:$0xf0] }
  0x49   : > { %v3440_v28 = vld [vmem:[%s5122_s25] sm:$0xf]  ;;  %v4017_v43 = vor.u32 %v4552_v27, %v4016_v25  ;;  %v4612_v46 = vld [vmem:[%s5045_s12 + $0x4ec] sm:$0xf0]  ;;  %1737 = vmatpush.bf16.msra.mxu1 %v3761_v38  ;;  %v4412_v18 = vld [vmem:[%s5122_s25 + $0x34] sm:$0xf] }
  0x4a   : > { %v4410_v40 = vld [vmem:[%s5122_s25 + $0x1c] sm:$0xf0]  ;;  %v5139_v48 = vor.u32 %v4409_v29, %v3440_v28  ;;  %v4644_v50 = vld [vmem:[%s5045_s12 + $0x5ec] sm:$0xf0]  ;;  %1786 = vmatpush.bf16.msra.mxu2 %v3889_v39  ;;  %v3466_v19 = vld [vmem:[%s5122_s25 + $0x48] sm:$0xf0] }
  0x4b   : > { %v4256_v45 = vld [vmem:[%s5045_s12 + $0x4e0] sm:$0xf]  ;;  %v5146_v54 = vor.u32 %v4410_v40, %v3448_v35  ;;  %1835 = vmatpush.bf16.msra.mxu3 %v4017_v43  ;;  %v4608_v62 = vld [vmem:[%s5045_s12 + $0x4cc] sm:$0xf0]  ;;  %v3472_v20 = vld [vmem:[%s5122_s25 + $0x38] sm:$0xf]  ;;  %v5178_v25 = vor.u32 %v4412_v18, %v3466_v19 }
  0x4c   : > { %v4384_v47 = vld [vmem:[%s5045_s12 + $0x5e0] sm:$0xf]  ;;  %6419 = vst [vmem:[#allocation14_spill] sm:$0xff] %v5139_v48  ;;  %v4257_v58 = vor.u32 %v4612_v46, %v4256_v45  ;;  %1689 = vmatmul.bf16.vlgmr.msra.gmra.mxu0 %v5139_v48  ;;  %v4640_v1 = vld [vmem:[%s5045_s12 + $0x5cc] sm:$0xf0]  ;;  %1738 = vmatmul.bf16.vlgmr.msra.gmra.mxu1 %v5144_v53 }
  0x4d   : > { %6421 = vst [vmem:[#allocation16_spill] sm:$0xff] %v5146_v54  ;;  %v4385_v59 = vor.u32 %v4644_v50, %v4384_v47  ;;  %v4240_v61 = vld [vmem:[%s5045_s12 + $0x4c0] sm:$0xf]  ;;  %1787 = vmatmul.bf16.vlgmr.msra.gmra.mxu2 %v5146_v54  ;;  %v4604_v8 = vld [vmem:[%s5045_s12 + $0x4ac] sm:$0xf0] }
  0x4e   : > { %1975 = vmatpush.bf16.msrb.mxu2 %v3749_v44  ;;  %v4368_v0 = vld [vmem:[%s5045_s12 + $0x5c0] sm:$0xf]  ;;  %1836 = vmatmul.bf16.vlgmr.msra.gmra.mxu3 %v5150_v57  ;;  %v4241_v2 = vor.u32 %v4608_v62, %v4240_v61  ;;  %v4636_v13 = vld [vmem:[%s5045_s12 + $0x5ac] sm:$0xf0]  ;;  %v4413_v22 = vld [vmem:[%s5122_s25 + $0x3c] sm:$0xf] }
  0x4f   : > { %2024 = vmatpush.bf16.msrb.mxu3 %v3877_v49  ;;  %1877 = vmatpush.bf16.msrb.mxu0 %v4257_v58  ;;  %v4224_v5 = vld [vmem:[%s5045_s12 + $0x4a0] sm:$0xf]  ;;  %v4369_v6 = vor.u32 %v4640_v1, %v4368_v0  ;;  %v3464_v16 = vld [vmem:[%s5122_s25 + $0x30] sm:$0xf]  ;;  %v3474_v23 = vld [vmem:[%s5122_s25 + $0x50] sm:$0xf0] }
  0x50   : > { %1926 = vmatpush.bf16.msrb.mxu1 %v4385_v59  ;;  %v4352_v12 = vld [vmem:[%s5045_s12 + $0x5a0] sm:$0xf]  ;;  %v4225_v14 = vor.u32 %v4604_v8, %v4224_v5  ;;  %v4416_v21 = vld [vmem:[%s5122_s25 + $0x4c] sm:$0xf0]  ;;  %v5176_v24 = vor.u32 %v4415_v17, %v3464_v16  ;;  %6424 = vst [vmem:[#allocation19_spill] sm:$0xff] %v5178_v25  ;;  %v5182_v27 = vor.u32 %v4413_v22, %v3474_v23 }
  0x51   : > { %v4353_v15 = vor.u32 %v4636_v13, %v4352_v12  ;;  %v5180_v26 = vor.u32 %v4416_v21, %v3472_v20  ;;  %v4470_v28 = vld [vmem:[%s5045_s12 + $0x84] sm:$0xf]  ;;  %v3698_v29 = vld [vmem:[%s5045_s12 + $0x90] sm:$0xf0]  ;;  %v4208_v30 = vld [vmem:[%s5045_s12 + $0x480] sm:$0xf] }
  0x52   : > { %1976 = vmatpush.bf16.msrb.mxu2 %v3733_v60  ;;  %6423 = vst [vmem:[#allocation18_spill] sm:$0xff] %v5176_v24  ;;  %v3701_v31 = vor.u32 %v4470_v28, %v3698_v29  ;;  %v4600_v32 = vld [vmem:[%s5045_s12 + $0x48c] sm:$0xf0]  ;;  %v4502_v33 = vld [vmem:[%s5045_s12 + $0x184] sm:$0xf] }
  0x53   : > { %2025 = vmatpush.bf16.msrb.mxu3 %v3861_v63  ;;  %1878 = vmatpush.bf16.msrb.mxu0 %v4241_v2  ;;  %v3826_v34 = vld [vmem:[%s5045_s12 + $0x190] sm:$0xf0]  ;;  %v4209_v35 = vor.u32 %v4600_v32, %v4208_v30  ;;  %v4336_v37 = vld [vmem:[%s5045_s12 + $0x580] sm:$0xf]  ;;  %v4632_v38 = vld [vmem:[%s5045_s12 + $0x58c] sm:$0xf0] }
  0x54   : > { %1927 = vmatpush.bf16.msrb.mxu1 %v4369_v6  ;;  %v3829_v36 = vor.u32 %v4502_v33, %v3826_v34  ;;  %v4337_v39 = vor.u32 %v4632_v38, %v4336_v37  ;;  %v3488_v40 = vld [vmem:[%s5122_s25 + $0x60] sm:$0xf]  ;;  %v4421_v41 = vld [vmem:[%s5122_s25 + $0x74] sm:$0xf0]  ;;  %v4418_v42 = vld [vmem:[%s5122_s25 + $0x64] sm:$0xf] }
  0x55   : > { %v3490_v43 = vld [vmem:[%s5122_s25 + $0x78] sm:$0xf0]  ;;  %v3496_v44 = vld [vmem:[%s5122_s25 + $0x68] sm:$0xf]  ;;  %v4422_v45 = vld [vmem:[%s5122_s25 + $0x7c] sm:$0xf0]  ;;  %v5204_v49 = vor.u32 %v4421_v41, %v3488_v40 }
  0x56   : > { %1977 = vmatpush.bf16.msrb.mxu2 %v3717_v7  ;;  %v4419_v46 = vld [vmem:[%s5122_s25 + $0x6c] sm:$0xf]  ;;  %v3498_v47 = vld [vmem:[%s5122_s25 + $0x80] sm:$0xf0]  ;;  %v5206_v50 = vor.u32 %v4418_v42, %v3490_v43  ;;  %v5208_v51 = vor.u32 %v4422_v45, %v3496_v44  ;;  %v3682_v56 = vld [vmem:[%s5045_s12 + $0x70] sm:$0xf0] }
  0x57   : > { %2026 = vmatpush.bf16.msrb.mxu3 %v3845_v11  ;;  %1879 = vmatpush.bf16.msrb.mxu0 %v4225_v14  ;;  %6425 = vst [vmem:[#allocation20_spill] sm:$0xff] %v5204_v49  ;;  %v5210_v52 = vor.u32 %v4419_v46, %v3498_v47  ;;  %v4466_v55 = vld [vmem:[%s5045_s12 + $0x64] sm:$0xf]  ;;  %v4192_v58 = vld [vmem:[%s5045_s12 + $0x460] sm:$0xf] }
  0x58   : > { %1928 = vmatpush.bf16.msrb.mxu1 %v4353_v15  ;;  %6426 = vst [vmem:[#allocation21_spill] sm:$0xff] %v5206_v50  ;;  %v3685_v59 = vor.u32 %v4466_v55, %v3682_v56  ;;  %v4596_v60 = vld [vmem:[%s5045_s12 + $0x46c] sm:$0xf0]  ;;  %v4498_v61 = vld [vmem:[%s5045_s12 + $0x164] sm:$0xf] }
  0x59   : > { %v3810_v62 = vld [vmem:[%s5045_s12 + $0x170] sm:$0xf0]  ;;  %v4193_v63 = vor.u32 %v4596_v60, %v4192_v58  ;;  %v4320_v1 = vld [vmem:[%s5045_s12 + $0x560] sm:$0xf]  ;;  %v4628_v2 = vld [vmem:[%s5045_s12 + $0x56c] sm:$0xf0] }
  0x5a   : > { %1978 = vmatpush.bf16.msrb.mxu2 %v3701_v31  ;;  %v3813_v0 = vor.u32 %v4498_v61, %v3810_v62  ;;  %v4321_v3 = vor.u32 %v4628_v2, %v4320_v1  ;;  %v3512_v4 = vld [vmem:[%s5122_s25 + $0x90] sm:$0xf]  ;;  %v4427_v5 = vld [vmem:[%s5122_s25 + $0xa4] sm:$0xf0]  ;;  %v4424_v6 = vld [vmem:[%s5122_s25 + $0x94] sm:$0xf] }
  0x5b   : > { %1880 = vmatpush.bf16.msrb.mxu0 %v4209_v35  ;;  %2027 = vmatpush.bf16.msrb.mxu3 %v3829_v36  ;;  %v3514_v7 = vld [vmem:[%s5122_s25 + $0xa8] sm:$0xf0]  ;;  %v3520_v8 = vld [vmem:[%s5122_s25 + $0x98] sm:$0xf]  ;;  %v4428_v9 = vld [vmem:[%s5122_s25 + $0xac] sm:$0xf0]  ;;  %v5232_v12 = vor.u32 %v4427_v5, %v3512_v4 }
  0x5c   : > { %1694 = vmatmul.bf16.gmra.mxu0 %v5176_v24  ;;  %1743 = vmatmul.bf16.gmra.mxu1 %v5178_v25  ;;  %v4425_v10 = vld [vmem:[%s5122_s25 + $0x9c] sm:$0xf]  ;;  %v3522_v11 = vld [vmem:[%s5122_s25 + $0xb0] sm:$0xf0]  ;;  %v5234_v13 = vor.u32 %v4424_v6, %v3514_v7  ;;  %v5236_v14 = vor.u32 %v4428_v9, %v3520_v8  ;;  %v4462_v16 = vld [vmem:[%s5045_s12 + $0x44] sm:$0xf] }
  0x5d   : > { %1792 = vmatmul.bf16.gmra.mxu2 %v5180_v26  ;;  %1929 = vmatpush.bf16.msrb.mxu1 %v4337_v39  ;;  %6427 = vst [vmem:[#allocation22_spill] sm:$0xff] %v5232_v12  ;;  %v5238_v15 = vor.u32 %v4425_v10, %v3522_v11  ;;  %v3666_v17 = vld [vmem:[%s5045_s12 + $0x50] sm:$0xf0]  ;;  %v4176_v18 = vld [vmem:[%s5045_s12 + $0x440] sm:$0xf] }
  0x5e   : > { %1841 = vmatmul.bf16.gmra.mxu3 %v5182_v27  ;;  %1979 = vmatpush.bf16.msrb.mxu2 %v3685_v59  ;;  %6428 = vst [vmem:[#allocation23_spill] sm:$0xff] %v5234_v13  ;;  %v3669_v19 = vor.u32 %v4462_v16, %v3666_v17  ;;  %v4592_v20 = vld [vmem:[%s5045_s12 + $0x44c] sm:$0xf0]  ;;  %v4494_v21 = vld [vmem:[%s5045_s12 + $0x144] sm:$0xf] }
  0x5f   : > { %1881 = vmatpush.bf16.msrb.mxu0 %v4193_v63  ;;  %2028 = vmatpush.bf16.msrb.mxu3 %v3813_v0  ;;  %v3794_v22 = vld [vmem:[%s5045_s12 + $0x150] sm:$0xf0]  ;;  %v4177_v23 = vor.u32 %v4592_v20, %v4176_v18  ;;  %v4304_v29 = vld [vmem:[%s5045_s12 + $0x540] sm:$0xf]  ;;  %v4624_v30 = vld [vmem:[%s5045_s12 + $0x54c] sm:$0xf0] }
  0x60   : > { %v3797_v28 = vor.u32 %v4494_v21, %v3794_v22  ;;  %v4305_v31 = vor.u32 %v4624_v30, %v4304_v29  ;;  %v3536_v32 = vld [vmem:[%s5122_s25 + $0xc0] sm:$0xf]  ;;  %v4433_v33 = vld [vmem:[%s5122_s25 + $0xd4] sm:$0xf0]  ;;  %v4430_v34 = vld [vmem:[%s5122_s25 + $0xc4] sm:$0xf] }
  0x61   : > { %1930 = vmatpush.bf16.msrb.mxu1 %v4321_v3  ;;  %v3538_v35 = vld [vmem:[%s5122_s25 + $0xd8] sm:$0xf0]  ;;  %v3544_v36 = vld [vmem:[%s5122_s25 + $0xc8] sm:$0xf]  ;;  %v4434_v37 = vld [vmem:[%s5122_s25 + $0xdc] sm:$0xf0]  ;;  %v5260_v40 = vor.u32 %v4433_v33, %v3536_v32 }
  0x62   : > { %1980 = vmatpush.bf16.msrb.mxu2 %v3669_v19  ;;  %v4431_v38 = vld [vmem:[%s5122_s25 + $0xcc] sm:$0xf]  ;;  %v3546_v39 = vld [vmem:[%s5122_s25 + $0xe0] sm:$0xf0]  ;;  %v5262_v41 = vor.u32 %v4430_v34, %v3538_v35  ;;  %v5264_v42 = vor.u32 %v4434_v37, %v3544_v36  ;;  %v3650_v45 = vld [vmem:[%s5045_s12 + $0x30] sm:$0xf0] }
  0x63   : > { %1882 = vmatpush.bf16.msrb.mxu0 %v4177_v23  ;;  %2029 = vmatpush.bf16.msrb.mxu3 %v3797_v28  ;;  %6429 = vst [vmem:[#allocation24_spill] sm:$0xff] %v5260_v40  ;;  %v5266_v43 = vor.u32 %v4431_v38, %v3546_v39  ;;  %v4458_v44 = vld [vmem:[%s5045_s12 + $0x24] sm:$0xf]  ;;  %v4160_v46 = vld [vmem:[%s5045_s12 + $0x420] sm:$0xf] }
  0x64   : > { %6430 = vst [vmem:[#allocation25_spill] sm:$0xff] %v5262_v41  ;;  %v3653_v47 = vor.u32 %v4458_v44, %v3650_v45  ;;  %v4588_v55 = vld [vmem:[%s5045_s12 + $0x42c] sm:$0xf0]  ;;  %v4490_v56 = vld [vmem:[%s5045_s12 + $0x124] sm:$0xf] }
  0x65   : > { %1931 = vmatpush.bf16.msrb.mxu1 %v4305_v31  ;;  %v3778_v58 = vld [vmem:[%s5045_s12 + $0x130] sm:$0xf0]  ;;  %v4161_v59 = vor.u32 %v4588_v55, %v4160_v46  ;;  %v4288_v61 = vld [vmem:[%s5045_s12 + $0x520] sm:$0xf]  ;;  %v4620_v62 = vld [vmem:[%s5045_s12 + $0x52c] sm:$0xf0] }
  0x66   : > { %v3781_v60 = vor.u32 %v4490_v56, %v3778_v58  ;;  %1981 = vmatpush.bf16.msrb.mxu2 %v3653_v47  ;;  %v4289_v63 = vor.u32 %v4620_v62, %v4288_v61  ;;  %v3560_v0 = vld [vmem:[%s5122_s25 + $0xf0] sm:$0xf]  ;;  %v4439_v1 = vld [vmem:[%s5122_s25 + $0x104] sm:$0xf0]  ;;  %v4436_v2 = vld [vmem:[%s5122_s25 + $0xf4] sm:$0xf] }
  0x67   : > { %1883 = vmatpush.bf16.msrb.mxu0 %v4161_v59  ;;  %v3562_v3 = vld [vmem:[%s5122_s25 + $0x108] sm:$0xf0]  ;;  %v3568_v4 = vld [vmem:[%s5122_s25 + $0xf8] sm:$0xf]  ;;  %v4440_v5 = vld [vmem:[%s5122_s25 + $0x10c] sm:$0xf0]  ;;  %v5288_v8 = vor.u32 %v4439_v1, %v3560_v0 }
  0x68   : > { %2030 = vmatpush.bf16.msrb.mxu3 %v3781_v60  ;;  %v4437_v6 = vld [vmem:[%s5122_s25 + $0xfc] sm:$0xf]  ;;  %v3570_v7 = vld [vmem:[%s5122_s25 + $0x110] sm:$0xf0]  ;;  %v5290_v9 = vor.u32 %v4436_v2, %v3562_v3  ;;  %v5292_v10 = vor.u32 %v4440_v5, %v3568_v4  ;;  %v4454_v16 = vld [vmem:[%s5045_s12 + $0x4] sm:$0xf] }
  0x69   : > { %1932 = vmatpush.bf16.msrb.mxu1 %v4289_v63  ;;  %6431 = vst [vmem:[#allocation26_spill] sm:$0xff] %v5288_v8  ;;  %v5294_v11 = vor.u32 %v4437_v6, %v3570_v7  ;;  %v3634_v17 = vld [vmem:[%s5045_s12 + $0x10] sm:$0xf0]  ;;  %v4144_v18 = vld [vmem:[%s5045_s12 + $0x400] sm:$0xf] }
  0x6a   : > { %6432 = vst [vmem:[#allocation27_spill] sm:$0xff] %v5290_v9  ;;  %v3637_v19 = vor.u32 %v4454_v16, %v3634_v17  ;;  %v4584_v20 = vld [vmem:[%s5045_s12 + $0x40c] sm:$0xf0]  ;;  %v4486_v21 = vld [vmem:[%s5045_s12 + $0x104] sm:$0xf] }
  0x6b   : > { %v3762_v22 = vld [vmem:[%s5045_s12 + $0x110] sm:$0xf0]  ;;  %v4145_v23 = vor.u32 %v4584_v20, %v4144_v18  ;;  %v4272_v29 = vld [vmem:[%s5045_s12 + $0x500] sm:$0xf]  ;;  %v4616_v30 = vld [vmem:[%s5045_s12 + $0x50c] sm:$0xf0] }
  0x6c   : > { %1699 = vmatmul.bf16.gmra.mxu0 %v5204_v49  ;;  %1748 = vmatmul.bf16.gmra.mxu1 %v5206_v50  ;;  %v3765_v28 = vor.u32 %v4486_v21, %v3762_v22  ;;  %v4273_v31 = vor.u32 %v4616_v30, %v4272_v29  ;;  %v3584_v32 = vld [vmem:[%s5122_s25 + $0x120] sm:$0xf]  ;;  %v4445_v33 = vld [vmem:[%s5122_s25 + $0x134] sm:$0xf0]  ;;  %v4442_v34 = vld [vmem:[%s5122_s25 + $0x124] sm:$0xf] }
  0x6d   : > { %1797 = vmatmul.bf16.gmra.mxu2 %v5208_v51  ;;  %1884 = vmatpush.bf16.msrb.mxu0 %v4145_v23  ;;  %v3586_v35 = vld [vmem:[%s5122_s25 + $0x138] sm:$0xf0]  ;;  %v3592_v36 = vld [vmem:[%s5122_s25 + $0x128] sm:$0xf]  ;;  %v4446_v37 = vld [vmem:[%s5122_s25 + $0x13c] sm:$0xf0]  ;;  %v5316_v44 = vor.u32 %v4445_v33, %v3584_v32 }
  0x6e   : > { %1846 = vmatmul.bf16.gmra.mxu3 %v5210_v52  ;;  %1982 = vmatpush.bf16.msrb.mxu2 %v3637_v19  ;;  %v4443_v38 = vld [vmem:[%s5122_s25 + $0x12c] sm:$0xf]  ;;  %v3594_v39 = vld [vmem:[%s5122_s25 + $0x140] sm:$0xf0]  ;;  %v5318_v45 = vor.u32 %v4442_v34, %v3586_v35  ;;  %v5320_v46 = vor.u32 %v4446_v37, %v3592_v36  ;;  %v4258_v56 = vld [vmem:[%s5045_s12 + $0x4f0] sm:$0xf0] }
  0x6f   : > { %2031 = vmatpush.bf16.msrb.mxu3 %v3765_v28  ;;  %1933 = vmatpush.bf16.msrb.mxu1 %v4273_v31  ;;  %6433 = vst [vmem:[#allocation28_spill] sm:$0xff] %v5316_v44  ;;  %v5322_v47 = vor.u32 %v4443_v38, %v3594_v39  ;;  %v4610_v55 = vld [vmem:[%s5045_s12 + $0x4e4] sm:$0xf]  ;;  %v4002_v60 = vld [vmem:[%s5045_s12 + $0x2f0] sm:$0xf0] }
  0x70   : > { %6434 = vst [vmem:[#allocation29_spill] sm:$0xff] %v5318_v45  ;;  %v4546_v58 = vld [vmem:[%s5045_s12 + $0x2e4] sm:$0xf]  ;;  %v4261_v59 = vor.u32 %v4610_v55, %v4258_v56  ;;  %v4386_v62 = vld [vmem:[%s5045_s12 + $0x5f0] sm:$0xf0] }
  0x71   : > { %v4642_v61 = vld [vmem:[%s5045_s12 + $0x5e4] sm:$0xf]  ;;  %v4005_v63 = vor.u32 %v4546_v58, %v4002_v60  ;;  %v4130_v2 = vld [vmem:[%s5045_s12 + $0x3f0] sm:$0xf0]  ;;  %v3608_v4 = vld [vmem:[%s5122_s25 + $0x150] sm:$0xf] }
  0x72   : > { %v4389_v0 = vor.u32 %v4642_v61, %v4386_v62  ;;  %2171 = vmatpush.bf16.msra.mxu2 %v4261_v59  ;;  %v4578_v1 = vld [vmem:[%s5045_s12 + $0x3e4] sm:$0xf]  ;;  %v4451_v5 = vld [vmem:[%s5122_s25 + $0x164] sm:$0xf0]  ;;  %v4448_v6 = vld [vmem:[%s5122_s25 + $0x154] sm:$0xf] }
  0x73   : > { %2073 = vmatpush.bf16.msra.mxu0 %v4005_v63  ;;  %v4133_v3 = vor.u32 %v4578_v1, %v4130_v2  ;;  %v3610_v7 = vld [vmem:[%s5122_s25 + $0x168] sm:$0xf0]  ;;  %v3616_v16 = vld [vmem:[%s5122_s25 + $0x158] sm:$0xf]  ;;  %v4452_v17 = vld [vmem:[%s5122_s25 + $0x16c] sm:$0xf0]  ;;  %v5344_v20 = vor.u32 %v4451_v5, %v3608_v4 }
  0x74   : > { %2220 = vmatpush.bf16.msra.mxu3 %v4389_v0  ;;  %v4449_v18 = vld [vmem:[%s5122_s25 + $0x15c] sm:$0xf]  ;;  %v3618_v19 = vld [vmem:[%s5122_s25 + $0x170] sm:$0xf0]  ;;  %v5346_v21 = vor.u32 %v4448_v6, %v3610_v7  ;;  %v5348_v22 = vor.u32 %v4452_v17, %v3616_v16  ;;  %v4606_v28 = vld [vmem:[%s5045_s12 + $0x4c4] sm:$0xf] }
  0x75   : > { %2122 = vmatpush.bf16.msra.mxu1 %v4133_v3  ;;  %6435 = vst [vmem:[#allocation30_spill] sm:$0xff] %v5344_v20  ;;  %v5350_v23 = vor.u32 %v4449_v18, %v3618_v19  ;;  %v4242_v29 = vld [vmem:[%s5045_s12 + $0x4d0] sm:$0xf0]  ;;  %v4542_v30 = vld [vmem:[%s5045_s12 + $0x2c4] sm:$0xf] }
  0x76   : > { %6436 = vst [vmem:[#allocation31_spill] sm:$0xff] %v5346_v21  ;;  %v4245_v31 = vor.u32 %v4606_v28, %v4242_v29  ;;  %v3986_v32 = vld [vmem:[%s5045_s12 + $0x2d0] sm:$0xf0]  ;;  %v4638_v33 = vld [vmem:[%s5045_s12 + $0x5c4] sm:$0xf] }
  0x77   : > { %v4370_v34 = vld [vmem:[%s5045_s12 + $0x5d0] sm:$0xf0]  ;;  %v3989_v35 = vor.u32 %v4542_v30, %v3986_v32  ;;  %v4574_v37 = vld [vmem:[%s5045_s12 + $0x3c4] sm:$0xf]  ;;  %v3456_v55 = vld [vmem:[%s5122_s25 + $0x10] sm:$0xf] }
  0x78   : > { %v4373_v36 = vor.u32 %v4638_v33, %v4370_v34  ;;  %2172 = vmatpush.bf16.msra.mxu2 %v4245_v31  ;;  %v4114_v38 = vld [vmem:[%s5045_s12 + $0x3d0] sm:$0xf0]  ;;  %v4411_v56 = vld [vmem:[%s5122_s25 + $0x24] sm:$0xf0]  ;;  %v3458_v59 = vld [vmem:[%s5122_s25 + $0x28] sm:$0xf0] }
  0x79   : > { %2074 = vmatpush.bf16.msra.mxu0 %v3989_v35  ;;  %v4117_v39 = vor.u32 %v4574_v37, %v4114_v38  ;;  %v4408_v58 = vld [vmem:[%s5122_s25 + $0x14] sm:$0xf]  ;;  %v5368_v60 = vor.u32 %v4411_v56, %v3456_v55  ;;  %v4602_v1 = vld [vmem:[%s5045_s12 + $0x4a4] sm:$0xf]  ;;  %v4417_v37 = vld [vmem:[%s5122_s25 + $0x54] sm:$0xf0] }
  0x7a   : > { %2221 = vmatpush.bf16.msra.mxu3 %v4373_v36  ;;  %v5370_v62 = vor.u32 %v4408_v58, %v3458_v59  ;;  %v4226_v2 = vld [vmem:[%s5045_s12 + $0x4b0] sm:$0xf0]  ;;  %v4538_v3 = vld [vmem:[%s5045_s12 + $0x2a4] sm:$0xf]  ;;  %v3480_v36 = vld [vmem:[%s5122_s25 + $0x40] sm:$0xf] }
  0x7b   : > { %2123 = vmatpush.bf16.msra.mxu1 %v4117_v39  ;;  %v4229_v4 = vor.u32 %v4602_v1, %v4226_v2  ;;  %v3970_v5 = vld [vmem:[%s5045_s12 + $0x2b0] sm:$0xf0]  ;;  %v4634_v6 = vld [vmem:[%s5045_s12 + $0x5a4] sm:$0xf]  ;;  %v3482_v39 = vld [vmem:[%s5122_s25 + $0x58] sm:$0xf0]  ;;  %v5390_v56 = vor.u32 %v4417_v37, %v3480_v36 }
  0x7c   : > { %1704 = vmatmul.bf16.gmra.mxu0 %v5232_v12  ;;  %1753 = vmatmul.bf16.gmra.mxu1 %v5234_v13  ;;  %v4354_v7 = vld [vmem:[%s5045_s12 + $0x5b0] sm:$0xf0]  ;;  %v3973_v17 = vor.u32 %v4538_v3, %v3970_v5  ;;  %v4570_v33 = vld [vmem:[%s5045_s12 + $0x3a4] sm:$0xf] }
  0x7d   : > { %1802 = vmatmul.bf16.gmra.mxu2 %v5236_v14  ;;  %v4357_v18 = vor.u32 %v4634_v6, %v4354_v7  ;;  %v4098_v34 = vld [vmem:[%s5045_s12 + $0x3b0] sm:$0xf0]  ;;  %v4414_v38 = vld [vmem:[%s5122_s25 + $0x44] sm:$0xf] }
  0x7e   : > { %1851 = vmatmul.bf16.gmra.mxu3 %v5238_v15  ;;  %2173 = vmatpush.bf16.msra.mxu2 %v4229_v4  ;;  %v4101_v35 = vor.u32 %v4570_v33, %v4098_v34  ;;  %v4598_v3 = vld [vmem:[%s5045_s12 + $0x484] sm:$0xf]  ;;  %v4210_v4 = vld [vmem:[%s5045_s12 + $0x490] sm:$0xf0] }
  0x7f   : > { %2075 = vmatpush.bf16.msra.mxu0 %v3973_v17  ;;  %2222 = vmatpush.bf16.msra.mxu3 %v4357_v18  ;;  %v4534_v5 = vld [vmem:[%s5045_s12 + $0x284] sm:$0xf]  ;;  %v4213_v6 = vor.u32 %v4598_v3, %v4210_v4  ;;  %v3954_v7 = vld [vmem:[%s5045_s12 + $0x290] sm:$0xf0] }
  0x80   : > { %2124 = vmatpush.bf16.msra.mxu1 %v4101_v35  ;;  %v4338_v17 = vld [vmem:[%s5045_s12 + $0x590] sm:$0xf0]  ;;  %v4566_v36 = vld [vmem:[%s5045_s12 + $0x384] sm:$0xf] }
  0x81   : > { %v4082_v37 = vld [vmem:[%s5045_s12 + $0x390] sm:$0xf0] }
  0x82   : > { %2174 = vmatpush.bf16.msra.mxu2 %v4213_v6 }
  0x8c   : > { %1709 = vmatmul.bf16.gmra.mxu0 %v5260_v40  ;;  %1758 = vmatmul.bf16.gmra.mxu1 %v5262_v41 }
  0x8d   : > { %1807 = vmatmul.bf16.gmra.mxu2 %v5264_v42 }
  0x8e   : > { %1856 = vmatmul.bf16.gmra.mxu3 %v5266_v43 }
  0x9c   : > { %1714 = vmatmul.bf16.gmra.mxu0 %v5288_v8  ;;  %1763 = vmatmul.bf16.gmra.mxu1 %v5290_v9 }
  0x9d   : > { %1812 = vmatmul.bf16.gmra.mxu2 %v5292_v10 }
  0x9e   : > { %1861 = vmatmul.bf16.gmra.mxu3 %v5294_v11 }
  0xac   : > { %1719 = vmatmul.bf16.gmra.mxu0 %v5316_v44  ;;  %1768 = vmatmul.bf16.gmra.mxu1 %v5318_v45 }
  0xad   : > { %1817 = vmatmul.bf16.gmra.mxu2 %v5320_v46 }
  0xae   : > { %1866 = vmatmul.bf16.gmra.mxu3 %v5322_v47 }
  0xbc   : > { %1724 = vmatmul.bf16.gmra.mxu0 %v5344_v20  ;;  %1773 = vmatmul.bf16.gmra.mxu1 %v5346_v21 }
  0xbd   : > { %1822 = vmatmul.bf16.gmra.mxu2 %v5348_v22 }
  0xbe   : > { %1871 = vmatmul.bf16.gmra.mxu3 %v5350_v23 }
  0xc9   : > { %v1690_v61 = vpop.f32.mrf.mxu0  ;;  %v1739_v63 = vpop.f32.mrf.mxu1 }
  0xca   : > { %v1740_v0 = vadd.f32 %v1739_v63, %v1690_v61  ;;  %v5392_v63 = vor.u32 %v4414_v38, %v3482_v39  ;;  %v4085_v38 = vor.u32 %v4566_v36, %v4082_v37  ;;  %v3504_v39 = vld [vmem:[%s5122_s25 + $0x70] sm:$0xf] }
  0xcc   : > { %1885 = vmatmul.bf16.vlgmr.msrb.gmra.mxu0 %v5368_v60  ;;  %1934 = vmatmul.bf16.vlgmr.msrb.gmra.mxu1 %v5370_v62 }
  0xcd   : > { %1983 = vmatmul.bf16.vlgmr.msrb.gmra.mxu2 %v5139_v48  ;;  %2125 = vmatpush.bf16.msra.mxu1 %v4085_v38  ;;  %v4453_v48 = vld [vmem:[%s5122_s25 + $0x174] sm:$0xf0] }
  0xce   : > { %2032 = vmatmul.bf16.vlgmr.msrb.gmra.mxu3 %v5144_v53  ;;  %v4444_v53 = vld [vmem:[%s5122_s25 + $0x134] sm:$0xf] }
  0xd0   : > { %v1788_v16 = vpop.f32.mrf.mxu2 }
  0xd1   : > { %v1789_v19 = vadd.f32 %v1788_v16, %v1740_v0  ;;  %v1837_v28 = vpop.f32.mrf.mxu3  ;;  %v1692_v29 = vpop.f32.mrf.mxu0  ;;  %v4630_v16 = vld [vmem:[%s5045_s12 + $0x584] sm:$0xf] }
  0xd2   : > { %v1741_v30 = vpop.f32.mrf.mxu1 }
  0xd3   : > { %v5382_v31 = vadd.f32 %v1837_v28, %v1789_v19  ;;  %v1742_v32 = vadd.f32 %v1741_v30, %v1692_v29  ;;  %v3957_v19 = vor.u32 %v4534_v5, %v3954_v7  ;;  %v4341_v28 = vor.u32 %v4630_v16, %v4338_v17  ;;  %v4594_v17 = vld [vmem:[%s5045_s12 + $0x464] sm:$0xf] }
  0xd5   : > { %2076 = vmatpush.bf16.msra.mxu0 %v3957_v19  ;;  %2223 = vmatpush.bf16.msra.mxu3 %v4341_v28  ;;  %v4530_v19 = vld [vmem:[%s5045_s12 + $0x264] sm:$0xf] }
  0xd8   : > { %v1790_v55 = vpop.f32.mrf.mxu2 }
  0xd9   : > { %v1791_v58 = vadd.f32 %v1790_v55, %v1742_v32  ;;  %v1839_v59 = vpop.f32.mrf.mxu3  ;;  %v1695_v61 = vpop.f32.mrf.mxu0  ;;  %v4423_v55 = vld [vmem:[%s5122_s25 + $0x84] sm:$0xf0] }
  0xda   : > { %v1744_v0 = vpop.f32.mrf.mxu1 }
  0xdb   : > { %v5394_v1 = vadd.f32 %v1839_v59, %v1791_v58  ;;  %v1745_v2 = vadd.f32 %v1744_v0, %v1695_v61  ;;  %v4420_v58 = vld [vmem:[%s5122_s25 + $0x74] sm:$0xf]  ;;  %v3506_v59 = vld [vmem:[%s5122_s25 + $0x88] sm:$0xf0]  ;;  %v5414_v0 = vor.u32 %v4423_v55, %v3504_v39 }
  0xdc   : > { %1890 = vmatmul.bf16.gmra.mxu0 %v5390_v56  ;;  %1939 = vmatmul.bf16.gmra.mxu1 %v5392_v63  ;;  %v5416_v5 = vor.u32 %v4420_v58, %v3506_v59 }
  0xdd   : > { %1988 = vmatmul.bf16.gmra.mxu2 %v5176_v24  ;;  %v4447_v24 = vld [vmem:[%s5122_s25 + $0x144] sm:$0xf0] }
  0xde   : > { %2037 = vmatmul.bf16.gmra.mxu3 %v5178_v25  ;;  %v4438_v25 = vld [vmem:[%s5122_s25 + $0x104] sm:$0xf] }
  0xe0   : > { %v1793_v18 = vpop.f32.mrf.mxu2 }
  0xe1   : > { %v1794_v29 = vadd.f32 %v1793_v18, %v1745_v2  ;;  %v1842_v30 = vpop.f32.mrf.mxu3  ;;  %v1697_v32 = vpop.f32.mrf.mxu0  ;;  %v4194_v18 = vld [vmem:[%s5045_s12 + $0x470] sm:$0xf0] }
  0xe2   : > { %v1746_v33 = vpop.f32.mrf.mxu1  ;;  %v4197_v28 = vor.u32 %v4594_v17, %v4194_v18  ;;  %v4426_v17 = vld [vmem:[%s5122_s25 + $0xa4] sm:$0xf]  ;;  %v3530_v18 = vld [vmem:[%s5122_s25 + $0xb8] sm:$0xf0] }
  0xe3   : > { %v5406_v34 = vadd.f32 %v1842_v30, %v1794_v29  ;;  %v1747_v35 = vadd.f32 %v1746_v33, %v1697_v32  ;;  %v3938_v29 = vld [vmem:[%s5045_s12 + $0x270] sm:$0xf0]  ;;  %v4626_v30 = vld [vmem:[%s5045_s12 + $0x564] sm:$0xf] }
  0xe4   : > { %v4322_v32 = vld [vmem:[%s5045_s12 + $0x570] sm:$0xf0]  ;;  %2175 = vmatpush.bf16.msra.mxu2 %v4197_v28 }
  0xe5   : > { %v4325_v36 = vor.u32 %v4626_v30, %v4322_v32  ;;  %v5440_v32 = vor.u32 %v4426_v17, %v3530_v18 }
  0xe7   : > { %2224 = vmatpush.bf16.msra.mxu3 %v4325_v36 }
  0xe8   : > { %v1795_v61 = vpop.f32.mrf.mxu2 }
  0xe9   : > { %v1796_v2 = vadd.f32 %v1795_v61, %v1747_v35  ;;  %v1844_v3 = vpop.f32.mrf.mxu3  ;;  %v1700_v4 = vpop.f32.mrf.mxu0  ;;  %v3941_v35 = vor.u32 %v4530_v19, %v3938_v29  ;;  %v4562_v61 = vld [vmem:[%s5045_s12 + $0x364] sm:$0xf] }
  0xea   : > { %v1749_v6 = vpop.f32.mrf.mxu1 }
  0xeb   : > { %v5418_v7 = vadd.f32 %v1844_v3, %v1796_v2  ;;  %v1750_v16 = vadd.f32 %v1749_v6, %v1700_v4  ;;  %2077 = vmatpush.bf16.msra.mxu0 %v3941_v35  ;;  %v4066_v2 = vld [vmem:[%s5045_s12 + $0x370] sm:$0xf0]  ;;  %v3528_v4 = vld [vmem:[%s5122_s25 + $0xa0] sm:$0xf]  ;;  %v4429_v6 = vld [vmem:[%s5122_s25 + $0xb4] sm:$0xf0] }
  0xec   : > { %1895 = vmatmul.bf16.gmra.mxu0 %v5414_v0  ;;  %1944 = vmatmul.bf16.gmra.mxu1 %v5416_v5  ;;  %v4069_v3 = vor.u32 %v4562_v61, %v4066_v2  ;;  %v5438_v19 = vor.u32 %v4429_v6, %v3528_v4  ;;  %v4622_v61 = vld [vmem:[%s5045_s12 + $0x544] sm:$0xf]  ;;  %v4306_v2 = vld [vmem:[%s5045_s12 + $0x550] sm:$0xf0] }
  0xed   : > { %1993 = vmatmul.bf16.gmra.mxu2 %v5204_v49  ;;  %v4309_v6 = vor.u32 %v4622_v61, %v4306_v2  ;;  %v4441_v49 = vld [vmem:[%s5122_s25 + $0x114] sm:$0xf0] }
  0xee   : > { %2042 = vmatmul.bf16.gmra.mxu3 %v5206_v50  ;;  %2126 = vmatpush.bf16.msra.mxu1 %v4069_v3  ;;  %v4432_v50 = vld [vmem:[%s5122_s25 + $0xd4] sm:$0xf] }
  0xef   : > { %2225 = vmatpush.bf16.msra.mxu3 %v4309_v6 }
  0xf0   : > { %v1798_v33 = vpop.f32.mrf.mxu2 }
  0xf1   : > { %v1799_v37 = vadd.f32 %v1798_v33, %v1750_v16  ;;  %v1847_v38 = vpop.f32.mrf.mxu3  ;;  %v1702_v39 = vpop.f32.mrf.mxu0 }
  0xf2   : > { %v1751_v55 = vpop.f32.mrf.mxu1 }
  0xf3   : > { %v5430_v58 = vadd.f32 %v1847_v38, %v1799_v37  ;;  %v1752_v59 = vadd.f32 %v1751_v55, %v1702_v39  ;;  %v4590_v37 = vld [vmem:[%s5045_s12 + $0x444] sm:$0xf]  ;;  %v4178_v38 = vld [vmem:[%s5045_s12 + $0x450] sm:$0xf0] }
  0xf4   : > { %v4526_v39 = vld [vmem:[%s5045_s12 + $0x244] sm:$0xf]  ;;  %v4181_v55 = vor.u32 %v4590_v37, %v4178_v38  ;;  %v4050_v37 = vld [vmem:[%s5045_s12 + $0x350] sm:$0xf0] }
  0xf6   : > { %2176 = vmatpush.bf16.msra.mxu2 %v4181_v55 }
  0xf8   : > { %v1800_v16 = vpop.f32.mrf.mxu2 }
  0xf9   : > { %v1801_v28 = vadd.f32 %v1800_v16, %v1752_v59  ;;  %v1849_v29 = vpop.f32.mrf.mxu3  ;;  %v1705_v30 = vpop.f32.mrf.mxu0  ;;  %v3922_v59 = vld [vmem:[%s5045_s12 + $0x250] sm:$0xf0] }
  0xfa   : > { %v1754_v33 = vpop.f32.mrf.mxu1  ;;  %v3925_v4 = vor.u32 %v4526_v39, %v3922_v59  ;;  %v3554_v39 = vld [vmem:[%s5122_s25 + $0xe8] sm:$0xf0] }
  0xfb   : > { %v5442_v35 = vadd.f32 %v1849_v29, %v1801_v28  ;;  %v1755_v36 = vadd.f32 %v1754_v33, %v1705_v30  ;;  %v4558_v33 = vld [vmem:[%s5045_s12 + $0x344] sm:$0xf] }
  0xfc   : > { %1900 = vmatmul.bf16.gmra.mxu0 %v5438_v19  ;;  %1949 = vmatmul.bf16.gmra.mxu1 %v5440_v32  ;;  %v4053_v38 = vor.u32 %v4558_v33, %v4050_v37 }
  0xfd   : > { %1998 = vmatmul.bf16.gmra.mxu2 %v5232_v12  ;;  %2078 = vmatpush.bf16.msra.mxu0 %v3925_v4  ;;  %v4435_v12 = vld [vmem:[%s5122_s25 + $0xe4] sm:$0xf0] }
  0xfe   : > { %2047 = vmatmul.bf16.gmra.mxu3 %v5234_v13  ;;  %v3552_v13 = vld [vmem:[%s5122_s25 + $0xd0] sm:$0xf]  ;;  %2127 = vmatpush.bf16.msra.mxu1 %v4053_v38 }
  0xff   : > { %v5462_v59 = vor.u32 %v4435_v12, %v3552_v13  ;;  %v4586_v12 = vld [vmem:[%s5045_s12 + $0x424] sm:$0xf]  ;;  %v4162_v13 = vld [vmem:[%s5045_s12 + $0x430] sm:$0xf0] }
 0x100   : > { %v1803_v3 = vpop.f32.mrf.mxu2 }
 0x101   : > { %v1804_v17 = vadd.f32 %v1803_v3, %v1755_v36  ;;  %v1852_v18 = vpop.f32.mrf.mxu3  ;;  %v1707_v16 = vpop.f32.mrf.mxu0  ;;  %v5464_v3 = vor.u32 %v4432_v50, %v3554_v39  ;;  %v4618_v50 = vld [vmem:[%s5045_s12 + $0x524] sm:$0xf] }
 0x102   : > { %v1756_v28 = vpop.f32.mrf.mxu1 }
 0x103   : > { %v5454_v29 = vadd.f32 %v1852_v18, %v1804_v17  ;;  %v1757_v30 = vadd.f32 %v1756_v28, %v1707_v16  ;;  %v4522_v18 = vld [vmem:[%s5045_s12 + $0x224] sm:$0xf]  ;;  %v4165_v16 = vor.u32 %v4586_v12, %v4162_v13  ;;  %v3906_v28 = vld [vmem:[%s5045_s12 + $0x230] sm:$0xf0] }
 0x104   : > { %v3909_v37 = vor.u32 %v4522_v18, %v3906_v28  ;;  %v4554_v12 = vld [vmem:[%s5045_s12 + $0x324] sm:$0xf]  ;;  %v4034_v13 = vld [vmem:[%s5045_s12 + $0x330] sm:$0xf0]  ;;  %v3578_v18 = vld [vmem:[%s5122_s25 + $0x118] sm:$0xf0] }
 0x105   : > { %2177 = vmatpush.bf16.msra.mxu2 %v4165_v16 }
 0x106   : > { %2079 = vmatpush.bf16.msra.mxu0 %v3909_v37 }
 0x108   : > { %v1805_v36 = vpop.f32.mrf.mxu2 }
 0x109   : > { %v1806_v55 = vadd.f32 %v1805_v36, %v1757_v30  ;;  %v1854_v61 = vpop.f32.mrf.mxu3  ;;  %v1710_v2 = vpop.f32.mrf.mxu0  ;;  %v4290_v30 = vld [vmem:[%s5045_s12 + $0x530] sm:$0xf0] }
 0x10a   : > { %v1759_v4 = vpop.f32.mrf.mxu1  ;;  %v4293_v38 = vor.u32 %v4618_v50, %v4290_v30 }
 0x10b   : > { %v5466_v6 = vadd.f32 %v1854_v61, %v1806_v55  ;;  %v1760_v17 = vadd.f32 %v1759_v4, %v1710_v2 }
 0x10c   : > { %1905 = vmatmul.bf16.gmra.mxu0 %v5462_v59  ;;  %1954 = vmatmul.bf16.gmra.mxu1 %v5464_v3 }
 0x10d   : > { %2003 = vmatmul.bf16.gmra.mxu2 %v5260_v40  ;;  %2226 = vmatpush.bf16.msra.mxu3 %v4293_v38  ;;  %v3576_v40 = vld [vmem:[%s5122_s25 + $0x100] sm:$0xf] }
 0x10e   : > { %2052 = vmatmul.bf16.gmra.mxu3 %v5262_v41  ;;  %v4037_v41 = vor.u32 %v4554_v12, %v4034_v13  ;;  %v5486_v28 = vor.u32 %v4441_v49, %v3576_v40  ;;  %v4582_v49 = vld [vmem:[%s5045_s12 + $0x404] sm:$0xf]  ;;  %v4146_v40 = vld [vmem:[%s5045_s12 + $0x410] sm:$0xf0] }
 0x110   : > { %v1808_v33 = vpop.f32.mrf.mxu2  ;;  %2128 = vmatpush.bf16.msra.mxu1 %v4037_v41  ;;  %v4518_v41 = vld [vmem:[%s5045_s12 + $0x204] sm:$0xf] }
 0x111   : > { %v1809_v39 = vadd.f32 %v1808_v33, %v1760_v17  ;;  %v1857_v36 = vpop.f32.mrf.mxu3  ;;  %v1712_v55 = vpop.f32.mrf.mxu0  ;;  %v5488_v33 = vor.u32 %v4438_v25, %v3578_v18  ;;  %v4614_v25 = vld [vmem:[%s5045_s12 + $0x504] sm:$0xf] }
 0x112   : > { %v1761_v61 = vpop.f32.mrf.mxu1 }
 0x113   : > { %v5478_v2 = vadd.f32 %v1857_v36, %v1809_v39  ;;  %v1762_v4 = vadd.f32 %v1761_v61, %v1712_v55  ;;  %v4149_v36 = vor.u32 %v4582_v49, %v4146_v40  ;;  %v3890_v55 = vld [vmem:[%s5045_s12 + $0x210] sm:$0xf0]  ;;  %v4550_v49 = vld [vmem:[%s5045_s12 + $0x304] sm:$0xf] }
 0x114   : > { %v4274_v61 = vld [vmem:[%s5045_s12 + $0x510] sm:$0xf0]  ;;  %v3893_v12 = vor.u32 %v4518_v41, %v3890_v55  ;;  %v3602_v41 = vld [vmem:[%s5122_s25 + $0x148] sm:$0xf0] }
 0x115   : > { %v4277_v13 = vor.u32 %v4614_v25, %v4274_v61  ;;  %2178 = vmatpush.bf16.msra.mxu2 %v4149_v36  ;;  %v4018_v40 = vld [vmem:[%s5045_s12 + $0x310] sm:$0xf0] }
 0x116   : > { %2080 = vmatpush.bf16.msra.mxu0 %v3893_v12 }
 0x117   : > { %2227 = vmatpush.bf16.msra.mxu3 %v4277_v13 }
 0x118   : > { %v1810_v17 = vpop.f32.mrf.mxu2 }
 0x119   : > { %v1811_v16 = vadd.f32 %v1810_v17, %v1762_v4  ;;  %v1859_v50 = vpop.f32.mrf.mxu3  ;;  %v1715_v30 = vpop.f32.mrf.mxu0 }
 0x11a   : > { %v1764_v37 = vpop.f32.mrf.mxu1 }
 0x11b   : > { %v5490_v38 = vadd.f32 %v1859_v50, %v1811_v16  ;;  %v1765_v39 = vadd.f32 %v1764_v37, %v1715_v30 }
 0x11c   : > { %1910 = vmatmul.bf16.gmra.mxu0 %v5486_v28  ;;  %1959 = vmatmul.bf16.gmra.mxu1 %v5488_v33 }
 0x11d   : > { %2008 = vmatmul.bf16.gmra.mxu2 %v5288_v8  ;;  %v3600_v8 = vld [vmem:[%s5122_s25 + $0x130] sm:$0xf] }
 0x11e   : > { %2057 = vmatmul.bf16.gmra.mxu3 %v5290_v9  ;;  %v4021_v9 = vor.u32 %v4550_v49, %v4018_v40  ;;  %v5510_v55 = vor.u32 %v4447_v24, %v3600_v8  ;;  %v4008_v24 = vld [vmem:[%s5045_s12 + $0x2e8] sm:$0xf]  ;;  %v4549_v8 = vld [vmem:[%s5045_s12 + $0x2f4] sm:$0xf0] }
 0x120   : > { %v1813_v4 = vpop.f32.mrf.mxu2  ;;  %2129 = vmatpush.bf16.msra.mxu1 %v4021_v9  ;;  %v3752_v9 = vld [vmem:[%s5045_s12 + $0xe8] sm:$0xf] }
 0x121   : > { %v1814_v18 = vadd.f32 %v1813_v4, %v1765_v39  ;;  %v1862_v17 = vpop.f32.mrf.mxu3  ;;  %v1717_v16 = vpop.f32.mrf.mxu0  ;;  %v5512_v4 = vor.u32 %v4444_v53, %v3602_v41  ;;  %v4485_v53 = vld [vmem:[%s5045_s12 + $0xf4] sm:$0xf0] }
 0x122   : > { %v1766_v50 = vpop.f32.mrf.mxu1  ;;  %v3753_v49 = vor.u32 %v4485_v53, %v3752_v9  ;;  %v4450_v9 = vld [vmem:[%s5122_s25 + $0x164] sm:$0xf] }
 0x123   : > { %v5502_v30 = vadd.f32 %v1862_v17, %v1814_v18  ;;  %v1767_v37 = vadd.f32 %v1766_v50, %v1717_v16  ;;  %v4009_v17 = vor.u32 %v4549_v8, %v4008_v24  ;;  %v4136_v16 = vld [vmem:[%s5045_s12 + $0x3e8] sm:$0xf]  ;;  %v4581_v50 = vld [vmem:[%s5045_s12 + $0x3f4] sm:$0xf0] }
 0x124   : > { %v4137_v40 = vor.u32 %v4581_v50, %v4136_v16  ;;  %2269 = vmatpush.bf16.msrb.mxu0 %v3753_v49 }
 0x125   : > { %2367 = vmatpush.bf16.msrb.mxu2 %v4009_v17 }
 0x126   : > { %2416 = vmatpush.bf16.msrb.mxu3 %v4137_v40 }
 0x128   : > { %v1815_v39 = vpop.f32.mrf.mxu2 }
 0x129   : > { %v1816_v36 = vadd.f32 %v1815_v39, %v1767_v37  ;;  %v1864_v25 = vpop.f32.mrf.mxu3  ;;  %v1720_v61 = vpop.f32.mrf.mxu0 }
 0x12a   : > { %v1769_v12 = vpop.f32.mrf.mxu1 }
 0x12b   : > { %v5514_v13 = vadd.f32 %v1864_v25, %v1816_v36  ;;  %v1770_v18 = vadd.f32 %v1769_v12, %v1720_v61  ;;  %v3880_v61 = vld [vmem:[%s5045_s12 + $0x1e8] sm:$0xf]  ;;  %v4517_v12 = vld [vmem:[%s5045_s12 + $0x1f4] sm:$0xf0] }
 0x12c   : > { %1915 = vmatmul.bf16.gmra.mxu0 %v5510_v55  ;;  %1964 = vmatmul.bf16.gmra.mxu1 %v5512_v4 }
 0x12d   : > { %2013 = vmatmul.bf16.gmra.mxu2 %v5316_v44  ;;  %v3624_v44 = vld [vmem:[%s5122_s25 + $0x160] sm:$0xf] }
 0x12e   : > { %2062 = vmatmul.bf16.gmra.mxu3 %v5318_v45  ;;  %v3881_v45 = vor.u32 %v4517_v12, %v3880_v61  ;;  %v5534_v16 = vor.u32 %v4453_v48, %v3624_v44  ;;  %v3992_v48 = vld [vmem:[%s5045_s12 + $0x2c8] sm:$0xf]  ;;  %v4545_v44 = vld [vmem:[%s5045_s12 + $0x2d4] sm:$0xf0] }
 0x12f   : > { %v4120_v61 = vld [vmem:[%s5045_s12 + $0x3c8] sm:$0xf]  ;;  %v4577_v12 = vld [vmem:[%s5045_s12 + $0x3d4] sm:$0xf0] }
 0x130   : > { %v1818_v37 = vpop.f32.mrf.mxu2  ;;  %2318 = vmatpush.bf16.msrb.mxu1 %v3881_v45  ;;  %6437 = vst [vmem:[#allocation32_spill] sm:$0xff] %v5534_v16 }
 0x131   : > { %v1819_v41 = vadd.f32 %v1818_v37, %v1770_v18  ;;  %v1867_v39 = vpop.f32.mrf.mxu3  ;;  %v1722_v36 = vpop.f32.mrf.mxu0  ;;  %v3626_v18 = vld [vmem:[%s5122_s25 + $0x178] sm:$0xf0] }
 0x132   : > { %v1771_v25 = vpop.f32.mrf.mxu1  ;;  %v5536_v49 = vor.u32 %v4450_v9, %v3626_v18  ;;  %v4121_v18 = vor.u32 %v4577_v12, %v4120_v61 }
 0x133   : > { %v5528_v24 = vadd.f32 %v1867_v39, %v1819_v41  ;;  %v1772_v8 = vadd.f32 %v1771_v25, %v1722_v36  ;;  %v3736_v39 = vld [vmem:[%s5045_s12 + $0xc8] sm:$0xf]  ;;  %v3993_v36 = vor.u32 %v4545_v44, %v3992_v48  ;;  %v4481_v25 = vld [vmem:[%s5045_s12 + $0xd4] sm:$0xf0] }
 0x134   : > { %6438 = vst [vmem:[#allocation33_spill] sm:$0xff] %v5536_v49  ;;  %v3737_v9 = vor.u32 %v4481_v25, %v3736_v39  ;;  %2417 = vmatpush.bf16.msrb.mxu3 %v4121_v18 }
 0x135   : > { %2368 = vmatpush.bf16.msrb.mxu2 %v3993_v36 }
 0x136   : > { %2270 = vmatpush.bf16.msrb.mxu0 %v3737_v9  ;;  %v3720_v9 = vld [vmem:[%s5045_s12 + $0xa8] sm:$0xf] }
 0x138   : > { %v1820_v53 = vpop.f32.mrf.mxu2 }
 0x139   : > { %v1821_v17 = vadd.f32 %v1820_v53, %v1772_v8  ;;  %v1869_v50 = vpop.f32.mrf.mxu3  ;;  %v1725_v37 = vpop.f32.mrf.mxu0 }
 0x13a   : > { %v1774_v40 = vpop.f32.mrf.mxu1 }
 0x13b   : > { %v5538_v41 = vadd.f32 %v1869_v50, %v1821_v17  ;;  %v1775_v45 = vadd.f32 %v1774_v40, %v1725_v37  ;;  %v3864_v40 = vld [vmem:[%s5045_s12 + $0x1c8] sm:$0xf] }
 0x13c   : > { %1920 = vmatmul.bf16.gmra.mxu0 %v5534_v16  ;;  %1969 = vmatmul.bf16.gmra.mxu1 %v5536_v49 }
 0x13d   : > { %2018 = vmatmul.bf16.gmra.mxu2 %v5344_v20 }
 0x13e   : > { %2067 = vmatmul.bf16.gmra.mxu3 %v5346_v21  ;;  %v4513_v21 = vld [vmem:[%s5045_s12 + $0x1d4] sm:$0xf0] }
 0x13f   : > { %v3865_v48 = vor.u32 %v4513_v21, %v3864_v40  ;;  %v3976_v21 = vld [vmem:[%s5045_s12 + $0x2a8] sm:$0xf] }
 0x140   : > { %v1823_v8 = vpop.f32.mrf.mxu2 }
 0x141   : > { %v1824_v53 = vadd.f32 %v1823_v8, %v1775_v45  ;;  %v1872_v17 = vpop.f32.mrf.mxu3  ;;  %v1727_v50 = vpop.f32.mrf.mxu0  ;;  %2319 = vmatpush.bf16.msrb.mxu1 %v3865_v48 }
 0x142   : > { %v1776_v37 = vpop.f32.mrf.mxu1 }
 0x143   : > { %v5552_v20 = vadd.f32 %v1872_v17, %v1824_v53  ;;  %v1777_v49 = vadd.f32 %v1776_v37, %v1727_v50  ;;  %v4104_v53 = vld [vmem:[%s5045_s12 + $0x3a8] sm:$0xf]  ;;  %v4573_v17 = vld [vmem:[%s5045_s12 + $0x3b4] sm:$0xf0] }
 0x144   : > { %v4105_v40 = vor.u32 %v4573_v17, %v4104_v53 }
 0x146   : > { %2418 = vmatpush.bf16.msrb.mxu3 %v4105_v40  ;;  %v4537_v40 = vld [vmem:[%s5045_s12 + $0x294] sm:$0xf0] }
 0x148   : > { %v1825_v44 = vpop.f32.mrf.mxu2 }
 0x149   : > { %v1826_v39 = vadd.f32 %v1825_v44, %v1777_v49  ;;  %v1874_v45 = vpop.f32.mrf.mxu3  ;;  %v1886_v36 = vpop.f32.mrf.mxu0  ;;  %v4541_v49 = vld [vmem:[%s5045_s12 + $0x2b4] sm:$0xf0] }
 0x14a   : > { %v1887_v25 = vadd.f32 %v1886_v36, %v5382_v31  ;;  %v1935_v61 = vpop.f32.mrf.mxu1  ;;  %v3977_v18 = vor.u32 %v4541_v49, %v3976_v21  ;;  %v4477_v31 = vld [vmem:[%s5045_s12 + $0xb4] sm:$0xf0] }
 0x14b   : > { %v5555_v12 = vadd.f32 %v1874_v45, %v1826_v39  ;;  %v3721_v37 = vor.u32 %v4477_v31, %v3720_v9 }
 0x14c   : > { %v5557_v8 = vadd.f32 %v1935_v61, %v1887_v25  ;;  %2081 = vmatmul.bf16.vlgmr.msra.gmra.mxu0 %v5146_v54  ;;  %2130 = vmatmul.bf16.vlgmr.msra.gmra.mxu1 %v5150_v57  ;;  %v3848_v25 = vld [vmem:[%s5045_s12 + $0x1a8] sm:$0xf]  ;;  %v4509_v61 = vld [vmem:[%s5045_s12 + $0x1b4] sm:$0xf0] }
 0x14d   : > { %2179 = vmatmul.bf16.vlgmr.msra.gmra.mxu2 %v5368_v60  ;;  %2271 = vmatpush.bf16.msrb.mxu0 %v3721_v37  ;;  %v3849_v21 = vor.u32 %v4509_v61, %v3848_v25  ;;  %v3960_v37 = vld [vmem:[%s5045_s12 + $0x288] sm:$0xf] }
 0x14e   : > { %6439 = vst [vmem:[#allocation34_spill] sm:$0xff] %v5557_v8  ;;  %2228 = vmatmul.bf16.vlgmr.msra.gmra.mxu3 %v5370_v62  ;;  %2369 = vmatpush.bf16.msrb.mxu2 %v3977_v18 }
 0x14f   : > { %2320 = vmatpush.bf16.msrb.mxu1 %v3849_v21 }
 0x150   : > { %v1984_v50 = vpop.f32.mrf.mxu2 }
 0x151   : > { %v2033_v48 = vpop.f32.mrf.mxu3  ;;  %v1888_v44 = vpop.f32.mrf.mxu0 }
 0x152   : > { %v5569_v39 = vadd.f32 %v2033_v48, %v1984_v50  ;;  %v1889_v45 = vadd.f32 %v1888_v44, %v5394_v1  ;;  %v1937_v36 = vpop.f32.mrf.mxu1  ;;  %v3704_v48 = vld [vmem:[%s5045_s12 + $0x88] sm:$0xf]  ;;  %v3961_v44 = vor.u32 %v4537_v40, %v3960_v37  ;;  %v4505_v37 = vld [vmem:[%s5045_s12 + $0x194] sm:$0xf0] }
 0x154   : > { %v5574_v49 = vadd.f32 %v1937_v36, %v1889_v45  ;;  %v4473_v45 = vld [vmem:[%s5045_s12 + $0x94] sm:$0xf0]  ;;  %v4088_v36 = vld [vmem:[%s5045_s12 + $0x388] sm:$0xf]  ;;  %2370 = vmatpush.bf16.msrb.mxu2 %v3961_v44 }
 0x155   : > { %v3705_v61 = vor.u32 %v4473_v45, %v3704_v48 }
 0x156   : > { %6440 = vst [vmem:[#allocation35_spill] sm:$0xff] %v5574_v49 }
 0x157   : > { %2272 = vmatpush.bf16.msrb.mxu0 %v3705_v61  ;;  %v4533_v61 = vld [vmem:[%s5045_s12 + $0x274] sm:$0xf0] }
 0x158   : > { %v1986_v9 = vpop.f32.mrf.mxu2 }
 0x159   : > { %v2035_v18 = vpop.f32.mrf.mxu3  ;;  %v1891_v31 = vpop.f32.mrf.mxu0 }
 0x15a   : > { %v5576_v53 = vadd.f32 %v2035_v18, %v1986_v9  ;;  %v1892_v1 = vadd.f32 %v1891_v31, %v5406_v34  ;;  %v1940_v17 = vpop.f32.mrf.mxu1  ;;  %v4569_v34 = vld [vmem:[%s5045_s12 + $0x394] sm:$0xf0] }
 0x15b   : > { %v4089_v21 = vor.u32 %v4569_v34, %v4088_v36 }
 0x15c   : > { %v5579_v50 = vadd.f32 %v1940_v17, %v1892_v1  ;;  %2086 = vmatmul.bf16.gmra.mxu0 %v5180_v26  ;;  %2135 = vmatmul.bf16.gmra.mxu1 %v5182_v27 }
 0x15d   : > { %2184 = vmatmul.bf16.gmra.mxu2 %v5390_v56  ;;  %2419 = vmatpush.bf16.msrb.mxu3 %v4089_v21  ;;  %v3688_v21 = vld [vmem:[%s5045_s12 + $0x68] sm:$0xf] }
 0x15e   : > { %6441 = vst [vmem:[#allocation36_spill] sm:$0xff] %v5579_v50  ;;  %2233 = vmatmul.bf16.gmra.mxu3 %v5392_v63  ;;  %v3832_v50 = vld [vmem:[%s5045_s12 + $0x188] sm:$0xf] }
 0x15f   : > { %v3833_v40 = vor.u32 %v4505_v37, %v3832_v50  ;;  %v3944_v50 = vld [vmem:[%s5045_s12 + $0x268] sm:$0xf] }
 0x160   : > { %v1989_v25 = vpop.f32.mrf.mxu2 }
 0x161   : > { %v2038_v9 = vpop.f32.mrf.mxu3  ;;  %v1893_v18 = vpop.f32.mrf.mxu0  ;;  %2321 = vmatpush.bf16.msrb.mxu1 %v3833_v40 }
 0x162   : > { %v5591_v31 = vadd.f32 %v2038_v9, %v1989_v25  ;;  %v1894_v1 = vadd.f32 %v1893_v18, %v5418_v7  ;;  %v1942_v17 = vpop.f32.mrf.mxu1  ;;  %v3945_v9 = vor.u32 %v4533_v61, %v3944_v50  ;;  %v4469_v18 = vld [vmem:[%s5045_s12 + $0x74] sm:$0xf0] }
 0x163   : > { %v3689_v37 = vor.u32 %v4469_v18, %v3688_v21  ;;  %v4501_v50 = vld [vmem:[%s5045_s12 + $0x174] sm:$0xf0] }
 0x164   : > { %v5596_v49 = vadd.f32 %v1942_v17, %v1894_v1  ;;  %v4072_v1 = vld [vmem:[%s5045_s12 + $0x368] sm:$0xf]  ;;  %2371 = vmatpush.bf16.msrb.mxu2 %v3945_v9 }
 0x165   : > { %2273 = vmatpush.bf16.msrb.mxu0 %v3689_v37  ;;  %v4529_v37 = vld [vmem:[%s5045_s12 + $0x254] sm:$0xf0] }
 0x166   : > { %6442 = vst [vmem:[#allocation37_spill] sm:$0xff] %v5596_v49 }
 0x168   : > { %v1991_v48 = vpop.f32.mrf.mxu2 }
 0x169   : > { %v2040_v44 = vpop.f32.mrf.mxu3  ;;  %v1896_v45 = vpop.f32.mrf.mxu0 }
 0x16a   : > { %v5598_v36 = vadd.f32 %v2040_v44, %v1991_v48  ;;  %v1897_v7 = vadd.f32 %v1896_v45, %v5430_v58  ;;  %v1945_v34 = vpop.f32.mrf.mxu1  ;;  %v4565_v58 = vld [vmem:[%s5045_s12 + $0x374] sm:$0xf0] }
 0x16b   : > { %v4073_v40 = vor.u32 %v4565_v58, %v4072_v1 }
 0x16c   : > { %v5601_v25 = vadd.f32 %v1945_v34, %v1897_v7  ;;  %2091 = vmatmul.bf16.gmra.mxu0 %v5208_v51  ;;  %2140 = vmatmul.bf16.gmra.mxu1 %v5210_v52 }
 0x16d   : > { %2189 = vmatmul.bf16.gmra.mxu2 %v5414_v0  ;;  %2420 = vmatpush.bf16.msrb.mxu3 %v4073_v40  ;;  %v3672_v40 = vld [vmem:[%s5045_s12 + $0x48] sm:$0xf] }
 0x16e   : > { %6443 = vst [vmem:[#allocation38_spill] sm:$0xff] %v5601_v25  ;;  %2238 = vmatmul.bf16.gmra.mxu3 %v5416_v5  ;;  %v3816_v25 = vld [vmem:[%s5045_s12 + $0x168] sm:$0xf] }
 0x16f   : > { %v3817_v61 = vor.u32 %v4501_v50, %v3816_v25  ;;  %v3928_v25 = vld [vmem:[%s5045_s12 + $0x248] sm:$0xf] }
 0x170   : > { %v1994_v17 = vpop.f32.mrf.mxu2 }
 0x171   : > { %v2043_v48 = vpop.f32.mrf.mxu3  ;;  %v1898_v44 = vpop.f32.mrf.mxu0  ;;  %2322 = vmatpush.bf16.msrb.mxu1 %v3817_v61 }
 0x172   : > { %v5613_v45 = vadd.f32 %v2043_v48, %v1994_v17  ;;  %v1899_v7 = vadd.f32 %v1898_v44, %v5442_v35  ;;  %v1947_v34 = vpop.f32.mrf.mxu1  ;;  %v3929_v48 = vor.u32 %v4529_v37, %v3928_v25  ;;  %v4465_v44 = vld [vmem:[%s5045_s12 + $0x54] sm:$0xf0] }
 0x173   : > { %v3673_v50 = vor.u32 %v4465_v44, %v3672_v40  ;;  %v4497_v25 = vld [vmem:[%s5045_s12 + $0x154] sm:$0xf0] }
 0x174   : > { %v5618_v49 = vadd.f32 %v1947_v34, %v1899_v7  ;;  %v4056_v7 = vld [vmem:[%s5045_s12 + $0x348] sm:$0xf]  ;;  %2372 = vmatpush.bf16.msrb.mxu2 %v3929_v48 }
 0x175   : > { %2274 = vmatpush.bf16.msrb.mxu0 %v3673_v50  ;;  %v4525_v50 = vld [vmem:[%s5045_s12 + $0x234] sm:$0xf0] }
 0x176   : > { %6444 = vst [vmem:[#allocation39_spill] sm:$0xff] %v5618_v49 }
 0x178   : > { %v1996_v21 = vpop.f32.mrf.mxu2 }
 0x179   : > { %v2045_v9 = vpop.f32.mrf.mxu3  ;;  %v1901_v18 = vpop.f32.mrf.mxu0 }
 0x17a   : > { %v5620_v1 = vadd.f32 %v2045_v9, %v1996_v21  ;;  %v1902_v35 = vadd.f32 %v1901_v18, %v5454_v29  ;;  %v1950_v58 = vpop.f32.mrf.mxu1  ;;  %v4561_v29 = vld [vmem:[%s5045_s12 + $0x354] sm:$0xf0] }
 0x17b   : > { %v4057_v61 = vor.u32 %v4561_v29, %v4056_v7 }
 0x17c   : > { %v5623_v17 = vadd.f32 %v1950_v58, %v1902_v35  ;;  %2096 = vmatmul.bf16.gmra.mxu0 %v5236_v14  ;;  %2145 = vmatmul.bf16.gmra.mxu1 %v5238_v15 }
 0x17d   : > { %2194 = vmatmul.bf16.gmra.mxu2 %v5438_v19  ;;  %2421 = vmatpush.bf16.msrb.mxu3 %v4057_v61  ;;  %v3656_v61 = vld [vmem:[%s5045_s12 + $0x28] sm:$0xf] }
 0x17e   : > { %6445 = vst [vmem:[#allocation40_spill] sm:$0xff] %v5623_v17  ;;  %2243 = vmatmul.bf16.gmra.mxu3 %v5440_v32  ;;  %v3800_v17 = vld [vmem:[%s5045_s12 + $0x148] sm:$0xf] }
 0x17f   : > { %v3801_v37 = vor.u32 %v4497_v25, %v3800_v17  ;;  %v3912_v17 = vld [vmem:[%s5045_s12 + $0x228] sm:$0xf] }
 0x180   : > { %v1999_v34 = vpop.f32.mrf.mxu2 }
 0x181   : > { %v2048_v21 = vpop.f32.mrf.mxu3  ;;  %v1903_v9 = vpop.f32.mrf.mxu0  ;;  %2323 = vmatpush.bf16.msrb.mxu1 %v3801_v37 }
 0x182   : > { %v5635_v18 = vadd.f32 %v2048_v21, %v1999_v34  ;;  %v1904_v35 = vadd.f32 %v1903_v9, %v5466_v6  ;;  %v1952_v58 = vpop.f32.mrf.mxu1  ;;  %v3913_v21 = vor.u32 %v4525_v50, %v3912_v17  ;;  %v4461_v9 = vld [vmem:[%s5045_s12 + $0x34] sm:$0xf0] }
 0x183   : > { %v3657_v25 = vor.u32 %v4461_v9, %v3656_v61  ;;  %v4493_v17 = vld [vmem:[%s5045_s12 + $0x134] sm:$0xf0] }
 0x184   : > { %v5640_v49 = vadd.f32 %v1952_v58, %v1904_v35  ;;  %v4040_v35 = vld [vmem:[%s5045_s12 + $0x328] sm:$0xf]  ;;  %2373 = vmatpush.bf16.msrb.mxu2 %v3913_v21 }
 0x185   : > { %2275 = vmatpush.bf16.msrb.mxu0 %v3657_v25  ;;  %v4521_v25 = vld [vmem:[%s5045_s12 + $0x214] sm:$0xf0] }
 0x186   : > { %6446 = vst [vmem:[#allocation41_spill] sm:$0xff] %v5640_v49 }
 0x188   : > { %v2001_v40 = vpop.f32.mrf.mxu2 }
 0x189   : > { %v2050_v48 = vpop.f32.mrf.mxu3  ;;  %v1906_v44 = vpop.f32.mrf.mxu0 }
 0x18a   : > { %v5642_v7 = vadd.f32 %v2050_v48, %v2001_v40  ;;  %v1907_v6 = vadd.f32 %v1906_v44, %v5478_v2  ;;  %v1955_v29 = vpop.f32.mrf.mxu1  ;;  %v4557_v2 = vld [vmem:[%s5045_s12 + $0x334] sm:$0xf0] }
 0x18b   : > { %v4041_v37 = vor.u32 %v4557_v2, %v4040_v35 }
 0x18c   : > { %v5645_v34 = vadd.f32 %v1955_v29, %v1907_v6  ;;  %2101 = vmatmul.bf16.gmra.mxu0 %v5264_v42  ;;  %2150 = vmatmul.bf16.gmra.mxu1 %v5266_v43 }
 0x18d   : > { %2199 = vmatmul.bf16.gmra.mxu2 %v5462_v59  ;;  %2422 = vmatpush.bf16.msrb.mxu3 %v4041_v37  ;;  %v3640_v37 = vld [vmem:[%s5045_s12 + $0x8] sm:$0xf] }
 0x18e   : > { %6447 = vst [vmem:[#allocation42_spill] sm:$0xff] %v5645_v34  ;;  %2248 = vmatmul.bf16.gmra.mxu3 %v5464_v3  ;;  %v3784_v34 = vld [vmem:[%s5045_s12 + $0x128] sm:$0xf] }
 0x18f   : > { %v3785_v50 = vor.u32 %v4493_v17, %v3784_v34  ;;  %v3896_v34 = vld [vmem:[%s5045_s12 + $0x208] sm:$0xf] }
 0x190   : > { %v2004_v58 = vpop.f32.mrf.mxu2 }
 0x191   : > { %v2053_v40 = vpop.f32.mrf.mxu3  ;;  %v1908_v48 = vpop.f32.mrf.mxu0  ;;  %2324 = vmatpush.bf16.msrb.mxu1 %v3785_v50 }
 0x192   : > { %v5657_v44 = vadd.f32 %v2053_v40, %v2004_v58  ;;  %v1909_v6 = vadd.f32 %v1908_v48, %v5490_v38  ;;  %v1957_v29 = vpop.f32.mrf.mxu1  ;;  %v3897_v40 = vor.u32 %v4521_v25, %v3896_v34  ;;  %v4457_v48 = vld [vmem:[%s5045_s12 + $0x14] sm:$0xf0] }
 0x193   : > { %v3641_v17 = vor.u32 %v4457_v48, %v3640_v37  ;;  %v4489_v34 = vld [vmem:[%s5045_s12 + $0x114] sm:$0xf0] }
 0x194   : > { %v5662_v49 = vadd.f32 %v1957_v29, %v1909_v6  ;;  %v4024_v6 = vld [vmem:[%s5045_s12 + $0x308] sm:$0xf]  ;;  %2374 = vmatpush.bf16.msrb.mxu2 %v3897_v40 }
 0x195   : > { %2276 = vmatpush.bf16.msrb.mxu0 %v3641_v17  ;;  %v3754_v17 = vld [vmem:[%s5045_s12 + $0xf8] sm:$0xf0] }
 0x196   : > { %6448 = vst [vmem:[#allocation43_spill] sm:$0xff] %v5662_v49 }
 0x198   : > { %v2006_v61 = vpop.f32.mrf.mxu2 }
 0x199   : > { %v2055_v21 = vpop.f32.mrf.mxu3  ;;  %v1911_v9 = vpop.f32.mrf.mxu0 }
 0x19a   : > { %v5664_v35 = vadd.f32 %v2055_v21, %v2006_v61  ;;  %v1912_v38 = vadd.f32 %v1911_v9, %v5502_v30  ;;  %v1960_v2 = vpop.f32.mrf.mxu1  ;;  %v4553_v30 = vld [vmem:[%s5045_s12 + $0x314] sm:$0xf0] }
 0x19b   : > { %v4025_v50 = vor.u32 %v4553_v30, %v4024_v6 }
 0x19c   : > { %v5667_v58 = vadd.f32 %v1960_v2, %v1912_v38  ;;  %2106 = vmatmul.bf16.gmra.mxu0 %v5292_v10  ;;  %2155 = vmatmul.bf16.gmra.mxu1 %v5294_v11 }
 0x19d   : > { %2204 = vmatmul.bf16.gmra.mxu2 %v5486_v28  ;;  %2423 = vmatpush.bf16.msrb.mxu3 %v4025_v50  ;;  %v4264_v50 = vld [vmem:[%s5045_s12 + $0x4e8] sm:$0xf] }
 0x19e   : > { %6449 = vst [vmem:[#allocation44_spill] sm:$0xff] %v5667_v58  ;;  %2253 = vmatmul.bf16.gmra.mxu3 %v5488_v33  ;;  %v3768_v58 = vld [vmem:[%s5045_s12 + $0x108] sm:$0xf] }
 0x19f   : > { %v3769_v25 = vor.u32 %v4489_v34, %v3768_v58  ;;  %v4483_v58 = vld [vmem:[%s5045_s12 + $0xec] sm:$0xf] }
 0x1a0   : > { %v2009_v29 = vpop.f32.mrf.mxu2 }
 0x1a1   : > { %v2058_v61 = vpop.f32.mrf.mxu3  ;;  %v1913_v21 = vpop.f32.mrf.mxu0  ;;  %2325 = vmatpush.bf16.msrb.mxu1 %v3769_v25 }
 0x1a2   : > { %v5679_v9 = vadd.f32 %v2058_v61, %v2009_v29  ;;  %v1914_v38 = vadd.f32 %v1913_v21, %v5514_v13  ;;  %v1962_v2 = vpop.f32.mrf.mxu1  ;;  %v3757_v61 = vor.u32 %v4483_v58, %v3754_v17  ;;  %v4613_v21 = vld [vmem:[%s5045_s12 + $0x4f4] sm:$0xf0] }
 0x1a3   : > { %v4265_v34 = vor.u32 %v4613_v21, %v4264_v50  ;;  %v4645_v58 = vld [vmem:[%s5045_s12 + $0x5f4] sm:$0xf0] }
 0x1a4   : > { %v5684_v49 = vadd.f32 %v1962_v2, %v1914_v38  ;;  %v4515_v38 = vld [vmem:[%s5045_s12 + $0x1ec] sm:$0xf]  ;;  %2563 = vmatpush.bf16.msra.mxu2 %v3757_v61 }
 0x1a5   : > { %2465 = vmatpush.bf16.msra.mxu0 %v4265_v34  ;;  %v3738_v34 = vld [vmem:[%s5045_s12 + $0xd8] sm:$0xf0] }
 0x1a6   : > { %6450 = vst [vmem:[#allocation45_spill] sm:$0xff] %v5684_v49 }
 0x1a8   : > { %v2011_v37 = vpop.f32.mrf.mxu2 }
 0x1a9   : > { %v2060_v40 = vpop.f32.mrf.mxu3  ;;  %v1916_v48 = vpop.f32.mrf.mxu0 }
 0x1aa   : > { %v5686_v6 = vadd.f32 %v2060_v40, %v2011_v37  ;;  %v1917_v13 = vadd.f32 %v1916_v48, %v5528_v24  ;;  %v1965_v30 = vpop.f32.mrf.mxu1  ;;  %v3882_v24 = vld [vmem:[%s5045_s12 + $0x1f8] sm:$0xf0] }
 0x1ab   : > { %v3885_v25 = vor.u32 %v4515_v38, %v3882_v24 }
 0x1ac   : > { %v5689_v29 = vadd.f32 %v1965_v30, %v1917_v13  ;;  %2111 = vmatmul.bf16.gmra.mxu0 %v5320_v46  ;;  %2160 = vmatmul.bf16.gmra.mxu1 %v5322_v47 }
 0x1ad   : > { %2209 = vmatmul.bf16.gmra.mxu2 %v5510_v55  ;;  %2612 = vmatpush.bf16.msra.mxu3 %v3885_v25  ;;  %v4248_v25 = vld [vmem:[%s5045_s12 + $0x4c8] sm:$0xf] }
 0x1ae   : > { %6451 = vst [vmem:[#allocation46_spill] sm:$0xff] %v5689_v29  ;;  %2258 = vmatmul.bf16.gmra.mxu3 %v5512_v4  ;;  %v4392_v29 = vld [vmem:[%s5045_s12 + $0x5e8] sm:$0xf] }
 0x1af   : > { %v4393_v49 = vor.u32 %v4645_v58, %v4392_v29  ;;  %v4479_v29 = vld [vmem:[%s5045_s12 + $0xcc] sm:$0xf] }
 0x1b0   : > { %v2014_v2 = vpop.f32.mrf.mxu2 }
 0x1b1   : > { %v2063_v37 = vpop.f32.mrf.mxu3  ;;  %v1918_v40 = vpop.f32.mrf.mxu0  ;;  %2514 = vmatpush.bf16.msra.mxu1 %v4393_v49  ;;  %v6454_v49 = vld [vmem:[#allocation33_spill] sm:$0xff] }
 0x1b2   : > { %v5701_v48 = vadd.f32 %v2063_v37, %v2014_v2  ;;  %v1919_v13 = vadd.f32 %v1918_v40, %v5538_v41  ;;  %v1967_v30 = vpop.f32.mrf.mxu1  ;;  %v3741_v37 = vor.u32 %v4479_v29, %v3738_v34  ;;  %v4609_v40 = vld [vmem:[%s5045_s12 + $0x4d4] sm:$0xf0] }
 0x1b3   : > { %v4249_v58 = vor.u32 %v4609_v40, %v4248_v25  ;;  %v4641_v29 = vld [vmem:[%s5045_s12 + $0x5d4] sm:$0xf0] }
 0x1b4   : > { %v5706_v17 = vadd.f32 %v1967_v30, %v1919_v13  ;;  %v4511_v13 = vld [vmem:[%s5045_s12 + $0x1cc] sm:$0xf]  ;;  %2564 = vmatpush.bf16.msra.mxu2 %v3741_v37 }
 0x1b5   : > { %2466 = vmatpush.bf16.msra.mxu0 %v4249_v58  ;;  %v6456_v58 = vld [vmem:[#allocation14_spill] sm:$0xff] }
 0x1b6   : > { %6452 = vst [vmem:[#allocation47_spill] sm:$0xff] %v5706_v17  ;;  %v4376_v17 = vld [vmem:[%s5045_s12 + $0x5c8] sm:$0xf] }
 0x1b7   : > { %v4377_v8 = vor.u32 %v4641_v29, %v4376_v17  ;;  %v3722_v17 = vld [vmem:[%s5045_s12 + $0xb8] sm:$0xf0] }
 0x1b8   : > { %v2016_v50 = vpop.f32.mrf.mxu2  ;;  %v3850_v29 = vld [vmem:[%s5045_s12 + $0x1b8] sm:$0xf0] }
 0x1b9   : > { %v2065_v61 = vpop.f32.mrf.mxu3  ;;  %v1921_v21 = vpop.f32.mrf.mxu0  ;;  %2515 = vmatpush.bf16.msra.mxu1 %v4377_v8  ;;  %v4475_v8 = vld [vmem:[%s5045_s12 + $0xac] sm:$0xf] }
 0x1ba   : > { %v5708_v38 = vadd.f32 %v2065_v61, %v2016_v50  ;;  %v1922_v41 = vadd.f32 %v1921_v21, %v5552_v20  ;;  %v1970_v24 = vpop.f32.mrf.mxu1  ;;  %v3866_v20 = vld [vmem:[%s5045_s12 + $0x1d8] sm:$0xf0] }
 0x1bb   : > { %v3869_v50 = vor.u32 %v4511_v13, %v3866_v20 }
 0x1bc   : > { %v5711_v2 = vadd.f32 %v1970_v24, %v1922_v41  ;;  %2116 = vmatmul.bf16.gmra.mxu0 %v5348_v22  ;;  %2165 = vmatmul.bf16.gmra.mxu1 %v5350_v23 }
 0x1bd   : > { %2214 = vmatmul.bf16.gmra.mxu2 %v5534_v16  ;;  %2613 = vmatpush.bf16.msra.mxu3 %v3869_v50  ;;  %v6457_v50 = vld [vmem:[#allocation15_spill] sm:$0xff] }
 0x1be   : > { %6453 = vst [vmem:[#allocation48_spill] sm:$0xff] %v5711_v2  ;;  %2263 = vmatmul.bf16.gmra.mxu3 %v6454_v49 }
 0x1c0   : > { %v2019_v30 = vpop.f32.mrf.mxu2 }
 0x1c1   : > { %v2068_v61 = vpop.f32.mrf.mxu3  ;;  %v1923_v21 = vpop.f32.mrf.mxu0 }
 0x1c2   : > { %v5723_v41 = vadd.f32 %v2068_v61, %v2019_v30  ;;  %v1924_v24 = vadd.f32 %v1923_v21, %v5555_v12  ;;  %v1972_v2 = vpop.f32.mrf.mxu1  ;;  %v3725_v61 = vor.u32 %v4475_v8, %v3722_v17  ;;  %v4605_v21 = vld [vmem:[%s5045_s12 + $0x4b4] sm:$0xf0]  ;;  %v4360_v8 = vld [vmem:[%s5045_s12 + $0x5a8] sm:$0xf] }
 0x1c3   : > { %v4637_v17 = vld [vmem:[%s5045_s12 + $0x5b4] sm:$0xf0] }
 0x1c4   : > { %v5728_v34 = vadd.f32 %v1972_v2, %v1924_v24  ;;  %v4232_v2 = vld [vmem:[%s5045_s12 + $0x4a8] sm:$0xf]  ;;  %v4507_v24 = vld [vmem:[%s5045_s12 + $0x1ac] sm:$0xf]  ;;  %2565 = vmatpush.bf16.msra.mxu2 %v3725_v61  ;;  %v4361_v16 = vor.u32 %v4637_v17, %v4360_v8 }
 0x1c6   : > { %6455 = vst [vmem:[#allocation49_spill] sm:$0xff] %v5728_v34  ;;  %2516 = vmatpush.bf16.msra.mxu1 %v4361_v16  ;;  %v4471_v16 = vld [vmem:[%s5045_s12 + $0x8c] sm:$0xf] }
 0x1c8   : > { %v2021_v25 = vpop.f32.mrf.mxu2 }
 0x1c9   : > { %v2070_v37 = vpop.f32.mrf.mxu3  ;;  %v2082_v40 = vpop.f32.mrf.mxu0 }
 0x1ca   : > { %v5730_v13 = vadd.f32 %v2070_v37, %v2021_v25  ;;  %v2083_v12 = vadd.f32 %v2082_v40, %v5569_v39  ;;  %v2131_v20 = vpop.f32.mrf.mxu1  ;;  %v4233_v25 = vor.u32 %v4605_v21, %v4232_v2  ;;  %v3853_v37 = vor.u32 %v4507_v24, %v3850_v29 }
 0x1cc   : > { %v2132_v30 = vadd.f32 %v2131_v20, %v2083_v12  ;;  %2277 = vmatmul.bf16.vlgmr.msrb.gmra.mxu0 %v6456_v58  ;;  %2326 = vmatmul.bf16.vlgmr.msrb.gmra.mxu1 %v6457_v50 }
 0x1cd   : > { %2375 = vmatmul.bf16.vlgmr.msrb.gmra.mxu2 %v5146_v54  ;;  %2467 = vmatpush.bf16.msra.mxu0 %v4233_v25  ;;  %v6460_v25 = vld [vmem:[#allocation18_spill] sm:$0xff] }
 0x1ce   : > { %2424 = vmatmul.bf16.vlgmr.msrb.gmra.mxu3 %v5150_v57 }
 0x1cf   : > { %2614 = vmatpush.bf16.msra.mxu3 %v3853_v37 }
 0x1d0   : > { %v2180_v39 = vpop.f32.mrf.mxu2 }
 0x1d1   : > { %v2181_v40 = vadd.f32 %v2180_v39, %v2132_v30  ;;  %v2229_v12 = vpop.f32.mrf.mxu3  ;;  %v2084_v20 = vpop.f32.mrf.mxu0 }
 0x1d2   : > { %v2085_v34 = vadd.f32 %v2084_v20, %v5576_v53  ;;  %v2133_v54 = vpop.f32.mrf.mxu1 }
 0x1d3   : > { %v5744_v57 = vadd.f32 %v2229_v12, %v2181_v40  ;;  %v4601_v40 = vld [vmem:[%s5045_s12 + $0x494] sm:$0xf0]  ;;  %v3834_v12 = vld [vmem:[%s5045_s12 + $0x198] sm:$0xf0] }
 0x1d4   : > { %v2134_v49 = vadd.f32 %v2133_v54, %v2085_v34  ;;  %v6461_v54 = vld [vmem:[#allocation19_spill] sm:$0xff]  ;;  %v4216_v34 = vld [vmem:[%s5045_s12 + $0x488] sm:$0xf] }
 0x1d5   : > { %6458 = vst [vmem:[#allocation14_spill] sm:$0xff] %v5744_v57  ;;  %v4217_v8 = vor.u32 %v4601_v40, %v4216_v34 }
 0x1d7   : > { %2468 = vmatpush.bf16.msra.mxu0 %v4217_v8  ;;  %v6464_v8 = vld [vmem:[#allocation20_spill] sm:$0xff] }
 0x1d8   : > { %v2182_v2 = vpop.f32.mrf.mxu2 }
 0x1d9   : > { %v2183_v30 = vadd.f32 %v2182_v2, %v2134_v49  ;;  %v2231_v61 = vpop.f32.mrf.mxu3  ;;  %v2087_v53 = vpop.f32.mrf.mxu0  ;;  %v3706_v49 = vld [vmem:[%s5045_s12 + $0x98] sm:$0xf0] }
 0x1da   : > { %v2088_v21 = vadd.f32 %v2087_v53, %v5591_v31  ;;  %v2136_v24 = vpop.f32.mrf.mxu1  ;;  %v3709_v37 = vor.u32 %v4471_v16, %v3706_v49  ;;  %v4503_v31 = vld [vmem:[%s5045_s12 + $0x18c] sm:$0xf]  ;;  %v4344_v16 = vld [vmem:[%s5045_s12 + $0x588] sm:$0xf]  ;;  %v4633_v49 = vld [vmem:[%s5045_s12 + $0x594] sm:$0xf0] }
 0x1db   : > { %v5749_v29 = vadd.f32 %v2231_v61, %v2183_v30  ;;  %v3837_v17 = vor.u32 %v4503_v31, %v3834_v12  ;;  %v4345_v57 = vor.u32 %v4633_v49, %v4344_v16 }
 0x1dc   : > { %v2137_v39 = vadd.f32 %v2136_v24, %v2088_v21  ;;  %2282 = vmatmul.bf16.gmra.mxu0 %v6460_v25  ;;  %2331 = vmatmul.bf16.gmra.mxu1 %v6461_v54 }
 0x1dd   : > { %6459 = vst [vmem:[#allocation15_spill] sm:$0xff] %v5749_v29  ;;  %2380 = vmatmul.bf16.gmra.mxu2 %v5180_v26  ;;  %2615 = vmatpush.bf16.msra.mxu3 %v3837_v17  ;;  %v6465_v17 = vld [vmem:[#allocation21_spill] sm:$0xff] }
 0x1de   : > { %2429 = vmatmul.bf16.gmra.mxu3 %v5182_v27  ;;  %2566 = vmatpush.bf16.msra.mxu2 %v3709_v37 }
 0x1df   : > { %2517 = vmatpush.bf16.msra.mxu1 %v4345_v57  ;;  %v4467_v57 = vld [vmem:[%s5045_s12 + $0x6c] sm:$0xf] }
 0x1e0   : > { %v2185_v20 = vpop.f32.mrf.mxu2 }
 0x1e1   : > { %v2186_v2 = vadd.f32 %v2185_v20, %v2137_v39  ;;  %v2234_v30 = vpop.f32.mrf.mxu3  ;;  %v2089_v61 = vpop.f32.mrf.mxu0 }
 0x1e2   : > { %v2090_v53 = vadd.f32 %v2089_v61, %v5598_v36  ;;  %v2138_v21 = vpop.f32.mrf.mxu1  ;;  %v4597_v61 = vld [vmem:[%s5045_s12 + $0x474] sm:$0xf0] }
 0x1e3   : > { %v5762_v24 = vadd.f32 %v2234_v30, %v2186_v2  ;;  %v4200_v2 = vld [vmem:[%s5045_s12 + $0x468] sm:$0xf] }
 0x1e4   : > { %v2139_v29 = vadd.f32 %v2138_v21, %v2090_v53  ;;  %v3818_v53 = vld [vmem:[%s5045_s12 + $0x178] sm:$0xf0]  ;;  %v4201_v16 = vor.u32 %v4597_v61, %v4200_v2 }
 0x1e5   : > { %6462 = vst [vmem:[#allocation18_spill] sm:$0xff] %v5762_v24 }
 0x1e6   : > { %2469 = vmatpush.bf16.msra.mxu0 %v4201_v16  ;;  %v6468_v16 = vld [vmem:[#allocation22_spill] sm:$0xff] }
 0x1e8   : > { %v2187_v34 = vpop.f32.mrf.mxu2 }
 0x1e9   : > { %v2188_v39 = vadd.f32 %v2187_v34, %v2139_v29  ;;  %v2236_v37 = vpop.f32.mrf.mxu3  ;;  %v2092_v36 = vpop.f32.mrf.mxu0  ;;  %v3690_v29 = vld [vmem:[%s5045_s12 + $0x78] sm:$0xf0] }
 0x1ea   : > { %v2093_v40 = vadd.f32 %v2092_v36, %v5613_v45  ;;  %v2141_v31 = vpop.f32.mrf.mxu1  ;;  %v3693_v30 = vor.u32 %v4467_v57, %v3690_v29  ;;  %v4499_v45 = vld [vmem:[%s5045_s12 + $0x16c] sm:$0xf]  ;;  %v4328_v57 = vld [vmem:[%s5045_s12 + $0x568] sm:$0xf]  ;;  %v4629_v29 = vld [vmem:[%s5045_s12 + $0x574] sm:$0xf0] }
 0x1eb   : > { %v5767_v12 = vadd.f32 %v2236_v37, %v2188_v39  ;;  %v3821_v49 = vor.u32 %v4499_v45, %v3818_v53  ;;  %v4329_v24 = vor.u32 %v4629_v29, %v4328_v57 }
 0x1ec   : > { %v2142_v20 = vadd.f32 %v2141_v31, %v2093_v40  ;;  %2287 = vmatmul.bf16.gmra.mxu0 %v6464_v8  ;;  %2336 = vmatmul.bf16.gmra.mxu1 %v6465_v17 }
 0x1ed   : > { %6463 = vst [vmem:[#allocation19_spill] sm:$0xff] %v5767_v12  ;;  %2385 = vmatmul.bf16.gmra.mxu2 %v5208_v51  ;;  %2616 = vmatpush.bf16.msra.mxu3 %v3821_v49  ;;  %v6469_v49 = vld [vmem:[#allocation23_spill] sm:$0xff] }
 0x1ee   : > { %2434 = vmatmul.bf16.gmra.mxu3 %v5210_v52  ;;  %2567 = vmatpush.bf16.msra.mxu2 %v3693_v30 }
 0x1ef   : > { %2518 = vmatpush.bf16.msra.mxu1 %v4329_v24  ;;  %v4463_v24 = vld [vmem:[%s5045_s12 + $0x4c] sm:$0xf] }
 0x1f0   : > { %v2190_v21 = vpop.f32.mrf.mxu2 }
 0x1f1   : > { %v2191_v34 = vadd.f32 %v2190_v21, %v2142_v20  ;;  %v2239_v39 = vpop.f32.mrf.mxu3  ;;  %v2094_v37 = vpop.f32.mrf.mxu0 }
 0x1f2   : > { %v2095_v36 = vadd.f32 %v2094_v37, %v5620_v1  ;;  %v2143_v40 = vpop.f32.mrf.mxu1  ;;  %v4593_v37 = vld [vmem:[%s5045_s12 + $0x454] sm:$0xf0] }
 0x1f3   : > { %v5780_v31 = vadd.f32 %v2239_v39, %v2191_v34  ;;  %v4184_v34 = vld [vmem:[%s5045_s12 + $0x448] sm:$0xf] }
 0x1f4   : > { %v2144_v12 = vadd.f32 %v2143_v40, %v2095_v36  ;;  %v3802_v36 = vld [vmem:[%s5045_s12 + $0x158] sm:$0xf0]  ;;  %v4185_v57 = vor.u32 %v4593_v37, %v4184_v34 }
 0x1f5   : > { %6466 = vst [vmem:[#allocation20_spill] sm:$0xff] %v5780_v31 }
 0x1f6   : > { %2470 = vmatpush.bf16.msra.mxu0 %v4185_v57  ;;  %v6472_v57 = vld [vmem:[#allocation24_spill] sm:$0xff] }
 0x1f8   : > { %v2192_v2 = vpop.f32.mrf.mxu2 }
 0x1f9   : > { %v2193_v20 = vadd.f32 %v2192_v2, %v2144_v12  ;;  %v2241_v30 = vpop.f32.mrf.mxu3  ;;  %v2097_v1 = vpop.f32.mrf.mxu0  ;;  %v3674_v12 = vld [vmem:[%s5045_s12 + $0x58] sm:$0xf0] }
 0x1fa   : > { %v2098_v61 = vadd.f32 %v2097_v1, %v5635_v18  ;;  %v2146_v45 = vpop.f32.mrf.mxu1  ;;  %v3677_v39 = vor.u32 %v4463_v24, %v3674_v12  ;;  %v4495_v18 = vld [vmem:[%s5045_s12 + $0x14c] sm:$0xf]  ;;  %v4312_v24 = vld [vmem:[%s5045_s12 + $0x548] sm:$0xf]  ;;  %v4625_v12 = vld [vmem:[%s5045_s12 + $0x554] sm:$0xf0] }
 0x1fb   : > { %v5785_v53 = vadd.f32 %v2241_v30, %v2193_v20  ;;  %v3805_v29 = vor.u32 %v4495_v18, %v3802_v36  ;;  %v4313_v31 = vor.u32 %v4625_v12, %v4312_v24 }
 0x1fc   : > { %v2147_v21 = vadd.f32 %v2146_v45, %v2098_v61  ;;  %2292 = vmatmul.bf16.gmra.mxu0 %v6468_v16  ;;  %2341 = vmatmul.bf16.gmra.mxu1 %v6469_v49 }
 0x1fd   : > { %6467 = vst [vmem:[#allocation21_spill] sm:$0xff] %v5785_v53  ;;  %2390 = vmatmul.bf16.gmra.mxu2 %v5236_v14  ;;  %2617 = vmatpush.bf16.msra.mxu3 %v3805_v29  ;;  %v6473_v29 = vld [vmem:[#allocation25_spill] sm:$0xff] }
 0x1fe   : > { %2439 = vmatmul.bf16.gmra.mxu3 %v5238_v15  ;;  %2568 = vmatpush.bf16.msra.mxu2 %v3677_v39 }
 0x1ff   : > { %2519 = vmatpush.bf16.msra.mxu1 %v4313_v31  ;;  %v4459_v31 = vld [vmem:[%s5045_s12 + $0x2c] sm:$0xf] }
 0x200   : > { %v2195_v40 = vpop.f32.mrf.mxu2 }
 0x201   : > { %v2196_v2 = vadd.f32 %v2195_v40, %v2147_v21  ;;  %v2244_v20 = vpop.f32.mrf.mxu3  ;;  %v2099_v30 = vpop.f32.mrf.mxu0 }
 0x202   : > { %v2100_v1 = vadd.f32 %v2099_v30, %v5642_v7  ;;  %v2148_v61 = vpop.f32.mrf.mxu1  ;;  %v4589_v30 = vld [vmem:[%s5045_s12 + $0x434] sm:$0xf0] }
 0x203   : > { %v5798_v45 = vadd.f32 %v2244_v20, %v2196_v2  ;;  %v4168_v2 = vld [vmem:[%s5045_s12 + $0x428] sm:$0xf] }
 0x204   : > { %v2149_v53 = vadd.f32 %v2148_v61, %v2100_v1  ;;  %v3786_v1 = vld [vmem:[%s5045_s12 + $0x138] sm:$0xf0]  ;;  %v4169_v24 = vor.u32 %v4589_v30, %v4168_v2 }
 0x205   : > { %6470 = vst [vmem:[#allocation22_spill] sm:$0xff] %v5798_v45 }
 0x206   : > { %2471 = vmatpush.bf16.msra.mxu0 %v4169_v24  ;;  %v6476_v24 = vld [vmem:[#allocation26_spill] sm:$0xff] }
 0x208   : > { %v2197_v34 = vpop.f32.mrf.mxu2 }
 0x209   : > { %v2198_v21 = vadd.f32 %v2197_v34, %v2149_v53  ;;  %v2246_v39 = vpop.f32.mrf.mxu3  ;;  %v2102_v7 = vpop.f32.mrf.mxu0  ;;  %v3658_v53 = vld [vmem:[%s5045_s12 + $0x38] sm:$0xf0] }
 0x20a   : > { %v2103_v37 = vadd.f32 %v2102_v7, %v5657_v44  ;;  %v2151_v18 = vpop.f32.mrf.mxu1  ;;  %v3661_v20 = vor.u32 %v4459_v31, %v3658_v53  ;;  %v4491_v44 = vld [vmem:[%s5045_s12 + $0x12c] sm:$0xf]  ;;  %v4296_v31 = vld [vmem:[%s5045_s12 + $0x528] sm:$0xf]  ;;  %v4621_v53 = vld [vmem:[%s5045_s12 + $0x534] sm:$0xf0] }
 0x20b   : > { %v5803_v36 = vadd.f32 %v2246_v39, %v2198_v21  ;;  %v3789_v12 = vor.u32 %v4491_v44, %v3786_v1  ;;  %v4297_v45 = vor.u32 %v4621_v53, %v4296_v31 }
 0x20c   : > { %v2152_v40 = vadd.f32 %v2151_v18, %v2103_v37  ;;  %2297 = vmatmul.bf16.gmra.mxu0 %v6472_v57  ;;  %2346 = vmatmul.bf16.gmra.mxu1 %v6473_v29 }
 0x20d   : > { %6471 = vst [vmem:[#allocation23_spill] sm:$0xff] %v5803_v36  ;;  %2395 = vmatmul.bf16.gmra.mxu2 %v5264_v42  ;;  %2618 = vmatpush.bf16.msra.mxu3 %v3789_v12  ;;  %v6477_v12 = vld [vmem:[#allocation27_spill] sm:$0xff] }
 0x20e   : > { %2444 = vmatmul.bf16.gmra.mxu3 %v5266_v43  ;;  %2569 = vmatpush.bf16.msra.mxu2 %v3661_v20 }
 0x20f   : > { %2520 = vmatpush.bf16.msra.mxu1 %v4297_v45  ;;  %v4455_v45 = vld [vmem:[%s5045_s12 + $0xc] sm:$0xf] }
 0x210   : > { %v2200_v61 = vpop.f32.mrf.mxu2 }
 0x211   : > { %v2201_v34 = vadd.f32 %v2200_v61, %v2152_v40  ;;  %v2249_v21 = vpop.f32.mrf.mxu3  ;;  %v2104_v39 = vpop.f32.mrf.mxu0 }
 0x212   : > { %v2105_v7 = vadd.f32 %v2104_v39, %v5664_v35  ;;  %v2153_v37 = vpop.f32.mrf.mxu1  ;;  %v4585_v39 = vld [vmem:[%s5045_s12 + $0x414] sm:$0xf0] }
 0x213   : > { %v5816_v18 = vadd.f32 %v2249_v21, %v2201_v34  ;;  %v4152_v34 = vld [vmem:[%s5045_s12 + $0x408] sm:$0xf] }
 0x214   : > { %v2154_v36 = vadd.f32 %v2153_v37, %v2105_v7  ;;  %v3770_v7 = vld [vmem:[%s5045_s12 + $0x118] sm:$0xf0]  ;;  %v4153_v31 = vor.u32 %v4585_v39, %v4152_v34 }
 0x215   : > { %6474 = vst [vmem:[#allocation24_spill] sm:$0xff] %v5816_v18 }
 0x216   : > { %2472 = vmatpush.bf16.msra.mxu0 %v4153_v31  ;;  %v6480_v31 = vld [vmem:[#allocation28_spill] sm:$0xff] }
 0x218   : > { %v2202_v2 = vpop.f32.mrf.mxu2 }
 0x219   : > { %v2203_v40 = vadd.f32 %v2202_v2, %v2154_v36  ;;  %v2251_v20 = vpop.f32.mrf.mxu3  ;;  %v2107_v35 = vpop.f32.mrf.mxu0  ;;  %v3642_v36 = vld [vmem:[%s5045_s12 + $0x18] sm:$0xf0] }
 0x21a   : > { %v2108_v30 = vadd.f32 %v2107_v35, %v5679_v9  ;;  %v2156_v44 = vpop.f32.mrf.mxu1  ;;  %v3645_v21 = vor.u32 %v4455_v45, %v3642_v36  ;;  %v4487_v9 = vld [vmem:[%s5045_s12 + $0x10c] sm:$0xf]  ;;  %v4280_v45 = vld [vmem:[%s5045_s12 + $0x508] sm:$0xf]  ;;  %v4617_v36 = vld [vmem:[%s5045_s12 + $0x514] sm:$0xf0] }
 0x21b   : > { %v5821_v1 = vadd.f32 %v2251_v20, %v2203_v40  ;;  %v3773_v53 = vor.u32 %v4487_v9, %v3770_v7  ;;  %v4281_v18 = vor.u32 %v4617_v36, %v4280_v45 }
 0x21c   : > { %v2157_v61 = vadd.f32 %v2156_v44, %v2108_v30  ;;  %2302 = vmatmul.bf16.gmra.mxu0 %v6476_v24  ;;  %2351 = vmatmul.bf16.gmra.mxu1 %v6477_v12 }
 0x21d   : > { %6475 = vst [vmem:[#allocation25_spill] sm:$0xff] %v5821_v1  ;;  %2400 = vmatmul.bf16.gmra.mxu2 %v5292_v10  ;;  %2619 = vmatpush.bf16.msra.mxu3 %v3773_v53  ;;  %v6481_v53 = vld [vmem:[#allocation29_spill] sm:$0xff] }
 0x21e   : > { %2449 = vmatmul.bf16.gmra.mxu3 %v5294_v11  ;;  %2570 = vmatpush.bf16.msra.mxu2 %v3645_v21 }
 0x21f   : > { %2521 = vmatpush.bf16.msra.mxu1 %v4281_v18  ;;  %v4611_v18 = vld [vmem:[%s5045_s12 + $0x4ec] sm:$0xf] }
 0x220   : > { %v2205_v37 = vpop.f32.mrf.mxu2 }
 0x221   : > { %v2206_v2 = vadd.f32 %v2205_v37, %v2157_v61  ;;  %v2254_v40 = vpop.f32.mrf.mxu3  ;;  %v2109_v20 = vpop.f32.mrf.mxu0 }
 0x222   : > { %v2110_v35 = vadd.f32 %v2109_v20, %v5686_v6  ;;  %v2158_v30 = vpop.f32.mrf.mxu1  ;;  %v4010_v20 = vld [vmem:[%s5045_s12 + $0x2f8] sm:$0xf0] }
 0x223   : > { %v5834_v44 = vadd.f32 %v2254_v40, %v2206_v2  ;;  %v4547_v2 = vld [vmem:[%s5045_s12 + $0x2ec] sm:$0xf] }
 0x224   : > { %v2159_v1 = vadd.f32 %v2158_v30, %v2110_v35  ;;  %v4394_v35 = vld [vmem:[%s5045_s12 + $0x5f8] sm:$0xf0]  ;;  %v4013_v45 = vor.u32 %v4547_v2, %v4010_v20 }
 0x225   : > { %6478 = vst [vmem:[#allocation26_spill] sm:$0xff] %v5834_v44 }
 0x226   : > { %2661 = vmatpush.bf16.msrb.mxu0 %v4013_v45  ;;  %v6484_v45 = vld [vmem:[#allocation30_spill] sm:$0xff] }
 0x228   : > { %v2207_v34 = vpop.f32.mrf.mxu2 }
 0x229   : > { %v2208_v61 = vadd.f32 %v2207_v34, %v2159_v1  ;;  %v2256_v21 = vpop.f32.mrf.mxu3  ;;  %v2112_v6 = vpop.f32.mrf.mxu0  ;;  %v4266_v1 = vld [vmem:[%s5045_s12 + $0x4f8] sm:$0xf0] }
 0x22a   : > { %v2113_v39 = vadd.f32 %v2112_v6, %v5701_v48  ;;  %v2161_v9 = vpop.f32.mrf.mxu1  ;;  %v4269_v40 = vor.u32 %v4611_v18, %v4266_v1  ;;  %v4643_v48 = vld [vmem:[%s5045_s12 + $0x5ec] sm:$0xf]  ;;  %v4138_v1 = vld [vmem:[%s5045_s12 + $0x3f8] sm:$0xf0] }
 0x22b   : > { %v5839_v7 = vadd.f32 %v2256_v21, %v2208_v61  ;;  %v4397_v36 = vor.u32 %v4643_v48, %v4394_v35  ;;  %v4579_v18 = vld [vmem:[%s5045_s12 + $0x3ec] sm:$0xf] }
 0x22c   : > { %v2162_v37 = vadd.f32 %v2161_v9, %v2113_v39  ;;  %2307 = vmatmul.bf16.gmra.mxu0 %v6480_v31  ;;  %2356 = vmatmul.bf16.gmra.mxu1 %v6481_v53  ;;  %v4141_v44 = vor.u32 %v4579_v18, %v4138_v1 }
 0x22d   : > { %6479 = vst [vmem:[#allocation27_spill] sm:$0xff] %v5839_v7  ;;  %2405 = vmatmul.bf16.gmra.mxu2 %v5320_v46  ;;  %2808 = vmatpush.bf16.msrb.mxu3 %v4397_v36  ;;  %v6485_v36 = vld [vmem:[#allocation31_spill] sm:$0xff] }
 0x22e   : > { %2454 = vmatmul.bf16.gmra.mxu3 %v5322_v47  ;;  %2759 = vmatpush.bf16.msrb.mxu2 %v4269_v40 }
 0x22f   : > { %2710 = vmatpush.bf16.msrb.mxu1 %v4141_v44  ;;  %v4607_v44 = vld [vmem:[%s5045_s12 + $0x4cc] sm:$0xf] }
 0x230   : > { %v2210_v30 = vpop.f32.mrf.mxu2 }
 0x231   : > { %v2211_v34 = vadd.f32 %v2210_v30, %v2162_v37  ;;  %v2259_v61 = vpop.f32.mrf.mxu3  ;;  %v2114_v21 = vpop.f32.mrf.mxu0 }
 0x232   : > { %v2115_v6 = vadd.f32 %v2114_v21, %v5708_v38  ;;  %v2163_v39 = vpop.f32.mrf.mxu1  ;;  %v3994_v21 = vld [vmem:[%s5045_s12 + $0x2d8] sm:$0xf0] }
 0x233   : > { %v5852_v9 = vadd.f32 %v2259_v61, %v2211_v34  ;;  %v4543_v34 = vld [vmem:[%s5045_s12 + $0x2cc] sm:$0xf] }
 0x234   : > { %v2164_v7 = vadd.f32 %v2163_v39, %v2115_v6  ;;  %v4378_v6 = vld [vmem:[%s5045_s12 + $0x5d8] sm:$0xf0]  ;;  %v3997_v18 = vor.u32 %v4543_v34, %v3994_v21 }
 0x235   : > { %6482 = vst [vmem:[#allocation28_spill] sm:$0xff] %v5852_v9 }
 0x236   : > { %2662 = vmatpush.bf16.msrb.mxu0 %v3997_v18  ;;  %v4539_v18 = vld [vmem:[%s5045_s12 + $0x2ac] sm:$0xf] }
 0x238   : > { %v2212_v2 = vpop.f32.mrf.mxu2 }
 0x239   : > { %v2213_v37 = vadd.f32 %v2212_v2, %v2164_v7  ;;  %v2261_v40 = vpop.f32.mrf.mxu3  ;;  %v2117_v38 = vpop.f32.mrf.mxu0  ;;  %v4250_v7 = vld [vmem:[%s5045_s12 + $0x4d8] sm:$0xf0] }
 0x23a   : > { %v2118_v20 = vadd.f32 %v2117_v38, %v5723_v41  ;;  %v2166_v48 = vpop.f32.mrf.mxu1  ;;  %v4253_v61 = vor.u32 %v4607_v44, %v4250_v7  ;;  %v4639_v41 = vld [vmem:[%s5045_s12 + $0x5cc] sm:$0xf]  ;;  %v4122_v7 = vld [vmem:[%s5045_s12 + $0x3d8] sm:$0xf0] }
 0x23b   : > { %v5857_v35 = vadd.f32 %v2261_v40, %v2213_v37  ;;  %v4381_v1 = vor.u32 %v4639_v41, %v4378_v6  ;;  %v4575_v44 = vld [vmem:[%s5045_s12 + $0x3cc] sm:$0xf] }
 0x23c   : > { %v2167_v30 = vadd.f32 %v2166_v48, %v2118_v20  ;;  %2312 = vmatmul.bf16.gmra.mxu0 %v6484_v45  ;;  %2361 = vmatmul.bf16.gmra.mxu1 %v6485_v36  ;;  %v4125_v9 = vor.u32 %v4575_v44, %v4122_v7 }
 0x23d   : > { %6483 = vst [vmem:[#allocation29_spill] sm:$0xff] %v5857_v35  ;;  %2410 = vmatmul.bf16.gmra.mxu2 %v5348_v22  ;;  %2809 = vmatpush.bf16.msrb.mxu3 %v4381_v1 }
 0x23e   : > { %2459 = vmatmul.bf16.gmra.mxu3 %v5350_v23  ;;  %2760 = vmatpush.bf16.msrb.mxu2 %v4253_v61 }
 0x23f   : > { %2711 = vmatpush.bf16.msrb.mxu1 %v4125_v9  ;;  %v4603_v9 = vld [vmem:[%s5045_s12 + $0x4ac] sm:$0xf] }
 0x240   : > { %v2215_v39 = vpop.f32.mrf.mxu2 }
 0x241   : > { %v2216_v2 = vadd.f32 %v2215_v39, %v2167_v30  ;;  %v2264_v37 = vpop.f32.mrf.mxu3  ;;  %v2119_v40 = vpop.f32.mrf.mxu0  ;;  %v4234_v39 = vld [vmem:[%s5045_s12 + $0x4b8] sm:$0xf0] }
 0x242   : > { %v2120_v38 = vadd.f32 %v2119_v40, %v5730_v13  ;;  %v2168_v20 = vpop.f32.mrf.mxu1  ;;  %v4237_v1 = vor.u32 %v4603_v9, %v4234_v39 }
 0x243   : > { %v5870_v48 = vadd.f32 %v2264_v37, %v2216_v2  ;;  %v4635_v2 = vld [vmem:[%s5045_s12 + $0x5ac] sm:$0xf]  ;;  %v4362_v37 = vld [vmem:[%s5045_s12 + $0x5b8] sm:$0xf0] }
 0x244   : > { %v2169_v35 = vadd.f32 %v2168_v20, %v2120_v38  ;;  %v4365_v20 = vor.u32 %v4635_v2, %v4362_v37  ;;  %2761 = vmatpush.bf16.msrb.mxu2 %v4237_v1  ;;  %v4599_v37 = vld [vmem:[%s5045_s12 + $0x48c] sm:$0xf] }
 0x245   : > { %6486 = vst [vmem:[#allocation30_spill] sm:$0xff] %v5870_v48 }
 0x246   : > { %2810 = vmatpush.bf16.msrb.mxu3 %v4365_v20 }
 0x248   : > { %v2217_v30 = vpop.f32.mrf.mxu2 }
 0x249   : > { %v2218_v34 = vadd.f32 %v2217_v30, %v2169_v35  ;;  %v2266_v61 = vpop.f32.mrf.mxu3  ;;  %v2278_v13 = vpop.f32.mrf.mxu0  ;;  %v3978_v35 = vld [vmem:[%s5045_s12 + $0x2b8] sm:$0xf0] }
 0x24a   : > { %v2327_v21 = vpop.f32.mrf.mxu1  ;;  %v3981_v38 = vor.u32 %v4539_v18, %v3978_v35 }
 0x24b   : > { %v5874_v41 = vadd.f32 %v2266_v61, %v2218_v34  ;;  %v2328_v6 = vadd.f32 %v2327_v21, %v2278_v13  ;;  %v4571_v61 = vld [vmem:[%s5045_s12 + $0x3ac] sm:$0xf]  ;;  %v4106_v13 = vld [vmem:[%s5045_s12 + $0x3b8] sm:$0xf0] }
 0x24c   : > { %2473 = vmatmul.bf16.vlgmr.msra.gmra.mxu0 %v5368_v60  ;;  %2522 = vmatmul.bf16.vlgmr.msra.gmra.mxu1 %v5370_v62  ;;  %v4109_v21 = vor.u32 %v4571_v61, %v4106_v13 }
 0x24d   : > { %6487 = vst [vmem:[#allocation31_spill] sm:$0xff] %v5874_v41  ;;  %2571 = vmatmul.bf16.vlgmr.msra.gmra.mxu2 %v6456_v58  ;;  %2663 = vmatpush.bf16.msrb.mxu0 %v3981_v38  ;;  %v4535_v38 = vld [vmem:[%s5045_s12 + $0x28c] sm:$0xf] }
 0x24e   : > { %2620 = vmatmul.bf16.vlgmr.msra.gmra.mxu3 %v6457_v50  ;;  %2712 = vmatpush.bf16.msrb.mxu1 %v4109_v21 }
 0x250   : > { %v2376_v40 = vpop.f32.mrf.mxu2 }
 0x251   : > { %v2377_v44 = vadd.f32 %v2376_v40, %v2328_v6  ;;  %v2425_v7 = vpop.f32.mrf.mxu3  ;;  %v2280_v30 = vpop.f32.mrf.mxu0  ;;  %v4218_v40 = vld [vmem:[%s5045_s12 + $0x498] sm:$0xf0] }
 0x252   : > { %v2329_v34 = vpop.f32.mrf.mxu1  ;;  %v4221_v20 = vor.u32 %v4599_v37, %v4218_v40 }
 0x253   : > { %v5886_v58 = vadd.f32 %v2425_v7, %v2377_v44  ;;  %v2330_v50 = vadd.f32 %v2329_v34, %v2280_v30  ;;  %v3962_v44 = vld [vmem:[%s5045_s12 + $0x298] sm:$0xf0]  ;;  %v4631_v7 = vld [vmem:[%s5045_s12 + $0x58c] sm:$0xf] }
 0x254   : > { %v4346_v30 = vld [vmem:[%s5045_s12 + $0x598] sm:$0xf0]  ;;  %2762 = vmatpush.bf16.msrb.mxu2 %v4221_v20 }
 0x255   : > { %v4349_v61 = vor.u32 %v4631_v7, %v4346_v30  ;;  %v4595_v30 = vld [vmem:[%s5045_s12 + $0x46c] sm:$0xf] }
 0x257   : > { %2811 = vmatpush.bf16.msrb.mxu3 %v4349_v61 }
 0x258   : > { %v2378_v9 = vpop.f32.mrf.mxu2 }
 0x259   : > { %v2379_v6 = vadd.f32 %v2378_v9, %v2330_v50  ;;  %v2427_v39 = vpop.f32.mrf.mxu3  ;;  %v2283_v18 = vpop.f32.mrf.mxu0  ;;  %v3965_v50 = vor.u32 %v4535_v38, %v3962_v44 }
 0x25a   : > { %v2332_v1 = vpop.f32.mrf.mxu1 }
 0x25b   : > { %v5890_v35 = vadd.f32 %v2427_v39, %v2379_v6  ;;  %v2333_v2 = vadd.f32 %v2332_v1, %v2283_v18  ;;  %2664 = vmatpush.bf16.msrb.mxu0 %v3965_v50  ;;  %v4567_v39 = vld [vmem:[%s5045_s12 + $0x38c] sm:$0xf]  ;;  %v4090_v18 = vld [vmem:[%s5045_s12 + $0x398] sm:$0xf0] }
 0x25c   : > { %2478 = vmatmul.bf16.gmra.mxu0 %v5390_v56  ;;  %2527 = vmatmul.bf16.gmra.mxu1 %v5392_v63  ;;  %v4093_v1 = vor.u32 %v4567_v39, %v4090_v18  ;;  %v4531_v50 = vld [vmem:[%s5045_s12 + $0x26c] sm:$0xf] }
 0x25d   : > { %2576 = vmatmul.bf16.gmra.mxu2 %v6460_v25 }
 0x25e   : > { %2625 = vmatmul.bf16.gmra.mxu3 %v6461_v54  ;;  %2713 = vmatpush.bf16.msrb.mxu1 %v4093_v1 }
 0x260   : > { %v2381_v34 = vpop.f32.mrf.mxu2 }
 0x261   : > { %v2382_v13 = vadd.f32 %v2381_v34, %v2333_v2  ;;  %v2430_v21 = vpop.f32.mrf.mxu3  ;;  %v2285_v9 = vpop.f32.mrf.mxu0  ;;  %v4202_v34 = vld [vmem:[%s5045_s12 + $0x478] sm:$0xf0] }
 0x262   : > { %v2334_v6 = vpop.f32.mrf.mxu1  ;;  %v4205_v61 = vor.u32 %v4595_v30, %v4202_v34 }
 0x263   : > { %v5902_v25 = vadd.f32 %v2430_v21, %v2382_v13  ;;  %v2335_v54 = vadd.f32 %v2334_v6, %v2285_v9  ;;  %v3946_v13 = vld [vmem:[%s5045_s12 + $0x278] sm:$0xf0]  ;;  %v4627_v21 = vld [vmem:[%s5045_s12 + $0x56c] sm:$0xf] }
 0x264   : > { %v4330_v9 = vld [vmem:[%s5045_s12 + $0x578] sm:$0xf0]  ;;  %2763 = vmatpush.bf16.msrb.mxu2 %v4205_v61 }
 0x265   : > { %v4333_v39 = vor.u32 %v4627_v21, %v4330_v9  ;;  %v4591_v9 = vld [vmem:[%s5045_s12 + $0x44c] sm:$0xf] }
 0x267   : > { %2812 = vmatpush.bf16.msrb.mxu3 %v4333_v39 }
 0x268   : > { %v2383_v37 = vpop.f32.mrf.mxu2 }
 0x269   : > { %v2384_v2 = vadd.f32 %v2383_v37, %v2335_v54  ;;  %v2432_v40 = vpop.f32.mrf.mxu3  ;;  %v2288_v38 = vpop.f32.mrf.mxu0  ;;  %v3949_v54 = vor.u32 %v4531_v50, %v3946_v13 }
 0x26a   : > { %v2337_v20 = vpop.f32.mrf.mxu1 }
 0x26b   : > { %v5906_v44 = vadd.f32 %v2432_v40, %v2384_v2  ;;  %v2338_v7 = vadd.f32 %v2337_v20, %v2288_v38  ;;  %2665 = vmatpush.bf16.msrb.mxu0 %v3949_v54  ;;  %v4563_v40 = vld [vmem:[%s5045_s12 + $0x36c] sm:$0xf]  ;;  %v4074_v38 = vld [vmem:[%s5045_s12 + $0x378] sm:$0xf0] }
 0x26c   : > { %2483 = vmatmul.bf16.gmra.mxu0 %v5414_v0  ;;  %2532 = vmatmul.bf16.gmra.mxu1 %v5416_v5  ;;  %v4077_v20 = vor.u32 %v4563_v40, %v4074_v38  ;;  %v4527_v54 = vld [vmem:[%s5045_s12 + $0x24c] sm:$0xf] }
 0x26d   : > { %2581 = vmatmul.bf16.gmra.mxu2 %v6464_v8 }
 0x26e   : > { %2630 = vmatmul.bf16.gmra.mxu3 %v6465_v17  ;;  %2714 = vmatpush.bf16.msrb.mxu1 %v4077_v20 }
 0x270   : > { %v2386_v6 = vpop.f32.mrf.mxu2 }
 0x271   : > { %v2387_v18 = vadd.f32 %v2386_v6, %v2338_v7  ;;  %v2435_v1 = vpop.f32.mrf.mxu3  ;;  %v2290_v37 = vpop.f32.mrf.mxu0  ;;  %v4186_v6 = vld [vmem:[%s5045_s12 + $0x458] sm:$0xf0] }
 0x272   : > { %v2339_v2 = vpop.f32.mrf.mxu1  ;;  %v4189_v39 = vor.u32 %v4591_v9, %v4186_v6 }
 0x273   : > { %v5918_v8 = vadd.f32 %v2435_v1, %v2387_v18  ;;  %v2340_v17 = vadd.f32 %v2339_v2, %v2290_v37  ;;  %v3930_v18 = vld [vmem:[%s5045_s12 + $0x258] sm:$0xf0]  ;;  %v4623_v1 = vld [vmem:[%s5045_s12 + $0x54c] sm:$0xf] }
 0x274   : > { %v4314_v37 = vld [vmem:[%s5045_s12 + $0x558] sm:$0xf0]  ;;  %2764 = vmatpush.bf16.msrb.mxu2 %v4189_v39 }
 0x275   : > { %v4317_v40 = vor.u32 %v4623_v1, %v4314_v37  ;;  %v4587_v37 = vld [vmem:[%s5045_s12 + $0x42c] sm:$0xf] }
 0x277   : > { %2813 = vmatpush.bf16.msrb.mxu3 %v4317_v40 }
 0x278   : > { %v2388_v30 = vpop.f32.mrf.mxu2 }
 0x279   : > { %v2389_v7 = vadd.f32 %v2388_v30, %v2340_v17  ;;  %v2437_v34 = vpop.f32.mrf.mxu3  ;;  %v2293_v50 = vpop.f32.mrf.mxu0  ;;  %v3933_v17 = vor.u32 %v4527_v54, %v3930_v18 }
 0x27a   : > { %v2342_v61 = vpop.f32.mrf.mxu1 }
 0x27b   : > { %v5922_v13 = vadd.f32 %v2437_v34, %v2389_v7  ;;  %v2343_v21 = vadd.f32 %v2342_v61, %v2293_v50  ;;  %2666 = vmatpush.bf16.msrb.mxu0 %v3933_v17  ;;  %v4559_v34 = vld [vmem:[%s5045_s12 + $0x34c] sm:$0xf]  ;;  %v4058_v50 = vld [vmem:[%s5045_s12 + $0x358] sm:$0xf0] }
 0x27c   : > { %2488 = vmatmul.bf16.gmra.mxu0 %v5438_v19  ;;  %2537 = vmatmul.bf16.gmra.mxu1 %v5440_v32  ;;  %v4061_v61 = vor.u32 %v4559_v34, %v4058_v50  ;;  %v4523_v17 = vld [vmem:[%s5045_s12 + $0x22c] sm:$0xf] }
 0x27d   : > { %2586 = vmatmul.bf16.gmra.mxu2 %v6468_v16 }
 0x27e   : > { %2635 = vmatmul.bf16.gmra.mxu3 %v6469_v49  ;;  %2715 = vmatpush.bf16.msrb.mxu1 %v4061_v61 }
 0x280   : > { %v2391_v2 = vpop.f32.mrf.mxu2 }
 0x281   : > { %v2392_v38 = vadd.f32 %v2391_v2, %v2343_v21  ;;  %v2440_v20 = vpop.f32.mrf.mxu3  ;;  %v2295_v30 = vpop.f32.mrf.mxu0  ;;  %v4170_v2 = vld [vmem:[%s5045_s12 + $0x438] sm:$0xf0] }
 0x282   : > { %v2344_v7 = vpop.f32.mrf.mxu1  ;;  %v4173_v40 = vor.u32 %v4587_v37, %v4170_v2 }
 0x283   : > { %v5934_v16 = vadd.f32 %v2440_v20, %v2392_v38  ;;  %v2345_v49 = vadd.f32 %v2344_v7, %v2295_v30  ;;  %v3914_v38 = vld [vmem:[%s5045_s12 + $0x238] sm:$0xf0]  ;;  %v4619_v20 = vld [vmem:[%s5045_s12 + $0x52c] sm:$0xf] }
 0x284   : > { %v4298_v30 = vld [vmem:[%s5045_s12 + $0x538] sm:$0xf0]  ;;  %2765 = vmatpush.bf16.msrb.mxu2 %v4173_v40 }
 0x285   : > { %v4301_v34 = vor.u32 %v4619_v20, %v4298_v30  ;;  %v4583_v30 = vld [vmem:[%s5045_s12 + $0x40c] sm:$0xf] }
 0x287   : > { %2814 = vmatpush.bf16.msrb.mxu3 %v4301_v34 }
 0x288   : > { %v2393_v9 = vpop.f32.mrf.mxu2 }
 0x289   : > { %v2394_v21 = vadd.f32 %v2393_v9, %v2345_v49  ;;  %v2442_v6 = vpop.f32.mrf.mxu3  ;;  %v2298_v54 = vpop.f32.mrf.mxu0  ;;  %v3917_v49 = vor.u32 %v4523_v17, %v3914_v38 }
 0x28a   : > { %v2347_v39 = vpop.f32.mrf.mxu1 }
 0x28b   : > { %v5938_v18 = vadd.f32 %v2442_v6, %v2394_v21  ;;  %v2348_v1 = vadd.f32 %v2347_v39, %v2298_v54  ;;  %2667 = vmatpush.bf16.msrb.mxu0 %v3917_v49  ;;  %v4555_v6 = vld [vmem:[%s5045_s12 + $0x32c] sm:$0xf]  ;;  %v4042_v54 = vld [vmem:[%s5045_s12 + $0x338] sm:$0xf0] }
 0x28c   : > { %2493 = vmatmul.bf16.gmra.mxu0 %v5462_v59  ;;  %2542 = vmatmul.bf16.gmra.mxu1 %v5464_v3  ;;  %v4045_v39 = vor.u32 %v4555_v6, %v4042_v54  ;;  %v4519_v49 = vld [vmem:[%s5045_s12 + $0x20c] sm:$0xf] }
 0x28d   : > { %2591 = vmatmul.bf16.gmra.mxu2 %v6472_v57 }
 0x28e   : > { %2640 = vmatmul.bf16.gmra.mxu3 %v6473_v29  ;;  %2716 = vmatpush.bf16.msrb.mxu1 %v4045_v39 }
 0x290   : > { %v2396_v7 = vpop.f32.mrf.mxu2 }
 0x291   : > { %v2397_v50 = vadd.f32 %v2396_v7, %v2348_v1  ;;  %v2445_v61 = vpop.f32.mrf.mxu3  ;;  %v2300_v9 = vpop.f32.mrf.mxu0  ;;  %v4154_v7 = vld [vmem:[%s5045_s12 + $0x418] sm:$0xf0] }
 0x292   : > { %v2349_v21 = vpop.f32.mrf.mxu1  ;;  %v4157_v34 = vor.u32 %v4583_v30, %v4154_v7 }
 0x293   : > { %v5950_v57 = vadd.f32 %v2445_v61, %v2397_v50  ;;  %v2350_v29 = vadd.f32 %v2349_v21, %v2300_v9  ;;  %v3898_v50 = vld [vmem:[%s5045_s12 + $0x218] sm:$0xf0]  ;;  %v4615_v61 = vld [vmem:[%s5045_s12 + $0x50c] sm:$0xf] }
 0x294   : > { %v4282_v9 = vld [vmem:[%s5045_s12 + $0x518] sm:$0xf0]  ;;  %2766 = vmatpush.bf16.msrb.mxu2 %v4157_v34 }
 0x295   : > { %v4285_v6 = vor.u32 %v4615_v61, %v4282_v9 }
 0x297   : > { %2815 = vmatpush.bf16.msrb.mxu3 %v4285_v6 }
 0x298   : > { %v2398_v37 = vpop.f32.mrf.mxu2 }
 0x299   : > { %v2399_v1 = vadd.f32 %v2398_v37, %v2350_v29  ;;  %v2447_v2 = vpop.f32.mrf.mxu3  ;;  %v2303_v17 = vpop.f32.mrf.mxu0  ;;  %v3901_v29 = vor.u32 %v4519_v49, %v3898_v50 }
 0x29a   : > { %v2352_v40 = vpop.f32.mrf.mxu1 }
 0x29b   : > { %v5954_v38 = vadd.f32 %v2447_v2, %v2399_v1  ;;  %v2353_v20 = vadd.f32 %v2352_v40, %v2303_v17  ;;  %2668 = vmatpush.bf16.msrb.mxu0 %v3901_v29  ;;  %v4551_v2 = vld [vmem:[%s5045_s12 + $0x30c] sm:$0xf]  ;;  %v4026_v17 = vld [vmem:[%s5045_s12 + $0x318] sm:$0xf0] }
 0x29c   : > { %2498 = vmatmul.bf16.gmra.mxu0 %v5486_v28  ;;  %2547 = vmatmul.bf16.gmra.mxu1 %v5488_v33  ;;  %v4029_v40 = vor.u32 %v4551_v2, %v4026_v17  ;;  %v6488_v17 = vld [vmem:[#allocation32_spill] sm:$0xff] }
 0x29d   : > { %2596 = vmatmul.bf16.gmra.mxu2 %v6476_v24 }
 0x29e   : > { %2645 = vmatmul.bf16.gmra.mxu3 %v6477_v12  ;;  %2717 = vmatpush.bf16.msrb.mxu1 %v4029_v40 }
 0x2a0   : > { %v2401_v21 = vpop.f32.mrf.mxu2 }
 0x2a1   : > { %v2402_v54 = vadd.f32 %v2401_v21, %v2353_v20  ;;  %v2450_v39 = vpop.f32.mrf.mxu3  ;;  %v2305_v37 = vpop.f32.mrf.mxu0 }
 0x2a2   : > { %v2354_v1 = vpop.f32.mrf.mxu1 }
 0x2a3   : > { %v5966_v24 = vadd.f32 %v2450_v39, %v2402_v54  ;;  %v2355_v12 = vadd.f32 %v2354_v1, %v2305_v37 }
 0x2a8   : > { %v2403_v30 = vpop.f32.mrf.mxu2 }
 0x2a9   : > { %v2404_v7 = vadd.f32 %v2403_v30, %v2355_v12  ;;  %v2452_v41 = vpop.f32.mrf.mxu3  ;;  %v2308_v48 = vpop.f32.mrf.mxu0 }
 0x2aa   : > { %v2357_v49 = vpop.f32.mrf.mxu1 }
 0x2ab   : > { %v5970_v50 = vadd.f32 %v2452_v41, %v2404_v7  ;;  %v2358_v20 = vadd.f32 %v2357_v49, %v2308_v48 }
 0x2ac   : > { %2503 = vmatmul.bf16.gmra.mxu0 %v5510_v55  ;;  %2552 = vmatmul.bf16.gmra.mxu1 %v5512_v4 }
 0x2ad   : > { %2601 = vmatmul.bf16.gmra.mxu2 %v6480_v31  ;;  %v6489_v31 = vld [vmem:[#allocation33_spill] sm:$0xff] }
 0x2ae   : > { %2650 = vmatmul.bf16.gmra.mxu3 %v6481_v53 }
 0x2b0   : > { %v2406_v34 = vpop.f32.mrf.mxu2 }
 0x2b1   : > { %v2407_v61 = vadd.f32 %v2406_v34, %v2358_v20  ;;  %v2455_v9 = vpop.f32.mrf.mxu3  ;;  %v2310_v21 = vpop.f32.mrf.mxu0 }
 0x2b2   : > { %v2359_v29 = vpop.f32.mrf.mxu1 }
 0x2b3   : > { %v5976_v6 = vadd.f32 %v2455_v9, %v2407_v61  ;;  %v2360_v54 = vadd.f32 %v2359_v29, %v2310_v21 }
 0x2b8   : > { %v2408_v39 = vpop.f32.mrf.mxu2 }
 0x2b9   : > { %v2409_v41 = vadd.f32 %v2408_v39, %v2360_v54  ;;  %v2457_v37 = vpop.f32.mrf.mxu3  ;;  %v2313_v48 = vpop.f32.mrf.mxu0 }
 0x2ba   : > { %v2362_v1 = vpop.f32.mrf.mxu1 }
 0x2bb   : > { %v5978_v12 = vadd.f32 %v2457_v37, %v2409_v41  ;;  %v2363_v2 = vadd.f32 %v2362_v1, %v2313_v48  ;;  %v6491_v37 = vld [vmem:[#allocation17_spill] sm:$0xff] }
 0x2bc   : > { %2508 = vmatmul.bf16.gmra.mxu0 %v6488_v17  ;;  %2557 = vmatmul.bf16.gmra.mxu1 %v6489_v31 }
 0x2bd   : > { %2606 = vmatmul.bf16.gmra.mxu2 %v6484_v45 }
 0x2be   : > { %2655 = vmatmul.bf16.gmra.mxu3 %v6485_v36  ;;  %v6490_v36 = vld [vmem:[#allocation16_spill] sm:$0xff] }
 0x2c0   : > { %v2411_v53 = vpop.f32.mrf.mxu2 }
 0x2c1   : > { %v2412_v40 = vadd.f32 %v2411_v53, %v2363_v2  ;;  %v2460_v30 = vpop.f32.mrf.mxu3  ;;  %v2315_v7 = vpop.f32.mrf.mxu0 }
 0x2c2   : > { %v2364_v49 = vpop.f32.mrf.mxu1 }
 0x2c3   : > { %v5984_v20 = vadd.f32 %v2460_v30, %v2412_v40  ;;  %v2365_v34 = vadd.f32 %v2364_v49, %v2315_v7 }
 0x2c8   : > { %v2413_v61 = vpop.f32.mrf.mxu2 }
 0x2c9   : > { %v2414_v9 = vadd.f32 %v2413_v61, %v2365_v34  ;;  %v2462_v21 = vpop.f32.mrf.mxu3  ;;  %v2474_v29 = vpop.f32.mrf.mxu0 }
 0x2ca   : > { %v2475_v54 = vadd.f32 %v2474_v29, %v5886_v58  ;;  %v2523_v39 = vpop.f32.mrf.mxu1 }
 0x2cb   : > { %v5987_v41 = vadd.f32 %v2462_v21, %v2414_v9 }
 0x2cc   : > { %v5989_v45 = vadd.f32 %v2523_v39, %v2475_v54  ;;  %2669 = vmatmul.bf16.vlgmr.msrb.gmra.mxu0 %v6490_v36  ;;  %2718 = vmatmul.bf16.vlgmr.msrb.gmra.mxu1 %v6491_v37 }
 0x2cd   : > { %2767 = vmatmul.bf16.vlgmr.msrb.gmra.mxu2 %v5368_v60 }
 0x2ce   : > { %2816 = vmatmul.bf16.vlgmr.msrb.gmra.mxu3 %v5370_v62 }
 0x2d0   : > { %v2572_v48 = vpop.f32.mrf.mxu2 }
 0x2d1   : > { %v2621_v1 = vpop.f32.mrf.mxu3  ;;  %v2476_v2 = vpop.f32.mrf.mxu0 }
 0x2d2   : > { %v5995_v53 = vadd.f32 %v2621_v1, %v2572_v48  ;;  %v2477_v58 = vadd.f32 %v2476_v2, %v5890_v35  ;;  %v2525_v40 = vpop.f32.mrf.mxu1 }
 0x2d4   : > { %v5998_v30 = vadd.f32 %v2525_v40, %v2477_v58 }
 0x2d8   : > { %v2574_v7 = vpop.f32.mrf.mxu2 }
 0x2d9   : > { %v2623_v49 = vpop.f32.mrf.mxu3  ;;  %v2479_v34 = vpop.f32.mrf.mxu0 }
 0x2da   : > { %v6000_v61 = vadd.f32 %v2623_v49, %v2574_v7  ;;  %v2480_v9 = vadd.f32 %v2479_v34, %v5902_v25  ;;  %v2528_v60 = vpop.f32.mrf.mxu1 }
 0x2dc   : > { %v6003_v21 = vadd.f32 %v2528_v60, %v2480_v9  ;;  %2674 = vmatmul.bf16.gmra.mxu0 %v5180_v26  ;;  %2723 = vmatmul.bf16.gmra.mxu1 %v5182_v27 }
 0x2dd   : > { %2772 = vmatmul.bf16.gmra.mxu2 %v5390_v56 }
 0x2de   : > { %2821 = vmatmul.bf16.gmra.mxu3 %v5392_v63 }
 0x2e0   : > { %v2577_v62 = vpop.f32.mrf.mxu2 }
 0x2e1   : > { %v2626_v35 = vpop.f32.mrf.mxu3  ;;  %v2481_v29 = vpop.f32.mrf.mxu0 }
 0x2e2   : > { %v6009_v54 = vadd.f32 %v2626_v35, %v2577_v62  ;;  %v2482_v39 = vadd.f32 %v2481_v29, %v5906_v44  ;;  %v2530_v36 = vpop.f32.mrf.mxu1 }
 0x2e4   : > { %v6012_v25 = vadd.f32 %v2530_v36, %v2482_v39 }
 0x2e8   : > { %v2579_v37 = vpop.f32.mrf.mxu2 }
 0x2e9   : > { %v2628_v48 = vpop.f32.mrf.mxu3  ;;  %v2484_v1 = vpop.f32.mrf.mxu0 }
 0x2ea   : > { %v6014_v26 = vadd.f32 %v2628_v48, %v2579_v37  ;;  %v2485_v27 = vadd.f32 %v2484_v1, %v5918_v8  ;;  %v2533_v56 = vpop.f32.mrf.mxu1 }
 0x2ec   : > { %v6017_v2 = vadd.f32 %v2533_v56, %v2485_v27  ;;  %2679 = vmatmul.bf16.gmra.mxu0 %v5208_v51  ;;  %2728 = vmatmul.bf16.gmra.mxu1 %v5210_v52 }
 0x2ed   : > { %2777 = vmatmul.bf16.gmra.mxu2 %v5414_v0 }
 0x2ee   : > { %2826 = vmatmul.bf16.gmra.mxu3 %v5416_v5 }
 0x2f0   : > { %v2582_v63 = vpop.f32.mrf.mxu2 }
 0x2f1   : > { %v2631_v44 = vpop.f32.mrf.mxu3  ;;  %v2486_v58 = vpop.f32.mrf.mxu0 }
 0x2f2   : > { %v6023_v40 = vadd.f32 %v2631_v44, %v2582_v63  ;;  %v2487_v7 = vadd.f32 %v2486_v58, %v5922_v13  ;;  %v2535_v49 = vpop.f32.mrf.mxu1 }
 0x2f4   : > { %v6026_v8 = vadd.f32 %v2535_v49, %v2487_v7 }
 0x2f8   : > { %v2584_v34 = vpop.f32.mrf.mxu2 }
 0x2f9   : > { %v2633_v9 = vpop.f32.mrf.mxu3  ;;  %v2489_v60 = vpop.f32.mrf.mxu0 }
 0x2fa   : > { %v6028_v51 = vadd.f32 %v2633_v9, %v2584_v34  ;;  %v2490_v52 = vadd.f32 %v2489_v60, %v5934_v16  ;;  %v2538_v0 = vpop.f32.mrf.mxu1 }
 0x2fc   : > { %v6031_v62 = vadd.f32 %v2538_v0, %v2490_v52  ;;  %2684 = vmatmul.bf16.gmra.mxu0 %v5236_v14  ;;  %2733 = vmatmul.bf16.gmra.mxu1 %v5238_v15 }
 0x2fd   : > { %2782 = vmatmul.bf16.gmra.mxu2 %v5438_v19 }
 0x2fe   : > { %2831 = vmatmul.bf16.gmra.mxu3 %v5440_v32 }
 0x300   : > { %v2587_v5 = vpop.f32.mrf.mxu2 }
 0x301   : > { %v2636_v13 = vpop.f32.mrf.mxu3  ;;  %v2491_v35 = vpop.f32.mrf.mxu0 }
 0x302   : > { %v6037_v29 = vadd.f32 %v2636_v13, %v2587_v5  ;;  %v2492_v39 = vadd.f32 %v2491_v35, %v5938_v18  ;;  %v2540_v36 = vpop.f32.mrf.mxu1 }
 0x304   : > { %v6040_v16 = vadd.f32 %v2540_v36, %v2492_v39 }
 0x308   : > { %v2589_v37 = vpop.f32.mrf.mxu2 }
 0x309   : > { %v2638_v48 = vpop.f32.mrf.mxu3  ;;  %v2494_v1 = vpop.f32.mrf.mxu0 }
 0x30a   : > { %v6042_v14 = vadd.f32 %v2638_v48, %v2589_v37  ;;  %v2495_v15 = vadd.f32 %v2494_v1, %v5950_v57  ;;  %v2543_v19 = vpop.f32.mrf.mxu1 }
 0x30c   : > { %v6045_v27 = vadd.f32 %v2543_v19, %v2495_v15  ;;  %2689 = vmatmul.bf16.gmra.mxu0 %v5264_v42  ;;  %2738 = vmatmul.bf16.gmra.mxu1 %v5266_v43 }
 0x30d   : > { %2787 = vmatmul.bf16.gmra.mxu2 %v5462_v59 }
 0x30e   : > { %2836 = vmatmul.bf16.gmra.mxu3 %v5464_v3 }
 0x310   : > { %v2592_v32 = vpop.f32.mrf.mxu2 }
 0x311   : > { %v2641_v18 = vpop.f32.mrf.mxu3  ;;  %v2496_v56 = vpop.f32.mrf.mxu0 }
 0x312   : > { %v6051_v63 = vadd.f32 %v2641_v18, %v2592_v32  ;;  %v2497_v44 = vadd.f32 %v2496_v56, %v5954_v38  ;;  %v2545_v58 = vpop.f32.mrf.mxu1 }
 0x314   : > { %v6054_v57 = vadd.f32 %v2545_v58, %v2497_v44 }
 0x318   : > { %v2594_v7 = vpop.f32.mrf.mxu2 }
 0x319   : > { %v2643_v49 = vpop.f32.mrf.mxu3  ;;  %v2499_v34 = vpop.f32.mrf.mxu0 }
 0x31a   : > { %v6056_v42 = vadd.f32 %v2643_v49, %v2594_v7  ;;  %v2500_v43 = vadd.f32 %v2499_v34, %v5966_v24  ;;  %v2548_v59 = vpop.f32.mrf.mxu1 }
 0x31c   : > { %v6059_v9 = vadd.f32 %v2548_v59, %v2500_v43  ;;  %2694 = vmatmul.bf16.gmra.mxu0 %v5292_v10  ;;  %2743 = vmatmul.bf16.gmra.mxu1 %v5294_v11 }
 0x31d   : > { %2792 = vmatmul.bf16.gmra.mxu2 %v5486_v28 }
 0x31e   : > { %2841 = vmatmul.bf16.gmra.mxu3 %v5488_v33 }
 0x320   : > { %v2597_v3 = vpop.f32.mrf.mxu2 }
 0x321   : > { %v2646_v38 = vpop.f32.mrf.mxu3  ;;  %v2501_v60 = vpop.f32.mrf.mxu0 }
 0x322   : > { %v6065_v52 = vadd.f32 %v2646_v38, %v2597_v3  ;;  %v2502_v0 = vadd.f32 %v2501_v60, %v5970_v50  ;;  %v2550_v5 = vpop.f32.mrf.mxu1 }
 0x324   : > { %v6068_v24 = vadd.f32 %v2550_v5, %v2502_v0 }
 0x328   : > { %v2599_v13 = vpop.f32.mrf.mxu2 }
 0x329   : > { %v2648_v35 = vpop.f32.mrf.mxu3  ;;  %v2504_v39 = vpop.f32.mrf.mxu0 }
 0x32a   : > { %v6070_v10 = vadd.f32 %v2648_v35, %v2599_v13  ;;  %v2505_v11 = vadd.f32 %v2504_v39, %v5976_v6  ;;  %v2553_v28 = vpop.f32.mrf.mxu1 }
 0x32c   : > { %v6073_v36 = vadd.f32 %v2553_v28, %v2505_v11  ;;  %2699 = vmatmul.bf16.gmra.mxu0 %v5320_v46  ;;  %2748 = vmatmul.bf16.gmra.mxu1 %v5322_v47 }
 0x32d   : > { %2797 = vmatmul.bf16.gmra.mxu2 %v5510_v55 }
 0x32e   : > { %2846 = vmatmul.bf16.gmra.mxu3 %v5512_v4 }
 0x330   : > { %v2602_v33 = vpop.f32.mrf.mxu2 }
 0x331   : > { %v2651_v50 = vpop.f32.mrf.mxu3  ;;  %v2506_v37 = vpop.f32.mrf.mxu0 }
 0x332   : > { %v6079_v48 = vadd.f32 %v2651_v50, %v2602_v33  ;;  %v2507_v1 = vadd.f32 %v2506_v37, %v5978_v12  ;;  %v2555_v15 = vpop.f32.mrf.mxu1 }
 0x334   : > { %v6082_v6 = vadd.f32 %v2555_v15, %v2507_v1 }
 0x338   : > { %v2604_v19 = vpop.f32.mrf.mxu2 }
 0x339   : > { %v2653_v32 = vpop.f32.mrf.mxu3  ;;  %v2509_v18 = vpop.f32.mrf.mxu0 }
 0x33a   : > { %v6084_v46 = vadd.f32 %v2653_v32, %v2604_v19  ;;  %v2510_v47 = vadd.f32 %v2509_v18, %v5984_v20  ;;  %v2558_v55 = vpop.f32.mrf.mxu1 }
 0x33c   : > { %v6087_v56 = vadd.f32 %v2558_v55, %v2510_v47  ;;  %2704 = vmatmul.bf16.gmra.mxu0 %v5348_v22  ;;  %2753 = vmatmul.bf16.gmra.mxu1 %v5350_v23 }
 0x33d   : > { %2802 = vmatmul.bf16.gmra.mxu2 %v6488_v17 }
 0x33e   : > { %2851 = vmatmul.bf16.gmra.mxu3 %v6489_v31 }
 0x340   : > { %v2607_v4 = vpop.f32.mrf.mxu2 }
 0x341   : > { %v2656_v12 = vpop.f32.mrf.mxu3  ;;  %v2511_v44 = vpop.f32.mrf.mxu0 }
 0x342   : > { %v6093_v58 = vadd.f32 %v2656_v12, %v2607_v4  ;;  %v2512_v7 = vadd.f32 %v2511_v44, %v5987_v41  ;;  %v2560_v49 = vpop.f32.mrf.mxu1 }
 0x344   : > { %v6096_v20 = vadd.f32 %v2560_v49, %v2512_v7 }
 0x348   : > { %v2609_v34 = vpop.f32.mrf.mxu2 }
 0x349   : > { %v2658_v43 = vpop.f32.mrf.mxu3  ;;  %v2670_v59 = vpop.f32.mrf.mxu0 }
 0x34a   : > { %v6098_v22 = vadd.f32 %v2658_v43, %v2609_v34  ;;  %v2671_v23 = vadd.f32 %v2670_v59, %v5995_v53  ;;  %v2719_v17 = vpop.f32.mrf.mxu1 }
 0x34c   : > { %v2720_v3 = vadd.f32 %v2719_v17, %v2671_v23 }
 0x350   : > { %v2768_v31 = vpop.f32.mrf.mxu2 }
 0x351   : > { %v2769_v38 = vadd.f32 %v2768_v31, %v2720_v3  ;;  %v2817_v60 = vpop.f32.mrf.mxu3  ;;  %v2672_v0 = vpop.f32.mrf.mxu0 }
 0x352   : > { %v2673_v5 = vadd.f32 %v2672_v0, %v6000_v61  ;;  %v2721_v13 = vpop.f32.mrf.mxu1 }
 0x353   : > { %v6102_v41 = vadd.f32 %v2817_v60, %v2769_v38 }
 0x354   : > { %v2722_v35 = vadd.f32 %v2721_v13, %v2673_v5 }
 0x358   : > { %v2770_v39 = vpop.f32.mrf.mxu2 }
 0x359   : > { %v2771_v11 = vadd.f32 %v2770_v39, %v2722_v35  ;;  %v2819_v28 = vpop.f32.mrf.mxu3  ;;  %v2675_v33 = vpop.f32.mrf.mxu0 }
 0x35a   : > { %v2676_v50 = vadd.f32 %v2675_v33, %v6009_v54  ;;  %v2724_v37 = vpop.f32.mrf.mxu1 }
 0x35b   : > { %v6105_v53 = vadd.f32 %v2819_v28, %v2771_v11 }
 0x35c   : > { %v2725_v1 = vadd.f32 %v2724_v37, %v2676_v50 }
 0x360   : > { %v2773_v15 = vpop.f32.mrf.mxu2 }
 0x361   : > { %v2774_v19 = vadd.f32 %v2773_v15, %v2725_v1  ;;  %v2822_v32 = vpop.f32.mrf.mxu3  ;;  %v2677_v18 = vpop.f32.mrf.mxu0 }
 0x362   : > { %v2678_v61 = vadd.f32 %v2677_v18, %v6014_v26  ;;  %v2726_v47 = vpop.f32.mrf.mxu1 }
 0x363   : > { %v6108_v55 = vadd.f32 %v2822_v32, %v2774_v19 }
 0x364   : > { %v2727_v4 = vadd.f32 %v2726_v47, %v2678_v61 }
 0x368   : > { %v2775_v12 = vpop.f32.mrf.mxu2 }
 0x369   : > { %v2776_v44 = vadd.f32 %v2775_v12, %v2727_v4  ;;  %v2824_v7 = vpop.f32.mrf.mxu3  ;;  %v2680_v49 = vpop.f32.mrf.mxu0 }
 0x36a   : > { %v2681_v54 = vadd.f32 %v2680_v49, %v6023_v40  ;;  %v2729_v34 = vpop.f32.mrf.mxu1 }
 0x36b   : > { %v6111_v43 = vadd.f32 %v2824_v7, %v2776_v44 }
 0x36c   : > { %v2730_v59 = vadd.f32 %v2729_v34, %v2681_v54 }
 0x370   : > { %v2778_v23 = vpop.f32.mrf.mxu2 }
 0x371   : > { %v2779_v17 = vadd.f32 %v2778_v23, %v2730_v59  ;;  %v2827_v3 = vpop.f32.mrf.mxu3  ;;  %v2682_v31 = vpop.f32.mrf.mxu0 }
 0x372   : > { %v2683_v26 = vadd.f32 %v2682_v31, %v6028_v51  ;;  %v2731_v38 = vpop.f32.mrf.mxu1 }
 0x373   : > { %v6114_v60 = vadd.f32 %v2827_v3, %v2779_v17 }
 0x374   : > { %v2732_v0 = vadd.f32 %v2731_v38, %v2683_v26 }
 0x378   : > { %v2780_v5 = vpop.f32.mrf.mxu2 }
 0x379   : > { %v2781_v13 = vadd.f32 %v2780_v5, %v2732_v0  ;;  %v2829_v35 = vpop.f32.mrf.mxu3  ;;  %v2685_v39 = vpop.f32.mrf.mxu0 }
 0x37a   : > { %v2686_v40 = vadd.f32 %v2685_v39, %v6037_v29  ;;  %v2734_v11 = vpop.f32.mrf.mxu1 }
 0x37b   : > { %v6117_v28 = vadd.f32 %v2829_v35, %v2781_v13 }
 0x37c   : > { %v2735_v33 = vadd.f32 %v2734_v11, %v2686_v40 }
 0x380   : > { %v2783_v50 = vpop.f32.mrf.mxu2 }
 0x381   : > { %v2784_v37 = vadd.f32 %v2783_v50, %v2735_v33  ;;  %v2832_v1 = vpop.f32.mrf.mxu3  ;;  %v2687_v15 = vpop.f32.mrf.mxu0 }
 0x382   : > { %v2688_v51 = vadd.f32 %v2687_v15, %v6042_v14  ;;  %v2736_v19 = vpop.f32.mrf.mxu1 }
 0x383   : > { %v6120_v32 = vadd.f32 %v2832_v1, %v2784_v37 }
 0x384   : > { %v2737_v18 = vadd.f32 %v2736_v19, %v2688_v51 }
 0x388   : > { %v2785_v61 = vpop.f32.mrf.mxu2 }
 0x389   : > { %v2786_v47 = vadd.f32 %v2785_v61, %v2737_v18  ;;  %v2834_v4 = vpop.f32.mrf.mxu3  ;;  %v2690_v12 = vpop.f32.mrf.mxu0 }
 0x38a   : > { %v2739_v44 = vpop.f32.mrf.mxu1  ;;  %v2691_v7 = vadd.f32 %v2690_v12, %v6051_v63 }
 0x38b   : > { %v6122_v29 = vadd.f32 %v2834_v4, %v2786_v47 }
 0x38c   : > { %v2740_v49 = vadd.f32 %v2739_v44, %v2691_v7 }
 0x390   : > { %v2788_v54 = vpop.f32.mrf.mxu2 }
 0x391   : > { %v2789_v34 = vadd.f32 %v2788_v54, %v2740_v49  ;;  %v2837_v59 = vpop.f32.mrf.mxu3  ;;  %v2692_v23 = vpop.f32.mrf.mxu0 }
 0x392   : > { %v2741_v17 = vpop.f32.mrf.mxu1  ;;  %v2693_v3 = vadd.f32 %v2692_v23, %v6056_v42 }
 0x393   : > { %v6125_v14 = vadd.f32 %v2837_v59, %v2789_v34 }
 0x394   : > { %v2742_v31 = vadd.f32 %v2741_v17, %v2693_v3 }
 0x398   : > { %v2790_v26 = vpop.f32.mrf.mxu2 }
 0x399   : > { %v2791_v38 = vadd.f32 %v2790_v26, %v2742_v31  ;;  %v2839_v0 = vpop.f32.mrf.mxu3  ;;  %v2695_v5 = vpop.f32.mrf.mxu0 }
 0x39a   : > { %v2744_v13 = vpop.f32.mrf.mxu1  ;;  %v2696_v63 = vadd.f32 %v2695_v5, %v6065_v52 }
 0x39b   : > { %v6128_v35 = vadd.f32 %v2839_v0, %v2791_v38 }
 0x39c   : > { %v2745_v39 = vadd.f32 %v2744_v13, %v2696_v63 }
 0x3a0   : > { %v2793_v40 = vpop.f32.mrf.mxu2 }
 0x3a1   : > { %v2794_v11 = vadd.f32 %v2793_v40, %v2745_v39  ;;  %v2842_v33 = vpop.f32.mrf.mxu3  ;;  %v2697_v50 = vpop.f32.mrf.mxu0 }
 0x3a2   : > { %v2746_v37 = vpop.f32.mrf.mxu1  ;;  %v2698_v42 = vadd.f32 %v2697_v50, %v6070_v10 }
 0x3a3   : > { %v6131_v1 = vadd.f32 %v2842_v33, %v2794_v11 }
 0x3a4   : > { %v2747_v15 = vadd.f32 %v2746_v37, %v2698_v42 }
 0x3a8   : > { %v2795_v51 = vpop.f32.mrf.mxu2 }
 0x3a9   : > { %v2796_v19 = vadd.f32 %v2795_v51, %v2747_v15  ;;  %v2844_v18 = vpop.f32.mrf.mxu3  ;;  %v2700_v61 = vpop.f32.mrf.mxu0 }
 0x3aa   : > { %v2749_v47 = vpop.f32.mrf.mxu1  ;;  %v2701_v52 = vadd.f32 %v2700_v61, %v6079_v48 }
 0x3ab   : > { %v6134_v4 = vadd.f32 %v2844_v18, %v2796_v19 }
 0x3ac   : > { %v2750_v12 = vadd.f32 %v2749_v47, %v2701_v52 }
 0x3b0   : > { %v2798_v44 = vpop.f32.mrf.mxu2 }
 0x3b1   : > { %v2799_v7 = vadd.f32 %v2798_v44, %v2750_v12  ;;  %v2847_v49 = vpop.f32.mrf.mxu3  ;;  %v2702_v54 = vpop.f32.mrf.mxu0 }
 0x3b2   : > { %v2751_v34 = vpop.f32.mrf.mxu1  ;;  %v2703_v10 = vadd.f32 %v2702_v54, %v6084_v46 }
 0x3b3   : > { %v6137_v59 = vadd.f32 %v2847_v49, %v2799_v7 }
 0x3b4   : > { %v2752_v23 = vadd.f32 %v2751_v34, %v2703_v10 }
 0x3b8   : > { %v2800_v17 = vpop.f32.mrf.mxu2 }
 0x3b9   : > { %v2801_v3 = vadd.f32 %v2800_v17, %v2752_v23  ;;  %v2849_v31 = vpop.f32.mrf.mxu3  ;;  %v2705_v26 = vpop.f32.mrf.mxu0 }
 0x3ba   : > { %v2706_v0 = vadd.f32 %v2705_v26, %v6093_v58  ;;  %v2754_v48 = vpop.f32.mrf.mxu1 }
 0x3bb   : > { %v6140_v38 = vadd.f32 %v2849_v31, %v2801_v3 }
 0x3bc   : > { %v2755_v5 = vadd.f32 %v2754_v48, %v2706_v0 }
 0x3c0   : > { %v2803_v13 = vpop.f32.mrf.mxu2 }
 0x3c1   : > { %v2804_v63 = vadd.f32 %v2803_v13, %v2755_v5  ;;  %v2852_v39 = vpop.f32.mrf.mxu3  ;;  %v2707_v40 = vpop.f32.mrf.mxu0 }
 0x3c2   : > { %v2708_v33 = vadd.f32 %v2707_v40, %v6098_v22  ;;  %v2756_v46 = vpop.f32.mrf.mxu1 }
 0x3c3   : > { %v6143_v11 = vadd.f32 %v2852_v39, %v2804_v63 }
 0x3c4   : > { %v2757_v50 = vadd.f32 %v2756_v46, %v2708_v33 }
 0x3c7   : > { %2860 = sbr.rel (%p4398_p1) target bundleno = 1036 (0x40c), region = 48 }
 0x3c8   : > { %v2805_v37 = vpop.f32.mrf.mxu2 }
 0x3c9   : > { %v2806_v42 = vadd.f32 %v2805_v37, %v2757_v50  ;;  %v2854_v15 = vpop.f32.mrf.mxu3 }
 0x3cb   : > { %v6146_v51 = vadd.f32 %v2854_v15, %v2806_v42 }
 0x3cc   : > { %v6492_v58 = vld [vmem:[#allocation34_spill] sm:$0xff]  ;;  %2863 = vst [vmem:[#allocation2 + $0xd8] sm:$0xff] %v5989_v45  ;;  %v6494_v18 = vld [vmem:[#allocation35_spill] sm:$0xff]  ;;  %v6496_v61 = vld [vmem:[#allocation36_spill] sm:$0xff] }
 0x3cd   : > { %2861 = vst [vmem:[#allocation2 + $0xb0] sm:$0xff] %v6492_v58  ;;  %v6493_v19 = vld [vmem:[#allocation14_spill] sm:$0xff]  ;;  %v6495_v22 = vld [vmem:[#allocation15_spill] sm:$0xff]  ;;  %v6498_v52 = vld [vmem:[#allocation37_spill] sm:$0xff] }
 0x3ce   : > { %2862 = vst [vmem:[#allocation2 + $0x1b0] sm:$0xff] %v6493_v19  ;;  %v6497_v47 = vld [vmem:[#allocation18_spill] sm:$0xff]  ;;  %v6499_v12 = vld [vmem:[#allocation19_spill] sm:$0xff]  ;;  %v6501_v7 = vld [vmem:[#allocation20_spill] sm:$0xff] }
 0x3cf   : > { %2864 = vst [vmem:[#allocation2 + $0x18] sm:$0xff] %v6102_v41  ;;  %v6500_v44 = vld [vmem:[#allocation38_spill] sm:$0xff]  ;;  %v6502_v49 = vld [vmem:[#allocation39_spill] sm:$0xff]  ;;  %v6503_v54 = vld [vmem:[#allocation21_spill] sm:$0xff] }
 0x3d0   : > { %2865 = vst [vmem:[#allocation2 + $0x50] sm:$0xff] %v6494_v18  ;;  %v6504_v34 = vld [vmem:[#allocation40_spill] sm:$0xff]  ;;  %v6505_v10 = vld [vmem:[#allocation22_spill] sm:$0xff]  ;;  %v6506_v23 = vld [vmem:[#allocation41_spill] sm:$0xff] }
 0x3d1   : > { %2866 = vst [vmem:[#allocation2 + $0x168] sm:$0xff] %v6495_v22  ;;  %v6507_v17 = vld [vmem:[#allocation23_spill] sm:$0xff]  ;;  %v6508_v3 = vld [vmem:[#allocation42_spill] sm:$0xff]  ;;  %v6509_v31 = vld [vmem:[#allocation24_spill] sm:$0xff] }
 0x3d2   : > { %2867 = vst [vmem:[#allocation2 + $0x130] sm:$0xff] %v5998_v30  ;;  %v6510_v26 = vld [vmem:[#allocation43_spill] sm:$0xff]  ;;  %v6511_v0 = vld [vmem:[#allocation25_spill] sm:$0xff]  ;;  %v6512_v48 = vld [vmem:[#allocation44_spill] sm:$0xff] }
 0x3d3   : > { %2868 = vst [vmem:[#allocation2 + $0x48] sm:$0xff] %v6105_v53  ;;  %v6513_v5 = vld [vmem:[#allocation26_spill] sm:$0xff]  ;;  %v6514_v13 = vld [vmem:[#allocation45_spill] sm:$0xff]  ;;  %v6515_v63 = vld [vmem:[#allocation27_spill] sm:$0xff] }
 0x3d4   : > { %2869 = vst [vmem:[#allocation2 + $0x180] sm:$0xff] %v6496_v61  ;;  %v6516_v39 = vld [vmem:[#allocation46_spill] sm:$0xff]  ;;  %v6517_v40 = vld [vmem:[#allocation28_spill] sm:$0xff]  ;;  %v6518_v33 = vld [vmem:[#allocation47_spill] sm:$0xff] }
 0x3d5   : > { %2870 = vst [vmem:[#allocation2 + $0x110] sm:$0xff] %v6497_v47  ;;  %v6519_v46 = vld [vmem:[#allocation29_spill] sm:$0xff]  ;;  %v6520_v50 = vld [vmem:[#allocation48_spill] sm:$0xff]  ;;  %v6521_v37 = vld [vmem:[#allocation30_spill] sm:$0xff] }
 0x3d6   : > { %2871 = vst [vmem:[#allocation2 + $0x118] sm:$0xff] %v6003_v21  ;;  %v6522_v42 = vld [vmem:[#allocation49_spill] sm:$0xff]  ;;  %v6523_v15 = vld [vmem:[#allocation31_spill] sm:$0xff] }
 0x3d7   : > { %2872 = vst [vmem:[#allocation2 + $0x98] sm:$0xff] %v6108_v55 }
 0x3d8   : > { %2873 = vst [vmem:[#allocation2 + $0x120] sm:$0xff] %v6498_v52 }
 0x3d9   : > { %2874 = vst [vmem:[#allocation2 + $0x150] sm:$0xff] %v6499_v12 }
 0x3da   : > { %2875 = vst [vmem:[#allocation2 + $0x108] sm:$0xff] %v6012_v25 }
 0x3db   : > { %2876 = vst [vmem:[#allocation2 + $0x60] sm:$0xff] %v6111_v43 }
 0x3dc   : > { %2877 = vst [vmem:[#allocation2 + $0xe0] sm:$0xff] %v6500_v44 }
 0x3dd   : > { %2878 = vst [vmem:[#allocation2 + $0x188] sm:$0xff] %v6501_v7 }
 0x3de   : > { %2879 = vst [vmem:[#allocation2 + $0x138] sm:$0xff] %v6017_v2 }
 0x3df   : > { %2880 = vst [vmem:[#allocation2 + $0x140] sm:$0xff] %v6114_v60 }
 0x3e0   : > { %2881 = vst [vmem:[#allocation2 + $0x80] sm:$0xff] %v6502_v49 }
 0x3e1   : > { %2882 = vst [vmem:[#allocation2 + $0x1a8] sm:$0xff] %v6503_v54 }
 0x3e2   : > { %2883 = vst [vmem:[#allocation2 + $0x1b8] sm:$0xff] %v6026_v8 }
 0x3e3   : > { %2884 = vst [vmem:[#allocation2 + $0x28] sm:$0xff] %v6117_v28 }
 0x3e4   : > { %2885 = vst [vmem:[#allocation2 + $0x1e8] sm:$0xff] %v6504_v34 }
 0x3e5   : > { %2886 = vst [vmem:[#allocation2 + $0xf8] sm:$0xff] %v6505_v10 }
 0x3e6   : > { %2887 = vst [vmem:[#allocation2 + $0x160] sm:$0xff] %v6031_v62 }
 0x3e7   : > { %2888 = vst [vmem:[#allocation2 + $0x30] sm:$0xff] %v6120_v32 }
 0x3e8   : > { %2889 = vst [vmem:[#allocation2 + $0x1e0] sm:$0xff] %v6506_v23 }
 0x3e9   : > { %2890 = vst [vmem:[#allocation2] sm:$0xff] %v6507_v17 }
 0x3ea   : > { %2891 = vst [vmem:[#allocation2 + $0xf0] sm:$0xff] %v6040_v16 }
 0x3eb   : > { %2892 = vst [vmem:[#allocation2 + $0x8] sm:$0xff] %v6122_v29 }
 0x3ec   : > { %2893 = vst [vmem:[#allocation2 + $0x148] sm:$0xff] %v6508_v3 }
 0x3ed   : > { %2894 = vst [vmem:[#allocation2 + $0x1d0] sm:$0xff] %v6509_v31 }
 0x3ee   : > { %2895 = vst [vmem:[#allocation2 + $0x100] sm:$0xff] %v6045_v27 }
 0x3ef   : > { %2896 = vst [vmem:[#allocation2 + $0xc8] sm:$0xff] %v6125_v14 }
 0x3f0   : > { %2897 = vst [vmem:[#allocation2 + $0x40] sm:$0xff] %v6510_v26 }
 0x3f1   : > { %2898 = vst [vmem:[#allocation2 + $0x1f8] sm:$0xff] %v6511_v0 }
 0x3f2   : > { %2899 = vst [vmem:[#allocation2 + $0x20] sm:$0xff] %v6054_v57 }
 0x3f3   : > { %2900 = vst [vmem:[#allocation2 + $0x128] sm:$0xff] %v6128_v35 }
 0x3f4   : > { %2901 = vst [vmem:[#allocation2 + $0x1a0] sm:$0xff] %v6512_v48 }
 0x3f5   : > { %2902 = vst [vmem:[#allocation2 + $0x1f0] sm:$0xff] %v6513_v5 }
 0x3f6   : > { %2903 = vst [vmem:[#allocation2 + $0xe8] sm:$0xff] %v6059_v9 }
 0x3f7   : > { %2904 = vst [vmem:[#allocation2 + $0x78] sm:$0xff] %v6131_v1 }
 0x3f8   : > { %2905 = vst [vmem:[#allocation2 + $0x70] sm:$0xff] %v6514_v13 }
 0x3f9   : > { %2906 = vst [vmem:[#allocation2 + $0x90] sm:$0xff] %v6515_v63 }
 0x3fa   : > { %2907 = vst [vmem:[#allocation2 + $0x1d8] sm:$0xff] %v6068_v24 }
 0x3fb   : > { %2908 = vst [vmem:[#allocation2 + $0xd0] sm:$0xff] %v6134_v4 }
 0x3fc   : > { %2909 = vst [vmem:[#allocation2 + $0xb8] sm:$0xff] %v6516_v39 }
 0x3fd   : > { %2910 = vst [vmem:[#allocation2 + $0x88] sm:$0xff] %v6517_v40 }
 0x3fe   : > { %2911 = vst [vmem:[#allocation2 + $0xa8] sm:$0xff] %v6073_v36 }
 0x3ff   : > { %2912 = vst [vmem:[#allocation2 + $0x1c8] sm:$0xff] %v6137_v59 }
 0x400   : > { %2913 = vst [vmem:[#allocation2 + $0x170] sm:$0xff] %v6518_v33 }
 0x401   : > { %2914 = vst [vmem:[#allocation2 + $0x178] sm:$0xff] %v6519_v46 }
 0x402   : > { %2915 = vst [vmem:[#allocation2 + $0x68] sm:$0xff] %v6082_v6 }
 0x403   : > { %2916 = vst [vmem:[#allocation2 + $0x190] sm:$0xff] %v6140_v38 }
 0x404   : > { %2917 = vst [vmem:[#allocation2 + $0x198] sm:$0xff] %v6520_v50 }
 0x405   : > { %2918 = vst [vmem:[#allocation2 + $0x38] sm:$0xff] %v6521_v37 }
 0x406   : > { %2919 = vst [vmem:[#allocation2 + $0xc0] sm:$0xff] %v6087_v56 }
 0x407   : > { %2920 = vst [vmem:[#allocation2 + $0x1c0] sm:$0xff] %v6143_v11 }
 0x408   : > { %2921 = vst [vmem:[#allocation2 + $0x158] sm:$0xff] %v6522_v42 }
 0x409   : > { %2922 = vst [vmem:[#allocation2 + $0x10] sm:$0xff] %v6523_v15 }
 0x40a   : > { %2923 = vst [vmem:[#allocation2 + $0x58] sm:$0xff] %v6096_v20 }
 0x40b   : > { %2924 = vst [vmem:[#allocation2 + $0xa0] sm:$0xff] %v6146_v51 }
 0x40c PF: > { %p4399_p2 = scmp.eq.s32.totalorder %s4910_s15, 0 }
 0x40e   : > { %2928 = sbr.rel (%p4399_p2) target bundleno = 1110 (0x456), region = 52 }
 0x413   : > { %v2929_v58 = vld [vmem:[#allocation2 + $0xb0] sm:$0xff]  ;;  %v2931_v18 = vld [vmem:[#allocation2 + $0xd8] sm:$0xff]  ;;  %v6524_v22 = vld [vmem:[#allocation34_spill] sm:$0xff] }
 0x414   : > { %v2930_v19 = vld [vmem:[#allocation2 + $0x1b0] sm:$0xff]  ;;  %v2993_v61 = vadd.f32 %v2929_v58, %v6524_v22  ;;  %v6525_v47 = vld [vmem:[#allocation14_spill] sm:$0xff]  ;;  %v2995_v12 = vadd.f32 %v2931_v18, %v5989_v45  ;;  %v2932_v44 = vld [vmem:[#allocation2 + $0x18] sm:$0xff] }
 0x415   : > { %v2994_v52 = vadd.f32 %v2930_v19, %v6525_v47  ;;  %v2933_v7 = vld [vmem:[#allocation2 + $0x50] sm:$0xff]  ;;  %v2934_v49 = vld [vmem:[#allocation2 + $0x168] sm:$0xff]  ;;  %v2996_v54 = vadd.f32 %v2932_v44, %v6102_v41  ;;  %v2937_v26 = vld [vmem:[#allocation2 + $0x180] sm:$0xff] }
 0x416   : > { %v2935_v34 = vld [vmem:[#allocation2 + $0x130] sm:$0xff]  ;;  %3057 = vst [vmem:[#allocation2 + $0xb0] sm:$0xff] %v2993_v61  ;;  %v2936_v17 = vld [vmem:[#allocation2 + $0x48] sm:$0xff]  ;;  %v2939_v5 = vld [vmem:[#allocation2 + $0x118] sm:$0xff] }
 0x417   : > { %v6526_v10 = vld [vmem:[#allocation35_spill] sm:$0xff]  ;;  %3058 = vst [vmem:[#allocation2 + $0x1b0] sm:$0xff] %v2994_v52  ;;  %v2999_v0 = vadd.f32 %v2935_v34, %v5998_v30  ;;  %v3000_v45 = vadd.f32 %v2936_v17, %v6105_v53  ;;  %v6528_v13 = vld [vmem:[#allocation36_spill] sm:$0xff]  ;;  %v6529_v39 = vld [vmem:[#allocation18_spill] sm:$0xff]  ;;  %v3003_v46 = vadd.f32 %v2939_v5, %v6003_v21 }
 0x418   : > { %v2997_v23 = vadd.f32 %v2933_v7, %v6526_v10  ;;  %v6527_v3 = vld [vmem:[#allocation15_spill] sm:$0xff]  ;;  %3059 = vst [vmem:[#allocation2 + $0xd8] sm:$0xff] %v2995_v12  ;;  %v3001_v41 = vadd.f32 %v2937_v26, %v6528_v13  ;;  %v2940_v63 = vld [vmem:[#allocation2 + $0x98] sm:$0xff]  ;;  %v2941_v33 = vld [vmem:[#allocation2 + $0x120] sm:$0xff] }
 0x419   : > { %v2998_v31 = vadd.f32 %v2934_v49, %v6527_v3  ;;  %v2938_v48 = vld [vmem:[#allocation2 + $0x110] sm:$0xff]  ;;  %3060 = vst [vmem:[#allocation2 + $0x18] sm:$0xff] %v2996_v54  ;;  %v3004_v30 = vadd.f32 %v2940_v63, %v6108_v55  ;;  %v2943_v37 = vld [vmem:[#allocation2 + $0x108] sm:$0xff]  ;;  %v6530_v42 = vld [vmem:[#allocation37_spill] sm:$0xff] }
 0x41a   : > { %3061 = vst [vmem:[#allocation2 + $0x50] sm:$0xff] %v2997_v23  ;;  %v3002_v40 = vadd.f32 %v2938_v48, %v6529_v39  ;;  %v2942_v50 = vld [vmem:[#allocation2 + $0x150] sm:$0xff]  ;;  %v3005_v53 = vadd.f32 %v2941_v33, %v6530_v42  ;;  %v2944_v15 = vld [vmem:[#allocation2 + $0x60] sm:$0xff]  ;;  %v3007_v22 = vadd.f32 %v2943_v37, %v6012_v25  ;;  %v2946_v61 = vld [vmem:[#allocation2 + $0x188] sm:$0xff] }
 0x41b   : > { %3062 = vst [vmem:[#allocation2 + $0x168] sm:$0xff] %v2998_v31  ;;  %v6531_v58 = vld [vmem:[#allocation19_spill] sm:$0xff]  ;;  %v2945_v18 = vld [vmem:[#allocation2 + $0xe0] sm:$0xff]  ;;  %v3008_v21 = vadd.f32 %v2944_v15, %v6111_v43  ;;  %v2947_v47 = vld [vmem:[#allocation2 + $0x138] sm:$0xff] }
 0x41c   : > { %3063 = vst [vmem:[#allocation2 + $0x130] sm:$0xff] %v2999_v0  ;;  %v3006_v19 = vadd.f32 %v2942_v50, %v6531_v58  ;;  %v6532_v52 = vld [vmem:[#allocation38_spill] sm:$0xff]  ;;  %v6533_v44 = vld [vmem:[#allocation20_spill] sm:$0xff]  ;;  %v3011_v54 = vadd.f32 %v2947_v47, %v6017_v2  ;;  %v6534_v23 = vld [vmem:[#allocation39_spill] sm:$0xff] }
 0x41d   : > { %3064 = vst [vmem:[#allocation2 + $0x48] sm:$0xff] %v3000_v45  ;;  %v3009_v55 = vadd.f32 %v2945_v18, %v6532_v52  ;;  %v2948_v12 = vld [vmem:[#allocation2 + $0x140] sm:$0xff]  ;;  %v3010_v7 = vadd.f32 %v2946_v61, %v6533_v44  ;;  %v2950_v34 = vld [vmem:[#allocation2 + $0x1a8] sm:$0xff]  ;;  %v2951_v10 = vld [vmem:[#allocation2 + $0x1b8] sm:$0xff] }
 0x41e   : > { %3065 = vst [vmem:[#allocation2 + $0x180] sm:$0xff] %v3001_v41  ;;  %v2949_v49 = vld [vmem:[#allocation2 + $0x80] sm:$0xff]  ;;  %v3012_v25 = vadd.f32 %v2948_v12, %v6114_v60  ;;  %v2952_v17 = vld [vmem:[#allocation2 + $0x28] sm:$0xff]  ;;  %v3015_v0 = vadd.f32 %v2951_v10, %v6026_v8  ;;  %v2954_v48 = vld [vmem:[#allocation2 + $0xf8] sm:$0xff] }
 0x41f   : > { %3066 = vst [vmem:[#allocation2 + $0x110] sm:$0xff] %v3002_v40  ;;  %v3013_v43 = vadd.f32 %v2949_v49, %v6534_v23  ;;  %v6535_v3 = vld [vmem:[#allocation21_spill] sm:$0xff]  ;;  %v2953_v26 = vld [vmem:[#allocation2 + $0x1e8] sm:$0xff]  ;;  %v3016_v2 = vadd.f32 %v2952_v17, %v6117_v28  ;;  %v6536_v5 = vld [vmem:[#allocation40_spill] sm:$0xff] }
 0x420   : > { %3067 = vst [vmem:[#allocation2 + $0x118] sm:$0xff] %v3003_v46  ;;  %v3014_v31 = vadd.f32 %v2950_v34, %v6535_v3  ;;  %v2955_v45 = vld [vmem:[#allocation2 + $0x160] sm:$0xff]  ;;  %v3017_v60 = vadd.f32 %v2953_v26, %v6536_v5  ;;  %v2956_v13 = vld [vmem:[#allocation2 + $0x30] sm:$0xff]  ;;  %v2971_v23 = vld [vmem:[#allocation2 + $0xe8] sm:$0xff] }
 0x421   : > { %3068 = vst [vmem:[#allocation2 + $0x98] sm:$0xff] %v3004_v30  ;;  %v6537_v41 = vld [vmem:[#allocation22_spill] sm:$0xff]  ;;  %v3019_v40 = vadd.f32 %v2955_v45, %v6031_v62  ;;  %v3020_v8 = vadd.f32 %v2956_v13, %v6120_v32  ;;  %v2959_v46 = vld [vmem:[#allocation2 + $0xf0] sm:$0xff]  ;;  %v6538_v50 = vld [vmem:[#allocation41_spill] sm:$0xff] }
 0x422   : > { %3069 = vst [vmem:[#allocation2 + $0x120] sm:$0xff] %v3005_v53  ;;  %v3018_v63 = vadd.f32 %v2954_v48, %v6537_v41  ;;  %v2957_v39 = vld [vmem:[#allocation2 + $0x1e0] sm:$0xff]  ;;  %v2960_v30 = vld [vmem:[#allocation2 + $0x8] sm:$0xff]  ;;  %v3023_v15 = vadd.f32 %v2959_v46, %v6040_v16  ;;  %v2962_v58 = vld [vmem:[#allocation2 + $0x1d0] sm:$0xff] }
 0x423   : > { %3070 = vst [vmem:[#allocation2 + $0x150] sm:$0xff] %v3006_v19  ;;  %v2958_v33 = vld [vmem:[#allocation2] sm:$0xff]  ;;  %v3021_v28 = vadd.f32 %v2957_v39, %v6538_v50  ;;  %v6539_v37 = vld [vmem:[#allocation23_spill] sm:$0xff]  ;;  %v3024_v62 = vadd.f32 %v2960_v30, %v6122_v29  ;;  %v6541_v61 = vld [vmem:[#allocation24_spill] sm:$0xff] }
 0x424   : > { %3071 = vst [vmem:[#allocation2 + $0x108] sm:$0xff] %v3007_v22  ;;  %v3022_v42 = vadd.f32 %v2958_v33, %v6539_v37  ;;  %v2961_v53 = vld [vmem:[#allocation2 + $0x148] sm:$0xff]  ;;  %v2963_v19 = vld [vmem:[#allocation2 + $0x100] sm:$0xff]  ;;  %v2970_v10 = vld [vmem:[#allocation2 + $0x1f0] sm:$0xff] }
 0x425   : > { %3072 = vst [vmem:[#allocation2 + $0x60] sm:$0xff] %v3008_v21  ;;  %v6540_v18 = vld [vmem:[#allocation42_spill] sm:$0xff]  ;;  %v3026_v21 = vadd.f32 %v2962_v58, %v6541_v61  ;;  %v3027_v52 = vadd.f32 %v2963_v19, %v6045_v27  ;;  %v6542_v44 = vld [vmem:[#allocation43_spill] sm:$0xff]  ;;  %v6543_v49 = vld [vmem:[#allocation25_spill] sm:$0xff] }
 0x426   : > { %3073 = vst [vmem:[#allocation2 + $0xe0] sm:$0xff] %v3009_v55  ;;  %v3025_v32 = vadd.f32 %v2961_v53, %v6540_v18  ;;  %v2964_v22 = vld [vmem:[#allocation2 + $0xc8] sm:$0xff]  ;;  %v2965_v47 = vld [vmem:[#allocation2 + $0x40] sm:$0xff]  ;;  %v2966_v55 = vld [vmem:[#allocation2 + $0x1f8] sm:$0xff] }
 0x427   : > { %3074 = vst [vmem:[#allocation2 + $0x188] sm:$0xff] %v3010_v7  ;;  %v3028_v16 = vadd.f32 %v2964_v22, %v6125_v14  ;;  %v2967_v12 = vld [vmem:[#allocation2 + $0x20] sm:$0xff]  ;;  %v3029_v29 = vadd.f32 %v2965_v47, %v6542_v44  ;;  %v2968_v7 = vld [vmem:[#allocation2 + $0x128] sm:$0xff]  ;;  %v2972_v17 = vld [vmem:[#allocation2 + $0x78] sm:$0xff] }
 0x428   : > { %3075 = vst [vmem:[#allocation2 + $0x138] sm:$0xff] %v3011_v54  ;;  %v3030_v54 = vadd.f32 %v2966_v55, %v6543_v49  ;;  %v2969_v34 = vld [vmem:[#allocation2 + $0x1a0] sm:$0xff]  ;;  %v3032_v27 = vadd.f32 %v2968_v7, %v6128_v35  ;;  %v2973_v26 = vld [vmem:[#allocation2 + $0x70] sm:$0xff]  ;;  %v2977_v41 = vld [vmem:[#allocation2 + $0xb8] sm:$0xff] }
 0x429   : > { %3076 = vst [vmem:[#allocation2 + $0x140] sm:$0xff] %v3012_v25  ;;  %v3031_v25 = vadd.f32 %v2967_v12, %v6054_v57  ;;  %v6545_v3 = vld [vmem:[#allocation26_spill] sm:$0xff]  ;;  %v2974_v48 = vld [vmem:[#allocation2 + $0x90] sm:$0xff]  ;;  %v3036_v57 = vadd.f32 %v2972_v17, %v6131_v1  ;;  %v6546_v45 = vld [vmem:[#allocation45_spill] sm:$0xff] }
 0x42a   : > { %3077 = vst [vmem:[#allocation2 + $0x80] sm:$0xff] %v3013_v43  ;;  %v6544_v43 = vld [vmem:[#allocation44_spill] sm:$0xff]  ;;  %v3037_v35 = vadd.f32 %v2973_v26, %v6546_v45  ;;  %v2978_v39 = vld [vmem:[#allocation2 + $0x88] sm:$0xff]  ;;  %v6551_v58 = vld [vmem:[#allocation29_spill] sm:$0xff] }
 0x42b   : > { %3078 = vst [vmem:[#allocation2 + $0x1a8] sm:$0xff] %v3014_v31  ;;  %v3033_v14 = vadd.f32 %v2969_v34, %v6544_v43  ;;  %v3034_v31 = vadd.f32 %v2970_v10, %v6545_v3  ;;  %v2976_v5 = vld [vmem:[#allocation2 + $0xd0] sm:$0xff]  ;;  %v6548_v33 = vld [vmem:[#allocation46_spill] sm:$0xff]  ;;  %v2982_v37 = vld [vmem:[#allocation2 + $0x178] sm:$0xff] }
 0x42c   : > { %3079 = vst [vmem:[#allocation2 + $0x1b8] sm:$0xff] %v3015_v0  ;;  %v3035_v0 = vadd.f32 %v2971_v23, %v6059_v9  ;;  %v3040_v9 = vadd.f32 %v2976_v5, %v6134_v4  ;;  %v3041_v1 = vadd.f32 %v2977_v41, %v6548_v33  ;;  %v6549_v46 = vld [vmem:[#allocation28_spill] sm:$0xff]  ;;  %v6550_v53 = vld [vmem:[#allocation47_spill] sm:$0xff]  ;;  %v2987_v22 = vld [vmem:[#allocation2 + $0xc0] sm:$0xff] }
 0x42d   : > { %3080 = vst [vmem:[#allocation2 + $0x28] sm:$0xff] %v3016_v2  ;;  %v2975_v2 = vld [vmem:[#allocation2 + $0x1d8] sm:$0xff]  ;;  %v3042_v50 = vadd.f32 %v2978_v39, %v6549_v46  ;;  %v6553_v47 = vld [vmem:[#allocation30_spill] sm:$0xff]  ;;  %v2990_v12 = vld [vmem:[#allocation2 + $0x10] sm:$0xff] }
 0x42e   : > { %3081 = vst [vmem:[#allocation2 + $0x1e8] sm:$0xff] %v3017_v60  ;;  %v6547_v60 = vld [vmem:[#allocation27_spill] sm:$0xff]  ;;  %v2985_v19 = vld [vmem:[#allocation2 + $0x198] sm:$0xff]  ;;  %v2992_v7 = vld [vmem:[#allocation2 + $0xa0] sm:$0xff] }
 0x42f   : > { %3082 = vst [vmem:[#allocation2 + $0xf8] sm:$0xff] %v3018_v63  ;;  %v3038_v13 = vadd.f32 %v2974_v48, %v6547_v60  ;;  %v3039_v63 = vadd.f32 %v2975_v2, %v6068_v24  ;;  %v6552_v61 = vld [vmem:[#allocation48_spill] sm:$0xff]  ;;  %v6555_v49 = vld [vmem:[#allocation31_spill] sm:$0xff] }
 0x430   : > { %3083 = vst [vmem:[#allocation2 + $0x160] sm:$0xff] %v3019_v40  ;;  %v2979_v40 = vld [vmem:[#allocation2 + $0xa8] sm:$0xff]  ;;  %v2989_v55 = vld [vmem:[#allocation2 + $0x158] sm:$0xff] }
 0x431   : > { %3084 = vst [vmem:[#allocation2 + $0x30] sm:$0xff] %v3020_v8  ;;  %v2980_v8 = vld [vmem:[#allocation2 + $0x1c8] sm:$0xff]  ;;  %v3043_v30 = vadd.f32 %v2979_v40, %v6073_v36  ;;  %v2991_v44 = vld [vmem:[#allocation2 + $0x58] sm:$0xff] }
 0x432   : > { %3085 = vst [vmem:[#allocation2 + $0x1e0] sm:$0xff] %v3021_v28  ;;  %v2981_v28 = vld [vmem:[#allocation2 + $0x170] sm:$0xff]  ;;  %v3044_v24 = vadd.f32 %v2980_v8, %v6137_v59  ;;  %v3049_v59 = vadd.f32 %v2985_v19, %v6552_v61  ;;  %v3055_v34 = vadd.f32 %v2991_v44, %v6096_v20 }
 0x433   : > { %3086 = vst [vmem:[#allocation2] sm:$0xff] %v3022_v42  ;;  %v2983_v42 = vld [vmem:[#allocation2 + $0x68] sm:$0xff]  ;;  %v3045_v4 = vadd.f32 %v2981_v28, %v6550_v53 }
 0x434   : > { %3087 = vst [vmem:[#allocation2 + $0xf0] sm:$0xff] %v3023_v15  ;;  %v2984_v15 = vld [vmem:[#allocation2 + $0x190] sm:$0xff]  ;;  %v3047_v18 = vadd.f32 %v2983_v42, %v6082_v6 }
 0x435   : > { %3088 = vst [vmem:[#allocation2 + $0x8] sm:$0xff] %v3024_v62  ;;  %v3046_v62 = vadd.f32 %v2982_v37, %v6551_v58  ;;  %v3048_v36 = vadd.f32 %v2984_v15, %v6140_v38 }
 0x436   : > { %3089 = vst [vmem:[#allocation2 + $0x148] sm:$0xff] %v3025_v32  ;;  %v2986_v32 = vld [vmem:[#allocation2 + $0x38] sm:$0xff] }
 0x437   : > { %3090 = vst [vmem:[#allocation2 + $0x1d0] sm:$0xff] %v3026_v21  ;;  %v2988_v21 = vld [vmem:[#allocation2 + $0x1c0] sm:$0xff] }
 0x438   : > { %3091 = vst [vmem:[#allocation2 + $0x100] sm:$0xff] %v3027_v52  ;;  %v3050_v52 = vadd.f32 %v2986_v32, %v6553_v47  ;;  %v3052_v6 = vadd.f32 %v2988_v21, %v6143_v11 }
 0x439   : > { %3092 = vst [vmem:[#allocation2 + $0xc8] sm:$0xff] %v3028_v16  ;;  %v3051_v16 = vadd.f32 %v2987_v22, %v6087_v56 }
 0x43a   : > { %3093 = vst [vmem:[#allocation2 + $0x40] sm:$0xff] %v3029_v29  ;;  %v6554_v29 = vld [vmem:[#allocation49_spill] sm:$0xff] }
 0x43b   : > { %3094 = vst [vmem:[#allocation2 + $0x1f8] sm:$0xff] %v3030_v54  ;;  %v3053_v38 = vadd.f32 %v2989_v55, %v6554_v29  ;;  %v3054_v54 = vadd.f32 %v2990_v12, %v6555_v49 }
 0x43c   : > { %3095 = vst [vmem:[#allocation2 + $0x20] sm:$0xff] %v3031_v25  ;;  %v3056_v25 = vadd.f32 %v2992_v7, %v6146_v51 }
 0x43d   : > { %3096 = vst [vmem:[#allocation2 + $0x128] sm:$0xff] %v3032_v27 }
 0x43e   : > { %3097 = vst [vmem:[#allocation2 + $0x1a0] sm:$0xff] %v3033_v14 }
 0x43f   : > { %3098 = vst [vmem:[#allocation2 + $0x1f0] sm:$0xff] %v3034_v31 }
 0x440   : > { %3099 = vst [vmem:[#allocation2 + $0xe8] sm:$0xff] %v3035_v0 }
 0x441   : > { %3100 = vst [vmem:[#allocation2 + $0x78] sm:$0xff] %v3036_v57 }
 0x442   : > { %3101 = vst [vmem:[#allocation2 + $0x70] sm:$0xff] %v3037_v35 }
 0x443   : > { %3102 = vst [vmem:[#allocation2 + $0x90] sm:$0xff] %v3038_v13 }
 0x444   : > { %3103 = vst [vmem:[#allocation2 + $0x1d8] sm:$0xff] %v3039_v63 }
 0x445   : > { %3104 = vst [vmem:[#allocation2 + $0xd0] sm:$0xff] %v3040_v9 }
 0x446   : > { %3105 = vst [vmem:[#allocation2 + $0xb8] sm:$0xff] %v3041_v1 }
 0x447   : > { %3106 = vst [vmem:[#allocation2 + $0x88] sm:$0xff] %v3042_v50 }
 0x448   : > { %3107 = vst [vmem:[#allocation2 + $0xa8] sm:$0xff] %v3043_v30 }
 0x449   : > { %3108 = vst [vmem:[#allocation2 + $0x1c8] sm:$0xff] %v3044_v24 }
 0x44a   : > { %3109 = vst [vmem:[#allocation2 + $0x170] sm:$0xff] %v3045_v4 }
 0x44b   : > { %3110 = vst [vmem:[#allocation2 + $0x178] sm:$0xff] %v3046_v62 }
 0x44c   : > { %3111 = vst [vmem:[#allocation2 + $0x68] sm:$0xff] %v3047_v18 }
 0x44d   : > { %3112 = vst [vmem:[#allocation2 + $0x190] sm:$0xff] %v3048_v36 }
 0x44e   : > { %3113 = vst [vmem:[#allocation2 + $0x198] sm:$0xff] %v3049_v59 }
 0x44f   : > { %3114 = vst [vmem:[#allocation2 + $0x38] sm:$0xff] %v3050_v52 }
 0x450   : > { %3115 = vst [vmem:[#allocation2 + $0xc0] sm:$0xff] %v3051_v16 }
 0x451   : > { %3116 = vst [vmem:[#allocation2 + $0x1c0] sm:$0xff] %v3052_v6 }
 0x452   : > { %3117 = vst [vmem:[#allocation2 + $0x158] sm:$0xff] %v3053_v38 }
 0x453   : > { %3118 = vst [vmem:[#allocation2 + $0x10] sm:$0xff] %v3054_v54 }
 0x454   : > { %3119 = vst [vmem:[#allocation2 + $0x58] sm:$0xff] %v3055_v34 }
 0x455   : > { %3120 = vst [vmem:[#allocation2 + $0xa0] sm:$0xff] %v3056_v25 }
 0x456 PF: > { %p4400_p3 = scmp.ne.s32.totalorder %s4910_s15, 4 }
 0x458   : > { %3124 = sbr.rel (%p4400_p3) target bundleno = 1186 (0x4a2), region = 56 }
 0x45d   : > { %v3125_v56 = vld [vmem:[#allocation2 + $0xb0] sm:$0xff]  ;;  %v3189_v11 = vld [vmem:[#allocation8] sm:$0xf]  ;;  %v3127_v43 = vld [vmem:[#allocation2 + $0xd8] sm:$0xff] }
 0x45e   : > { %v3126_v10 = vld [vmem:[#allocation2 + $0x1b0] sm:$0xff]  ;;  %v6279_v27 = vperm.slane %v3189_v11, 0  ;;  %v6281_v23 = vperm.slane %v3189_v11, 1  ;;  %v6283_v20 = vperm.slane %v3189_v11, 2  ;;  %v3128_v14 = vld [vmem:[#allocation2 + $0x18] sm:$0xff]  ;;  %v6285_v51 = vperm.slane %v3189_v11, 3 }
 0x45f   : > { %v3129_v17 = vld [vmem:[#allocation2 + $0x50] sm:$0xff]  ;;  %v3130_v0 = vld [vmem:[#allocation2 + $0x168] sm:$0xff]  ;;  %v3133_v5 = vld [vmem:[#allocation2 + $0x180] sm:$0xff] }
 0x460   : > { %v3199_v3 = vadd.f32 %v6279_v27, %v3125_v56  ;;  %v3200_v31 = vadd.f32 %v6281_v23, %v3126_v10  ;;  %v3201_v26 = vadd.f32 %v6283_v20, %v3127_v43  ;;  %v3202_v48 = vadd.f32 %v6285_v51, %v3128_v14  ;;  %v3131_v57 = vld [vmem:[#allocation2 + $0x130] sm:$0xff]  ;;  %v3132_v45 = vld [vmem:[#allocation2 + $0x48] sm:$0xff]  ;;  %v3135_v63 = vld [vmem:[#allocation2 + $0x118] sm:$0xff] }
 0x461   : > { %v3203_v2 = vadd.f32 %v6279_v27, %v3129_v17  ;;  %v3204_v35 = vadd.f32 %v6281_v23, %v3130_v0  ;;  %v3205_v60 = vadd.f32 %v6283_v20, %v3131_v57  ;;  %v3134_v13 = vld [vmem:[#allocation2 + $0x110] sm:$0xff]  ;;  %v3206_v41 = vadd.f32 %v6285_v51, %v3132_v45  ;;  %v3136_v9 = vld [vmem:[#allocation2 + $0x98] sm:$0xff]  ;;  %v3137_v33 = vld [vmem:[#allocation2 + $0x120] sm:$0xff] }
 0x462   : > { %3263 = vst [vmem:[#allocation9] sm:$0xff] %v3199_v3  ;;  %v3207_v39 = vadd.f32 %v6279_v27, %v3133_v5  ;;  %v3208_v40 = vadd.f32 %v6281_v23, %v3134_v13  ;;  %v3209_v1 = vadd.f32 %v6283_v20, %v3135_v63  ;;  %v3138_v8 = vld [vmem:[#allocation2 + $0x150] sm:$0xff]  ;;  %v3210_v46 = vadd.f32 %v6285_v51, %v3136_v9  ;;  %v3139_v50 = vld [vmem:[#allocation2 + $0x108] sm:$0xff]  ;;  %v3140_v30 = vld [vmem:[#allocation2 + $0x60] sm:$0xff] }
 0x463   : > { %3264 = vst [vmem:[#allocation9 + $0x8] sm:$0xff] %v3200_v31  ;;  %v3211_v28 = vadd.f32 %v6279_v27, %v3137_v33  ;;  %v3212_v37 = vadd.f32 %v6281_v23, %v3138_v8  ;;  %v3141_v24 = vld [vmem:[#allocation2 + $0xe0] sm:$0xff]  ;;  %v3213_v42 = vadd.f32 %v6283_v20, %v3139_v50  ;;  %v3142_v53 = vld [vmem:[#allocation2 + $0x188] sm:$0xff]  ;;  %v3214_v4 = vadd.f32 %v6285_v51, %v3140_v30  ;;  %v3143_v15 = vld [vmem:[#allocation2 + $0x138] sm:$0xff] }
 0x464   : > { %3265 = vst [vmem:[#allocation9 + $0x10] sm:$0xff] %v3201_v26  ;;  %v3215_v58 = vadd.f32 %v6279_v27, %v3141_v24  ;;  %v3144_v62 = vld [vmem:[#allocation2 + $0x140] sm:$0xff]  ;;  %v3216_v19 = vadd.f32 %v6281_v23, %v3142_v53  ;;  %v3217_v32 = vadd.f32 %v6283_v20, %v3143_v15  ;;  %v3146_v36 = vld [vmem:[#allocation2 + $0x1a8] sm:$0xff]  ;;  %v3147_v61 = vld [vmem:[#allocation2 + $0x1b8] sm:$0xff] }
 0x465   : > { %3266 = vst [vmem:[#allocation9 + $0x18] sm:$0xff] %v3202_v48  ;;  %v3145_v18 = vld [vmem:[#allocation2 + $0x80] sm:$0xff]  ;;  %v3218_v22 = vadd.f32 %v6285_v51, %v3144_v62  ;;  %v3148_v21 = vld [vmem:[#allocation2 + $0x28] sm:$0xff]  ;;  %v3220_v47 = vadd.f32 %v6281_v23, %v3146_v36  ;;  %v3221_v55 = vadd.f32 %v6283_v20, %v3147_v61  ;;  %v3150_v16 = vld [vmem:[#allocation2 + $0xf8] sm:$0xff] }
 0x466   : > { %3267 = vst [vmem:[#allocation9 + $0x20] sm:$0xff] %v3203_v2  ;;  %v3219_v59 = vadd.f32 %v6279_v27, %v3145_v18  ;;  %v3149_v52 = vld [vmem:[#allocation2 + $0x1e8] sm:$0xff]  ;;  %v3222_v12 = vadd.f32 %v6285_v51, %v3148_v21  ;;  %v3151_v6 = vld [vmem:[#allocation2 + $0x160] sm:$0xff]  ;;  %v3152_v29 = vld [vmem:[#allocation2 + $0x30] sm:$0xff]  ;;  %v3224_v38 = vadd.f32 %v6281_v23, %v3150_v16 }
 0x467   : > { %3268 = vst [vmem:[#allocation9 + $0x28] sm:$0xff] %v3204_v35  ;;  %v3223_v44 = vadd.f32 %v6279_v27, %v3149_v52  ;;  %v3153_v7 = vld [vmem:[#allocation2 + $0x1e0] sm:$0xff]  ;;  %v3225_v49 = vadd.f32 %v6283_v20, %v3151_v6  ;;  %v3226_v34 = vadd.f32 %v6285_v51, %v3152_v29  ;;  %v3155_v25 = vld [vmem:[#allocation2 + $0xf0] sm:$0xff]  ;;  %v3156_v11 = vld [vmem:[#allocation2 + $0x8] sm:$0xff] }
 0x468   : > { %3269 = vst [vmem:[#allocation9 + $0x30] sm:$0xff] %v3205_v60  ;;  %v3154_v54 = vld [vmem:[#allocation2] sm:$0xff]  ;;  %v3227_v56 = vadd.f32 %v6279_v27, %v3153_v7  ;;  %v3157_v43 = vld [vmem:[#allocation2 + $0x148] sm:$0xff]  ;;  %v3229_v14 = vadd.f32 %v6283_v20, %v3155_v25  ;;  %v3158_v17 = vld [vmem:[#allocation2 + $0x1d0] sm:$0xff]  ;;  %v3230_v3 = vadd.f32 %v6285_v51, %v3156_v11 }
 0x469   : > { %3270 = vst [vmem:[#allocation9 + $0x38] sm:$0xff] %v3206_v41  ;;  %v3228_v10 = vadd.f32 %v6281_v23, %v3154_v54  ;;  %v3159_v31 = vld [vmem:[#allocation2 + $0x100] sm:$0xff]  ;;  %v3231_v26 = vadd.f32 %v6279_v27, %v3157_v43  ;;  %v3160_v0 = vld [vmem:[#allocation2 + $0xc8] sm:$0xff]  ;;  %v3232_v48 = vadd.f32 %v6281_v23, %v3158_v17  ;;  %v3162_v45 = vld [vmem:[#allocation2 + $0x1f8] sm:$0xff] }
 0x46a   : > { %3271 = vst [vmem:[#allocation9 + $0x40] sm:$0xff] %v3207_v39  ;;  %v3161_v57 = vld [vmem:[#allocation2 + $0x40] sm:$0xff]  ;;  %v3233_v2 = vadd.f32 %v6283_v20, %v3159_v31  ;;  %v3234_v35 = vadd.f32 %v6285_v51, %v3160_v0  ;;  %v3164_v13 = vld [vmem:[#allocation2 + $0x128] sm:$0xff]  ;;  %v3236_v41 = vadd.f32 %v6281_v23, %v3162_v45  ;;  %v3166_v9 = vld [vmem:[#allocation2 + $0x1f0] sm:$0xff] }
 0x46b   : > { %3272 = vst [vmem:[#allocation9 + $0x48] sm:$0xff] %v3208_v40  ;;  %v3163_v5 = vld [vmem:[#allocation2 + $0x20] sm:$0xff]  ;;  %v3235_v60 = vadd.f32 %v6279_v27, %v3161_v57  ;;  %v3238_v40 = vadd.f32 %v6285_v51, %v3164_v13  ;;  %v3167_v33 = vld [vmem:[#allocation2 + $0xe8] sm:$0xff]  ;;  %v3168_v8 = vld [vmem:[#allocation2 + $0x78] sm:$0xff] }
 0x46c   : > { %3273 = vst [vmem:[#allocation9 + $0x50] sm:$0xff] %v3209_v1  ;;  %v3165_v63 = vld [vmem:[#allocation2 + $0x1a0] sm:$0xff]  ;;  %v3237_v39 = vadd.f32 %v6283_v20, %v3163_v5  ;;  %v3169_v50 = vld [vmem:[#allocation2 + $0x70] sm:$0xff]  ;;  %v3171_v24 = vld [vmem:[#allocation2 + $0x1d8] sm:$0xff] }
 0x46d   : > { %3274 = vst [vmem:[#allocation9 + $0x58] sm:$0xff] %v3210_v46  ;;  %v3239_v1 = vadd.f32 %v6279_v27, %v3165_v63  ;;  %v3240_v46 = vadd.f32 %v6281_v23, %v3166_v9  ;;  %v3170_v30 = vld [vmem:[#allocation2 + $0x90] sm:$0xff]  ;;  %v3173_v15 = vld [vmem:[#allocation2 + $0xb8] sm:$0xff]  ;;  %v3174_v62 = vld [vmem:[#allocation2 + $0x88] sm:$0xff] }
 0x46e   : > { %3275 = vst [vmem:[#allocation9 + $0x60] sm:$0xff] %v3211_v28  ;;  %v3241_v28 = vadd.f32 %v6283_v20, %v3167_v33  ;;  %v3172_v53 = vld [vmem:[#allocation2 + $0xd0] sm:$0xff]  ;;  %v3175_v18 = vld [vmem:[#allocation2 + $0xa8] sm:$0xff]  ;;  %v3178_v21 = vld [vmem:[#allocation2 + $0x178] sm:$0xff] }
 0x46f   : > { %3276 = vst [vmem:[#allocation9 + $0x68] sm:$0xff] %v3212_v37  ;;  %v3242_v37 = vadd.f32 %v6285_v51, %v3168_v8  ;;  %v3176_v36 = vld [vmem:[#allocation2 + $0x1c8] sm:$0xff]  ;;  %v3177_v61 = vld [vmem:[#allocation2 + $0x170] sm:$0xff]  ;;  %v3181_v6 = vld [vmem:[#allocation2 + $0x198] sm:$0xff] }
 0x470   : > { %3277 = vst [vmem:[#allocation9 + $0x70] sm:$0xff] %v3213_v42  ;;  %v3243_v42 = vadd.f32 %v6279_v27, %v3169_v50  ;;  %v3179_v52 = vld [vmem:[#allocation2 + $0x68] sm:$0xff]  ;;  %v3180_v16 = vld [vmem:[#allocation2 + $0x190] sm:$0xff]  ;;  %v3182_v29 = vld [vmem:[#allocation2 + $0x38] sm:$0xff] }
 0x471   : > { %3278 = vst [vmem:[#allocation9 + $0x78] sm:$0xff] %v3214_v4  ;;  %v3244_v4 = vadd.f32 %v6281_v23, %v3170_v30  ;;  %v3183_v7 = vld [vmem:[#allocation2 + $0xc0] sm:$0xff]  ;;  %v3185_v25 = vld [vmem:[#allocation2 + $0x158] sm:$0xff]  ;;  %v3186_v11 = vld [vmem:[#allocation2 + $0x10] sm:$0xff] }
 0x472   : > { %3279 = vst [vmem:[#allocation9 + $0x80] sm:$0xff] %v3215_v58  ;;  %v3245_v58 = vadd.f32 %v6283_v20, %v3171_v24  ;;  %v3184_v54 = vld [vmem:[#allocation2 + $0x1c0] sm:$0xff]  ;;  %v3187_v43 = vld [vmem:[#allocation2 + $0x58] sm:$0xff] }
 0x473   : > { %3280 = vst [vmem:[#allocation9 + $0x88] sm:$0xff] %v3216_v19  ;;  %v3246_v19 = vadd.f32 %v6285_v51, %v3172_v53  ;;  %v3188_v17 = vld [vmem:[#allocation2 + $0xa0] sm:$0xff]  ;;  %v3261_v31 = vadd.f32 %v6283_v20, %v3187_v43 }
 0x474   : > { %3281 = vst [vmem:[#allocation9 + $0x90] sm:$0xff] %v3217_v32  ;;  %v3247_v32 = vadd.f32 %v6279_v27, %v3173_v15 }
 0x475   : > { %3282 = vst [vmem:[#allocation9 + $0x98] sm:$0xff] %v3218_v22  ;;  %v3248_v22 = vadd.f32 %v6281_v23, %v3174_v62 }
 0x476   : > { %3283 = vst [vmem:[#allocation9 + $0xa0] sm:$0xff] %v3219_v59  ;;  %v3249_v59 = vadd.f32 %v6283_v20, %v3175_v18 }
 0x477   : > { %3284 = vst [vmem:[#allocation9 + $0xa8] sm:$0xff] %v3220_v47  ;;  %v3250_v47 = vadd.f32 %v6285_v51, %v3176_v36 }
 0x478   : > { %3285 = vst [vmem:[#allocation9 + $0xb0] sm:$0xff] %v3221_v55  ;;  %v3251_v55 = vadd.f32 %v6279_v27, %v3177_v61 }
 0x479   : > { %3286 = vst [vmem:[#allocation9 + $0xb8] sm:$0xff] %v3222_v12  ;;  %v3252_v12 = vadd.f32 %v6281_v23, %v3178_v21 }
 0x47a   : > { %3287 = vst [vmem:[#allocation9 + $0xc0] sm:$0xff] %v3223_v44  ;;  %v3253_v44 = vadd.f32 %v6283_v20, %v3179_v52 }
 0x47b   : > { %3288 = vst [vmem:[#allocation9 + $0xc8] sm:$0xff] %v3224_v38  ;;  %v3254_v38 = vadd.f32 %v6285_v51, %v3180_v16 }
 0x47c   : > { %3289 = vst [vmem:[#allocation9 + $0xd0] sm:$0xff] %v3225_v49  ;;  %v3255_v49 = vadd.f32 %v6279_v27, %v3181_v6 }
 0x47d   : > { %3290 = vst [vmem:[#allocation9 + $0xd8] sm:$0xff] %v3226_v34  ;;  %v3256_v34 = vadd.f32 %v6281_v23, %v3182_v29 }
 0x47e   : > { %3291 = vst [vmem:[#allocation9 + $0xe0] sm:$0xff] %v3227_v56  ;;  %v3257_v56 = vadd.f32 %v6283_v20, %v3183_v7 }
 0x47f   : > { %3292 = vst [vmem:[#allocation9 + $0xe8] sm:$0xff] %v3228_v10  ;;  %v3258_v10 = vadd.f32 %v6285_v51, %v3184_v54 }
 0x480   : > { %3293 = vst [vmem:[#allocation9 + $0xf0] sm:$0xff] %v3229_v14  ;;  %v3259_v14 = vadd.f32 %v6279_v27, %v3185_v25 }
 0x481   : > { %3294 = vst [vmem:[#allocation9 + $0xf8] sm:$0xff] %v3230_v3  ;;  %v3260_v3 = vadd.f32 %v6281_v23, %v3186_v11 }
 0x482   : > { %3295 = vst [vmem:[#allocation9 + $0x100] sm:$0xff] %v3231_v26  ;;  %v3262_v26 = vadd.f32 %v6285_v51, %v3188_v17 }
 0x483   : > { %3296 = vst [vmem:[#allocation9 + $0x108] sm:$0xff] %v3232_v48 }
 0x484   : > { %3297 = vst [vmem:[#allocation9 + $0x110] sm:$0xff] %v3233_v2 }
 0x485   : > { %3298 = vst [vmem:[#allocation9 + $0x118] sm:$0xff] %v3234_v35 }
 0x486   : > { %3299 = vst [vmem:[#allocation9 + $0x120] sm:$0xff] %v3235_v60 }
 0x487   : > { %3300 = vst [vmem:[#allocation9 + $0x128] sm:$0xff] %v3236_v41 }
 0x488   : > { %3301 = vst [vmem:[#allocation9 + $0x130] sm:$0xff] %v3237_v39 }
 0x489   : > { %3302 = vst [vmem:[#allocation9 + $0x138] sm:$0xff] %v3238_v40 }
 0x48a   : > { %3303 = vst [vmem:[#allocation9 + $0x140] sm:$0xff] %v3239_v1 }
 0x48b   : > { %3304 = vst [vmem:[#allocation9 + $0x148] sm:$0xff] %v3240_v46 }
 0x48c   : > { %3305 = vst [vmem:[#allocation9 + $0x150] sm:$0xff] %v3241_v28 }
 0x48d   : > { %3306 = vst [vmem:[#allocation9 + $0x158] sm:$0xff] %v3242_v37 }
 0x48e   : > { %3307 = vst [vmem:[#allocation9 + $0x160] sm:$0xff] %v3243_v42 }
 0x48f   : > { %3308 = vst [vmem:[#allocation9 + $0x168] sm:$0xff] %v3244_v4 }
 0x490   : > { %3309 = vst [vmem:[#allocation9 + $0x170] sm:$0xff] %v3245_v58 }
 0x491   : > { %3310 = vst [vmem:[#allocation9 + $0x178] sm:$0xff] %v3246_v19 }
 0x492   : > { %3311 = vst [vmem:[#allocation9 + $0x180] sm:$0xff] %v3247_v32 }
 0x493   : > { %3312 = vst [vmem:[#allocation9 + $0x188] sm:$0xff] %v3248_v22 }
 0x494   : > { %3313 = vst [vmem:[#allocation9 + $0x190] sm:$0xff] %v3249_v59 }
 0x495   : > { %3314 = vst [vmem:[#allocation9 + $0x198] sm:$0xff] %v3250_v47 }
 0x496   : > { %3315 = vst [vmem:[#allocation9 + $0x1a0] sm:$0xff] %v3251_v55 }
 0x497   : > { %3316 = vst [vmem:[#allocation9 + $0x1a8] sm:$0xff] %v3252_v12 }
 0x498   : > { %3317 = vst [vmem:[#allocation9 + $0x1b0] sm:$0xff] %v3253_v44 }
 0x499   : > { %3318 = vst [vmem:[#allocation9 + $0x1b8] sm:$0xff] %v3254_v38 }
 0x49a   : > { %3319 = vst [vmem:[#allocation9 + $0x1c0] sm:$0xff] %v3255_v49 }
 0x49b   : > { %3320 = vst [vmem:[#allocation9 + $0x1c8] sm:$0xff] %v3256_v34 }
 0x49c   : > { %3321 = vst [vmem:[#allocation9 + $0x1d0] sm:$0xff] %v3257_v56 }
 0x49d   : > { %3322 = vst [vmem:[#allocation9 + $0x1d8] sm:$0xff] %v3258_v10 }
 0x49e   : > { %3323 = vst [vmem:[#allocation9 + $0x1e0] sm:$0xff] %v3259_v14 }
 0x49f   : > { %3324 = vst [vmem:[#allocation9 + $0x1e8] sm:$0xff] %v3260_v3 }
 0x4a0   : > { %3325 = vst [vmem:[#allocation9 + $0x1f0] sm:$0xff] %v3261_v31 }
 0x4a1   : > { %3326 = vst [vmem:[#allocation9 + $0x1f8] sm:$0xff] %v3262_v26 }
 0x4a2 PF: > { %p4679_p4 = scmp.eq.s32.totalorder %s4978_s18, 4  ;;  %s3338_s20 = sshll.u32 %s6376_s3, 4  ;;  %s3339_s20 = int_to_ptr.hbm [resolvable:$true] %s3338_s20 }
 0x4a3   : > { %s4926_s22 = smov [#allocation9]   ;;  %s4927_s24 = smov 512  }
 0x4a4   : > { %s3336_s23 = sshll.u32 %s4926_s22, 4  ;;  %s4928_s26 = smov 32   ;;  %s3337_s23 = int_to_ptr.vmem [resolvable:$true] %s3336_s23 }
 0x4a5   : > { %4660 = dma.vmem_to_hbm [thread:$0]  (%p4679_p4), %s3337_s23, 8192, %s3339_s20, [#allocation5], %s4927_s24, %s4927_s24, %s4928_s26  }
 0x4a6   : > { %4893 = dma.done.wait (%p4679_p4), [#allocation5], 8192  }
 0x4a7   : > { %4895 = vsyncadd (%p4679_p4), [#allocation5], 4294959104 }
 0x4a8 PF: > { %s18_s17 = sadd.s32 1, %s4918_s17   ;;  %s6556_s12 = smov %s4902_s13 }
 0x4a9   : > { %p15_p5 = scmp.ge.s32.totalorder %s18_s17, 7   ;;  %s6557_s13 = smov %s4906_s14 }
 0x4aa   : > { %s6558_s14 = smov %s5033_s4  ;;  %s6559_s15 = smov %s4914_s16 }
 0x4ab   : > { %s6560_s16 = smov %s6562_s10  ;;  %17 = sbr.rel (!%p15_p5) target bundleno = 6 (0x6), region = 93 }
 0x4b0   :  { %3355 = vsyncpa [#allocation4], 1 }
 0x4b1   :  { %3357 = vsyncpa [#allocation4 + $0x1], 1 }
 0x4b2   :  { %3358 = vsyncpa [#allocation7], 1 }
 0x4b3   :  { %3360 = vsyncpa [#allocation7 + $0x1], 1 }
 0x4b4   :  { %3361 = vsyncpa [#allocation5], 1 }
 0x4b5   :  { %3363 = vsyncpa [#allocation5 + $0x1], 1 }

</bundles_post_ra>
